<compile_context>
chip_gen: v7x
topology: tpu7x:2x2x1
jax: 0.10.0
libtpu: 0.0.40
codegen_flags: <defaults>
</compile_context>

<pallas_src>
import functools

import jax
import jax.numpy as jnp
from jax.experimental import pallas as pl
from jax.experimental.pallas import tpu as pltpu


# ----------------------------------------------------------------------------
# Fused kernel: all GRU layers + FC head in one invocation (grid = ()).
# Ref order: x_flat, then per layer (w_ih_t, w_hh_t, b_comb, b_hn),
# then fc_w_t, fc_b, then out_ref, then the VMEM scratch for inter-layer
# activations.
# ----------------------------------------------------------------------------
def _gru_model_kernel(*refs, seq_len, batch_p, hidden_p, num_layers):
    T, Bp, Hp = seq_len, batch_p, hidden_p
    n_in = 1 + 4 * num_layers + 2

    x_ref = refs[0]
    fcw_ref = refs[n_in - 2]                        # (Hp, Cp)
    fcb_ref = refs[n_in - 1]                        # (1, Cp)
    out_ref = refs[n_in]                            # (Bp, Cp)
    xbuf = refs[n_in + 1]                           # VMEM scratch (T*Bp, Hp)

    h = None
    for l in range(num_layers):
        wih = refs[1 + 4 * l][...]                  # (D_in_p, 3*Hp)
        whh = refs[2 + 4 * l][...]                  # (Hp, 3*Hp)
        bcomb = refs[3 + 4 * l][...]                # (1, 3*Hp) = [bir+bhr | biz+bhz | bin]
        bhn = refs[4 + 4 * l][...]                  # (1, Hp)

        # Layer input sequence: original x for layer 0, previous layer's hidden
        # states (time-major rows, VMEM scratch) otherwise.
        x = x_ref[...] if l == 0 else xbuf[...]

        # Batched input projection for ALL timesteps at once (off the serial path).
        gi_all = jnp.dot(x, wih, preferred_element_type=jnp.float32) + bcomb   # (T*Bp, 3*Hp)

        # Hoist the b_hn broadcast out of the recurrence.
        bhn_b = jnp.broadcast_to(bhn, (Bp, Hp))

        h = jnp.zeros((Bp, Hp), jnp.float32)        # h0 = zeros (matches torch.zeros)
        last_layer = (l == num_layers - 1)
        for t in range(T):                          # static unroll: tile-aligned slices
            gi = gi_all[t * Bp:(t + 1) * Bp, :]     # (Bp, 3*Hp)
            gh = jnp.dot(h, whh, preferred_element_type=jnp.float32)           # (Bp, 3*Hp)

            r = jax.nn.sigmoid(gi[:, 0:Hp] + gh[:, 0:Hp])
            z = jax.nn.sigmoid(gi[:, Hp:2 * Hp] + gh[:, Hp:2 * Hp])
            n = jnp.tanh(gi[:, 2 * Hp:3 * Hp] + r * (gh[:, 2 * Hp:3 * Hp] + bhn_b))
            h = n + z * (h - n)                     # == (1-z)*n + z*h
            if not last_layer:
                xbuf[t * Bp:(t + 1) * Bp, :] = h    # next layer's input row block

    # FC head fused into the same kernel; output is lane-dense (Cp = 128 lanes),
    # padded columns are exactly zero (zero weight cols + zero bias lanes).
    out_ref[...] = (jnp.dot(h, fcw_ref[...], preferred_element_type=jnp.float32)
                    + fcb_ref[...]).astype(out_ref.dtype)


# ----------------------------------------------------------------------------
# Parameter packing: PyTorch layout -> kernel layout (transposed, lane-padded,
# biases fused).  Done once, outside the kernel.
# ----------------------------------------------------------------------------
def _round_up(v, m):
    return ((v + m - 1) // m) * m


def pack_params(params, input_size, hidden_size, num_classes, hidden_p, classes_p):
    H, Hp = hidden_size, hidden_p

    def pad_w(wg, rows_in, rows_p):
        # wg: (H, rows_in) gate weight  ->  (rows_p, Hp) transposed, zero-padded
        out = jnp.zeros((rows_p, Hp), jnp.float32)
        return out.at[:rows_in, :H].set(wg.T)

    def pad_b(b):
        return jnp.zeros((Hp,), jnp.float32).at[:H].set(b)

    packed_layers = []
    for l, layer in enumerate(params["gru_layers"]):
        d_in = input_size if l == 0 else hidden_size
        d_in_p = input_size if l == 0 else hidden_p   # layer>0 input is padded to Hp

        w_ih, w_hh = layer["w_ih"], layer["w_hh"]     # (3H, d_in), (3H, H)
        b_ih, b_hh = layer["b_ih"], layer["b_hh"]     # (3H,), (3H,)

        wr, wz, wn = w_ih[0:H], w_ih[H:2 * H], w_ih[2 * H:3 * H]
        ur, uz, un = w_hh[0:H], w_hh[H:2 * H], w_hh[2 * H:3 * H]
        bir, biz, bin_ = b_ih[0:H], b_ih[H:2 * H], b_ih[2 * H:3 * H]
        bhr, bhz, bhn = b_hh[0:H], b_hh[H:2 * H], b_hh[2 * H:3 * H]

        wih_p = jnp.concatenate(
            [pad_w(wr, d_in, d_in_p), pad_w(wz, d_in, d_in_p), pad_w(wn, d_in, d_in_p)],
            axis=1)                                   # (d_in_p, 3*Hp)
        whh_p = jnp.concatenate(
            [pad_w(ur, H, Hp), pad_w(uz, H, Hp), pad_w(un, H, Hp)], axis=1)   # (Hp, 3*Hp)

        # r/z gate biases fused (b_ir+b_hr, b_iz+b_hz); n gate keeps b_in here,
        # b_hn stays on the recurrent path inside tanh's r*(...) term.
        b_comb = jnp.concatenate(
            [pad_b(bir + bhr), pad_b(biz + bhz), pad_b(bin_)])[None, :]       # (1, 3*Hp)
        b_hn_p = pad_b(bhn)[None, :]                                          # (1, Hp)

        packed_layers.append((wih_p, whh_p, b_comb, b_hn_p))

    # FC head, lane-padded on both input (Hp) and output (classes_p) dims.
    fc_w_t = jnp.zeros((Hp, classes_p), jnp.float32).at[:H, :num_classes].set(params["fc_w"].T)
    fc_b = jnp.zeros((1, classes_p), jnp.float32).at[0, :num_classes].set(params["fc_b"])
    return packed_layers, fc_w_t, fc_b


# ----------------------------------------------------------------------------
# Full model forward (matches GRUModel.forward in eval mode).
# ----------------------------------------------------------------------------
def gru_model_forward(x_btd, packed_layers, fc_w_t, fc_b, *, hidden_p, batch_p,
                      num_classes):
    B, T, D = x_btd.shape
    Bp = batch_p
    Hp = hidden_p
    num_layers = len(packed_layers)
    classes_p = fc_w_t.shape[1]

    # batch_first (B,T,D) -> time-major rows (T*Bp, D), batch padded to 8 sublanes.
    x_tbd = jnp.transpose(x_btd, (1, 0, 2))
    x_tbd = jnp.pad(x_tbd, ((0, 0), (0, Bp - B), (0, 0)))
    x_flat = x_tbd.reshape(T * Bp, D)

    flat_params = [p for layer in packed_layers for p in layer]
    n_inputs = 1 + len(flat_params) + 2

    kernel = functools.partial(_gru_model_kernel, seq_len=T, batch_p=Bp,
                               hidden_p=Hp, num_layers=num_layers)

    out_p = pl.pallas_call(
        kernel,
        out_shape=jax.ShapeDtypeStruct((Bp, classes_p), jnp.float32),
        # Everything whole-array resident in VMEM; no grid (single invocation).
        in_specs=[pl.BlockSpec(memory_space=pltpu.MemorySpace.VMEM)] * n_inputs,
        out_specs=pl.BlockSpec(memory_space=pltpu.MemorySpace.VMEM),
        scratch_shapes=[pltpu.VMEM((T * Bp, Hp), jnp.float32)],   # inter-layer activations
    )(x_flat, *flat_params, fc_w_t, fc_b)

    return out_p[:B, :num_classes]                   # drop padded batch rows / lanes


# ----------------------------------------------------------------------------
# PyTorch-style parameters and a pure-JAX reference for correctness checking.
# ----------------------------------------------------------------------------
def init_params(key, input_size, hidden_size, num_layers, num_classes):
    bound = 1.0 / float(hidden_size) ** 0.5
    layers = []
    for l in range(num_layers):
        d_in = input_size if l == 0 else hidden_size
        key, k1, k2, k3, k4 = jax.random.split(key, 5)
        layers.append({
            "w_ih": jax.random.uniform(k1, (3 * hidden_size, d_in), jnp.float32, -bound, bound),
            "w_hh": jax.random.uniform(k2, (3 * hidden_size, hidden_size), jnp.float32, -bound, bound),
            "b_ih": jax.random.uniform(k3, (3 * hidden_size,), jnp.float32, -bound, bound),
            "b_hh": jax.random.uniform(k4, (3 * hidden_size,), jnp.float32, -bound, bound),
        })
    key, k5, k6 = jax.random.split(key, 3)
    return {
        "gru_layers": layers,
        "fc_w": jax.random.uniform(k5, (num_classes, hidden_size), jnp.float32, -bound, bound),
        "fc_b": jax.random.uniform(k6, (num_classes,), jnp.float32, -bound, bound),
    }


def gru_reference(x_btd, params, hidden_size):
    """Pure-JAX replica of GRUModel.forward (eval mode, dropout = identity)."""
    B, T, _ = x_btd.shape
    H = hidden_size
    x = x_btd
    for layer in params["gru_layers"]:
        w_ih, w_hh, b_ih, b_hh = layer["w_ih"], layer["w_hh"], layer["b_ih"], layer["b_hh"]
        h = jnp.zeros((B, H), jnp.float32)
        outs = []
        for t in range(T):
            gi = x[:, t, :] @ w_ih.T + b_ih
            gh = h @ w_hh.T + b_hh
            r = jax.nn.sigmoid(gi[:, :H] + gh[:, :H])
            z = jax.nn.sigmoid(gi[:, H:2 * H] + gh[:, H:2 * H])
            n = jnp.tanh(gi[:, 2 * H:] + r * gh[:, 2 * H:])
            h = (1.0 - z) * n + z * h
            outs.append(h)
        x = jnp.stack(outs, axis=1)
    return x[:, -1, :] @ params["fc_w"].T + params["fc_b"]


if __name__ == "__main__":
    # Small shapes implied by the module: (batch, seq, input_size)
    B, T = 2, 8
    input_size, hidden_size, num_layers, num_classes = 16, 32, 2, 4
    dropout_rate = 0.1  # identity at inference
    # TODO(synk): training-mode dropout (between GRU layers / on the head input)
    # is not implemented; this is the eval-mode forward pass.

    Hp = max(128, _round_up(hidden_size, 128))   # lane-aligned gate width
    Bp = max(8, _round_up(B, 8))                 # sublane-aligned batch
    Cp = max(128, _round_up(num_classes, 128))   # lane-dense output width

    key = jax.random.PRNGKey(0)
    key, kx = jax.random.split(key)
    x = jax.random.normal(kx, (B, T, input_size), jnp.float32)

    params = init_params(key, input_size, hidden_size, num_layers, num_classes)
    packed_layers, fc_w_t, fc_b = pack_params(params, input_size, hidden_size,
                                              num_classes, Hp, Cp)

    out = gru_model_forward(x, packed_layers, fc_w_t, fc_b, hidden_p=Hp,
                            batch_p=Bp, num_classes=num_classes)
    out = jax.block_until_ready(out)
    assert out.shape == (B, num_classes), out.shape

    ref = gru_reference(x, params, hidden_size)
    assert jnp.all(jnp.isfinite(out))
    assert jnp.allclose(out, ref, rtol=1e-2, atol=1e-2), (out, ref)

    print("KERNEL_OK")
</pallas_src>

<mosaic_0001>
module attributes {stable_mosaic.version = 11 : i64} {
  func.func @_gru_model_kernel(%arg0: memref<64x16xf32, #tpu.memory_space<vmem>>, %arg1: memref<16x384xf32, #tpu.memory_space<vmem>>, %arg2: memref<128x384xf32, #tpu.memory_space<vmem>>, %arg3: memref<1x384xf32, #tpu.memory_space<vmem>>, %arg4: memref<1x128xf32, #tpu.memory_space<vmem>>, %arg5: memref<128x384xf32, #tpu.memory_space<vmem>>, %arg6: memref<128x384xf32, #tpu.memory_space<vmem>>, %arg7: memref<1x384xf32, #tpu.memory_space<vmem>>, %arg8: memref<1x128xf32, #tpu.memory_space<vmem>>, %arg9: memref<128x128xf32, #tpu.memory_space<vmem>>, %arg10: memref<1x128xf32, #tpu.memory_space<vmem>>, %arg11: memref<8x128xf32, #tpu.memory_space<vmem>>, %arg12: memref<64x128xf32, #tpu.memory_space<vmem>>) attributes {dimension_semantics = [], scalar_prefetch = 0 : i64, scratch_operands = 1 : i64, tpu.core_type = #tpu.core_type<tc>} {
    %c0 = arith.constant 0 : index
    %c0_0 = arith.constant 0 : index
    %0 = vector.load %arg1[%c0, %c0_0] : memref<16x384xf32, #tpu.memory_space<vmem>>, vector<16x384xf32>
    %c0_1 = arith.constant 0 : index
    %c0_2 = arith.constant 0 : index
    %1 = vector.load %arg2[%c0_1, %c0_2] : memref<128x384xf32, #tpu.memory_space<vmem>>, vector<128x384xf32>
    %c0_3 = arith.constant 0 : index
    %c0_4 = arith.constant 0 : index
    %2 = vector.load %arg3[%c0_3, %c0_4] : memref<1x384xf32, #tpu.memory_space<vmem>>, vector<1x384xf32>
    %c0_5 = arith.constant 0 : index
    %c0_6 = arith.constant 0 : index
    %3 = vector.load %arg4[%c0_5, %c0_6] : memref<1x128xf32, #tpu.memory_space<vmem>>, vector<1x128xf32>
    %c0_7 = arith.constant 0 : index
    %c0_8 = arith.constant 0 : index
    %4 = vector.load %arg0[%c0_7, %c0_8] : memref<64x16xf32, #tpu.memory_space<vmem>>, vector<64x16xf32>
    %cst = arith.constant dense<0.000000e+00> : vector<64x384xf32>
    %5 = tpu.matmul %4, %0, %cst {dimension_numbers = #tpu.dot_dimension_numbers<[1], [0], [0], [1], [0, 0, 1, 1], [], []>} : vector<64x16xf32>, vector<16x384xf32>, vector<64x384xf32> -> vector<64x384xf32>
    %6 = vector.broadcast %2 : vector<1x384xf32> to vector<64x384xf32>
    %7 = arith.addf %5, %6 : vector<64x384xf32>
    %8 = vector.shape_cast %3 : vector<1x128xf32> to vector<1x128xf32>
    %9 = vector.broadcast %8 : vector<1x128xf32> to vector<8x128xf32>
    %cst_9 = arith.constant 0.000000e+00 : f32
    %10 = vector.broadcast %cst_9 : f32 to vector<8x128xf32>
    %11 = vector.extract_strided_slice %7 {offsets = [0, 0], sizes = [8, 384], strides = [1, 1]} : vector<64x384xf32> to vector<8x384xf32>
    %cst_10 = arith.constant dense<0.000000e+00> : vector<8x384xf32>
    %12 = tpu.matmul %10, %1, %cst_10 {dimension_numbers = #tpu.dot_dimension_numbers<[1], [0], [0], [1], [0, 0, 1, 1], [], []>} : vector<8x128xf32>, vector<128x384xf32>, vector<8x384xf32> -> vector<8x384xf32>
    %13 = vector.extract_strided_slice %11 {offsets = [0, 0], sizes = [8, 128], strides = [1, 1]} : vector<8x384xf32> to vector<8x128xf32>
    %14 = vector.extract_strided_slice %12 {offsets = [0, 0], sizes = [8, 128], strides = [1, 1]} : vector<8x384xf32> to vector<8x128xf32>
    %15 = arith.addf %13, %14 : vector<8x128xf32>
    %16 = arith.negf %15 : vector<8x128xf32>
    %17 = math.exp %16 : vector<8x128xf32>
    %cst_11 = arith.constant 1.000000e+00 : f32
    %18 = vector.broadcast %cst_11 : f32 to vector<8x128xf32>
    %19 = arith.addf %18, %17 : vector<8x128xf32>
    %20 = arith.divf %18, %19 : vector<8x128xf32>
    %21 = vector.extract_strided_slice %11 {offsets = [0, 128], sizes = [8, 128], strides = [1, 1]} : vector<8x384xf32> to vector<8x128xf32>
    %22 = vector.extract_strided_slice %12 {offsets = [0, 128], sizes = [8, 128], strides = [1, 1]} : vector<8x384xf32> to vector<8x128xf32>
    %23 = arith.addf %21, %22 : vector<8x128xf32>
    %24 = arith.negf %23 : vector<8x128xf32>
    %25 = math.exp %24 : vector<8x128xf32>
    %cst_12 = arith.constant 1.000000e+00 : f32
    %26 = vector.broadcast %cst_12 : f32 to vector<8x128xf32>
    %27 = arith.addf %26, %25 : vector<8x128xf32>
    %28 = arith.divf %26, %27 : vector<8x128xf32>
    %29 = vector.extract_strided_slice %11 {offsets = [0, 256], sizes = [8, 128], strides = [1, 1]} : vector<8x384xf32> to vector<8x128xf32>
    %30 = vector.extract_strided_slice %12 {offsets = [0, 256], sizes = [8, 128], strides = [1, 1]} : vector<8x384xf32> to vector<8x128xf32>
    %31 = arith.addf %30, %9 : vector<8x128xf32>
    %32 = arith.mulf %20, %31 : vector<8x128xf32>
    %33 = arith.addf %29, %32 : vector<8x128xf32>
    %34 = math.tanh %33 : vector<8x128xf32>
    %35 = arith.subf %10, %34 : vector<8x128xf32>
    %36 = arith.mulf %28, %35 : vector<8x128xf32>
    %37 = arith.addf %34, %36 : vector<8x128xf32>
    %c0_13 = arith.constant 0 : index
    %c0_14 = arith.constant 0 : index
    %38 = vector.load %arg12[%c0_13, %c0_14] : memref<64x128xf32, #tpu.memory_space<vmem>>, vector<8x128xf32>
    tpu.vector_store %arg12[%c0_13, %c0_14], %37 {strides = array<i32>} : memref<64x128xf32, #tpu.memory_space<vmem>>, vector<8x128xf32>,
    %39 = vector.extract_strided_slice %7 {offsets = [8, 0], sizes = [8, 384], strides = [1, 1]} : vector<64x384xf32> to vector<8x384xf32>
    %cst_15 = arith.constant dense<0.000000e+00> : vector<8x384xf32>
    %40 = tpu.matmul %37, %1, %cst_15 {dimension_numbers = #tpu.dot_dimension_numbers<[1], [0], [0], [1], [0, 0, 1, 1], [], []>} : vector<8x128xf32>, vector<128x384xf32>, vector<8x384xf32> -> vector<8x384xf32>
    %41 = vector.extract_strided_slice %39 {offsets = [0, 0], sizes = [8, 128], strides = [1, 1]} : vector<8x384xf32> to vector<8x128xf32>
    %42 = vector.extract_strided_slice %40 {offsets = [0, 0], sizes = [8, 128], strides = [1, 1]} : vector<8x384xf32> to vector<8x128xf32>
    %43 = arith.addf %41, %42 : vector<8x128xf32>
    %44 = arith.negf %43 : vector<8x128xf32>
    %45 = math.exp %44 : vector<8x128xf32>
    %cst_16 = arith.constant 1.000000e+00 : f32
    %46 = vector.broadcast %cst_16 : f32 to vector<8x128xf32>
    %47 = arith.addf %46, %45 : vector<8x128xf32>
    %48 = arith.divf %46, %47 : vector<8x128xf32>
    %49 = vector.extract_strided_slice %39 {offsets = [0, 128], sizes = [8, 128], strides = [1, 1]} : vector<8x384xf32> to vector<8x128xf32>
    %50 = vector.extract_strided_slice %40 {offsets = [0, 128], sizes = [8, 128], strides = [1, 1]} : vector<8x384xf32> to vector<8x128xf32>
    %51 = arith.addf %49, %50 : vector<8x128xf32>
    %52 = arith.negf %51 : vector<8x128xf32>
    %53 = math.exp %52 : vector<8x128xf32>
    %cst_17 = arith.constant 1.000000e+00 : f32
    %54 = vector.broadcast %cst_17 : f32 to vector<8x128xf32>
    %55 = arith.addf %54, %53 : vector<8x128xf32>
    %56 = arith.divf %54, %55 : vector<8x128xf32>
    %57 = vector.extract_strided_slice %39 {offsets = [0, 256], sizes = [8, 128], strides = [1, 1]} : vector<8x384xf32> to vector<8x128xf32>
    %58 = vector.extract_strided_slice %40 {offsets = [0, 256], sizes = [8, 128], strides = [1, 1]} : vector<8x384xf32> to vector<8x128xf32>
    %59 = arith.addf %58, %9 : vector<8x128xf32>
    %60 = arith.mulf %48, %59 : vector<8x128xf32>
    %61 = arith.addf %57, %60 : vector<8x128xf32>
    %62 = math.tanh %61 : vector<8x128xf32>
    %63 = arith.subf %37, %62 : vector<8x128xf32>
    %64 = arith.mulf %56, %63 : vector<8x128xf32>
    %65 = arith.addf %62, %64 : vector<8x128xf32>
    %c8 = arith.constant 8 : index
    %c0_18 = arith.constant 0 : index
    %66 = vector.load %arg12[%c8, %c0_18] : memref<64x128xf32, #tpu.memory_space<vmem>>, vector<8x128xf32>
    tpu.vector_store %arg12[%c8, %c0_18], %65 {strides = array<i32>} : memref<64x128xf32, #tpu.memory_space<vmem>>, vector<8x128xf32>,
    %67 = vector.extract_strided_slice %7 {offsets = [16, 0], sizes = [8, 384], strides = [1, 1]} : vector<64x384xf32> to vector<8x384xf32>
    %cst_19 = arith.constant dense<0.000000e+00> : vector<8x384xf32>
    %68 = tpu.matmul %65, %1, %cst_19 {dimension_numbers = #tpu.dot_dimension_numbers<[1], [0], [0], [1], [0, 0, 1, 1], [], []>} : vector<8x128xf32>, vector<128x384xf32>, vector<8x384xf32> -> vector<8x384xf32>
    %69 = vector.extract_strided_slice %67 {offsets = [0, 0], sizes = [8, 128], strides = [1, 1]} : vector<8x384xf32> to vector<8x128xf32>
    %70 = vector.extract_strided_slice %68 {offsets = [0, 0], sizes = [8, 128], strides = [1, 1]} : vector<8x384xf32> to vector<8x128xf32>
    %71 = arith.addf %69, %70 : vector<8x128xf32>
    %72 = arith.negf %71 : vector<8x128xf32>
    %73 = math.exp %72 : vector<8x128xf32>
    %cst_20 = arith.constant 1.000000e+00 : f32
    %74 = vector.broadcast %cst_20 : f32 to vector<8x128xf32>
    %75 = arith.addf %74, %73 : vector<8x128xf32>
    %76 = arith.divf %74, %75 : vector<8x128xf32>
    %77 = vector.extract_strided_slice %67 {offsets = [0, 128], sizes = [8, 128], strides = [1, 1]} : vector<8x384xf32> to vector<8x128xf32>
    %78 = vector.extract_strided_slice %68 {offsets = [0, 128], sizes = [8, 128], strides = [1, 1]} : vector<8x384xf32> to vector<8x128xf32>
    %79 = arith.addf %77, %78 : vector<8x128xf32>
    %80 = arith.negf %79 : vector<8x128xf32>
    %81 = math.exp %80 : vector<8x128xf32>
    %cst_21 = arith.constant 1.000000e+00 : f32
    %82 = vector.broadcast %cst_21 : f32 to vector<8x128xf32>
    %83 = arith.addf %82, %81 : vector<8x128xf32>
    %84 = arith.divf %82, %83 : vector<8x128xf32>
    %85 = vector.extract_strided_slice %67 {offsets = [0, 256], sizes = [8, 128], strides = [1, 1]} : vector<8x384xf32> to vector<8x128xf32>
    %86 = vector.extract_strided_slice %68 {offsets = [0, 256], sizes = [8, 128], strides = [1, 1]} : vector<8x384xf32> to vector<8x128xf32>
    %87 = arith.addf %86, %9 : vector<8x128xf32>
    %88 = arith.mulf %76, %87 : vector<8x128xf32>
    %89 = arith.addf %85, %88 : vector<8x128xf32>
    %90 = math.tanh %89 : vector<8x128xf32>
    %91 = arith.subf %65, %90 : vector<8x128xf32>
    %92 = arith.mulf %84, %91 : vector<8x128xf32>
    %93 = arith.addf %90, %92 : vector<8x128xf32>
    %c16 = arith.constant 16 : index
    %c0_22 = arith.constant 0 : index
    %94 = vector.load %arg12[%c16, %c0_22] : memref<64x128xf32, #tpu.memory_space<vmem>>, vector<8x128xf32>
    tpu.vector_store %arg12[%c16, %c0_22], %93 {strides = array<i32>} : memref<64x128xf32, #tpu.memory_space<vmem>>, vector<8x128xf32>,
    %95 = vector.extract_strided_slice %7 {offsets = [24, 0], sizes = [8, 384], strides = [1, 1]} : vector<64x384xf32> to vector<8x384xf32>
    %cst_23 = arith.constant dense<0.000000e+00> : vector<8x384xf32>
    %96 = tpu.matmul %93, %1, %cst_23 {dimension_numbers = #tpu.dot_dimension_numbers<[1], [0], [0], [1], [0, 0, 1, 1], [], []>} : vector<8x128xf32>, vector<128x384xf32>, vector<8x384xf32> -> vector<8x384xf32>
    %97 = vector.extract_strided_slice %95 {offsets = [0, 0], sizes = [8, 128], strides = [1, 1]} : vector<8x384xf32> to vector<8x128xf32>
    %98 = vector.extract_strided_slice %96 {offsets = [0, 0], sizes = [8, 128], strides = [1, 1]} : vector<8x384xf32> to vector<8x128xf32>
    %99 = arith.addf %97, %98 : vector<8x128xf32>
    %100 = arith.negf %99 : vector<8x128xf32>
    %101 = math.exp %100 : vector<8x128xf32>
    %cst_24 = arith.constant 1.000000e+00 : f32
    %102 = vector.broadcast %cst_24 : f32 to vector<8x128xf32>
    %103 = arith.addf %102, %101 : vector<8x128xf32>
    %104 = arith.divf %102, %103 : vector<8x128xf32>
    %105 = vector.extract_strided_slice %95 {offsets = [0, 128], sizes = [8, 128], strides = [1, 1]} : vector<8x384xf32> to vector<8x128xf32>
    %106 = vector.extract_strided_slice %96 {offsets = [0, 128], sizes = [8, 128], strides = [1, 1]} : vector<8x384xf32> to vector<8x128xf32>
    %107 = arith.addf %105, %106 : vector<8x128xf32>
    %108 = arith.negf %107 : vector<8x128xf32>
    %109 = math.exp %108 : vector<8x128xf32>
    %cst_25 = arith.constant 1.000000e+00 : f32
    %110 = vector.broadcast %cst_25 : f32 to vector<8x128xf32>
    %111 = arith.addf %110, %109 : vector<8x128xf32>
    %112 = arith.divf %110, %111 : vector<8x128xf32>
    %113 = vector.extract_strided_slice %95 {offsets = [0, 256], sizes = [8, 128], strides = [1, 1]} : vector<8x384xf32> to vector<8x128xf32>
    %114 = vector.extract_strided_slice %96 {offsets = [0, 256], sizes = [8, 128], strides = [1, 1]} : vector<8x384xf32> to vector<8x128xf32>
    %115 = arith.addf %114, %9 : vector<8x128xf32>
    %116 = arith.mulf %104, %115 : vector<8x128xf32>
    %117 = arith.addf %113, %116 : vector<8x128xf32>
    %118 = math.tanh %117 : vector<8x128xf32>
    %119 = arith.subf %93, %118 : vector<8x128xf32>
    %120 = arith.mulf %112, %119 : vector<8x128xf32>
    %121 = arith.addf %118, %120 : vector<8x128xf32>
    %c24 = arith.constant 24 : index
    %c0_26 = arith.constant 0 : index
    %122 = vector.load %arg12[%c24, %c0_26] : memref<64x128xf32, #tpu.memory_space<vmem>>, vector<8x128xf32>
    tpu.vector_store %arg12[%c24, %c0_26], %121 {strides = array<i32>} : memref<64x128xf32, #tpu.memory_space<vmem>>, vector<8x128xf32>,
    %123 = vector.extract_strided_slice %7 {offsets = [32, 0], sizes = [8, 384], strides = [1, 1]} : vector<64x384xf32> to vector<8x384xf32>
    %cst_27 = arith.constant dense<0.000000e+00> : vector<8x384xf32>
    %124 = tpu.matmul %121, %1, %cst_27 {dimension_numbers = #tpu.dot_dimension_numbers<[1], [0], [0], [1], [0, 0, 1, 1], [], []>} : vector<8x128xf32>, vector<128x384xf32>, vector<8x384xf32> -> vector<8x384xf32>
    %125 = vector.extract_strided_slice %123 {offsets = [0, 0], sizes = [8, 128], strides = [1, 1]} : vector<8x384xf32> to vector<8x128xf32>
    %126 = vector.extract_strided_slice %124 {offsets = [0, 0], sizes = [8, 128], strides = [1, 1]} : vector<8x384xf32> to vector<8x128xf32>
    %127 = arith.addf %125, %126 : vector<8x128xf32>
    %128 = arith.negf %127 : vector<8x128xf32>
    %129 = math.exp %128 : vector<8x128xf32>
    %cst_28 = arith.constant 1.000000e+00 : f32
    %130 = vector.broadcast %cst_28 : f32 to vector<8x128xf32>
    %131 = arith.addf %130, %129 : vector<8x128xf32>
    %132 = arith.divf %130, %131 : vector<8x128xf32>
    %133 = vector.extract_strided_slice %123 {offsets = [0, 128], sizes = [8, 128], strides = [1, 1]} : vector<8x384xf32> to vector<8x128xf32>
    %134 = vector.extract_strided_slice %124 {offsets = [0, 128], sizes = [8, 128], strides = [1, 1]} : vector<8x384xf32> to vector<8x128xf32>
    %135 = arith.addf %133, %134 : vector<8x128xf32>
    %136 = arith.negf %135 : vector<8x128xf32>
    %137 = math.exp %136 : vector<8x128xf32>
    %cst_29 = arith.constant 1.000000e+00 : f32
    %138 = vector.broadcast %cst_29 : f32 to vector<8x128xf32>
    %139 = arith.addf %138, %137 : vector<8x128xf32>
    %140 = arith.divf %138, %139 : vector<8x128xf32>
    %141 = vector.extract_strided_slice %123 {offsets = [0, 256], sizes = [8, 128], strides = [1, 1]} : vector<8x384xf32> to vector<8x128xf32>
    %142 = vector.extract_strided_slice %124 {offsets = [0, 256], sizes = [8, 128], strides = [1, 1]} : vector<8x384xf32> to vector<8x128xf32>
    %143 = arith.addf %142, %9 : vector<8x128xf32>
    %144 = arith.mulf %132, %143 : vector<8x128xf32>
    %145 = arith.addf %141, %144 : vector<8x128xf32>
    %146 = math.tanh %145 : vector<8x128xf32>
    %147 = arith.subf %121, %146 : vector<8x128xf32>
    %148 = arith.mulf %140, %147 : vector<8x128xf32>
    %149 = arith.addf %146, %148 : vector<8x128xf32>
    %c32 = arith.constant 32 : index
    %c0_30 = arith.constant 0 : index
    %150 = vector.load %arg12[%c32, %c0_30] : memref<64x128xf32, #tpu.memory_space<vmem>>, vector<8x128xf32>
    tpu.vector_store %arg12[%c32, %c0_30], %149 {strides = array<i32>} : memref<64x128xf32, #tpu.memory_space<vmem>>, vector<8x128xf32>,
    %151 = vector.extract_strided_slice %7 {offsets = [40, 0], sizes = [8, 384], strides = [1, 1]} : vector<64x384xf32> to vector<8x384xf32>
    %cst_31 = arith.constant dense<0.000000e+00> : vector<8x384xf32>
    %152 = tpu.matmul %149, %1, %cst_31 {dimension_numbers = #tpu.dot_dimension_numbers<[1], [0], [0], [1], [0, 0, 1, 1], [], []>} : vector<8x128xf32>, vector<128x384xf32>, vector<8x384xf32> -> vector<8x384xf32>
    %153 = vector.extract_strided_slice %151 {offsets = [0, 0], sizes = [8, 128], strides = [1, 1]} : vector<8x384xf32> to vector<8x128xf32>
    %154 = vector.extract_strided_slice %152 {offsets = [0, 0], sizes = [8, 128], strides = [1, 1]} : vector<8x384xf32> to vector<8x128xf32>
    %155 = arith.addf %153, %154 : vector<8x128xf32>
    %156 = arith.negf %155 : vector<8x128xf32>
    %157 = math.exp %156 : vector<8x128xf32>
    %cst_32 = arith.constant 1.000000e+00 : f32
    %158 = vector.broadcast %cst_32 : f32 to vector<8x128xf32>
    %159 = arith.addf %158, %157 : vector<8x128xf32>
    %160 = arith.divf %158, %159 : vector<8x128xf32>
    %161 = vector.extract_strided_slice %151 {offsets = [0, 128], sizes = [8, 128], strides = [1, 1]} : vector<8x384xf32> to vector<8x128xf32>
    %162 = vector.extract_strided_slice %152 {offsets = [0, 128], sizes = [8, 128], strides = [1, 1]} : vector<8x384xf32> to vector<8x128xf32>
    %163 = arith.addf %161, %162 : vector<8x128xf32>
    %164 = arith.negf %163 : vector<8x128xf32>
    %165 = math.exp %164 : vector<8x128xf32>
    %cst_33 = arith.constant 1.000000e+00 : f32
    %166 = vector.broadcast %cst_33 : f32 to vector<8x128xf32>
    %167 = arith.addf %166, %165 : vector<8x128xf32>
    %168 = arith.divf %166, %167 : vector<8x128xf32>
    %169 = vector.extract_strided_slice %151 {offsets = [0, 256], sizes = [8, 128], strides = [1, 1]} : vector<8x384xf32> to vector<8x128xf32>
    %170 = vector.extract_strided_slice %152 {offsets = [0, 256], sizes = [8, 128], strides = [1, 1]} : vector<8x384xf32> to vector<8x128xf32>
    %171 = arith.addf %170, %9 : vector<8x128xf32>
    %172 = arith.mulf %160, %171 : vector<8x128xf32>
    %173 = arith.addf %169, %172 : vector<8x128xf32>
    %174 = math.tanh %173 : vector<8x128xf32>
    %175 = arith.subf %149, %174 : vector<8x128xf32>
    %176 = arith.mulf %168, %175 : vector<8x128xf32>
    %177 = arith.addf %174, %176 : vector<8x128xf32>
    %c40 = arith.constant 40 : index
    %c0_34 = arith.constant 0 : index
    %178 = vector.load %arg12[%c40, %c0_34] : memref<64x128xf32, #tpu.memory_space<vmem>>, vector<8x128xf32>
    tpu.vector_store %arg12[%c40, %c0_34], %177 {strides = array<i32>} : memref<64x128xf32, #tpu.memory_space<vmem>>, vector<8x128xf32>,
    %179 = vector.extract_strided_slice %7 {offsets = [48, 0], sizes = [8, 384], strides = [1, 1]} : vector<64x384xf32> to vector<8x384xf32>
    %cst_35 = arith.constant dense<0.000000e+00> : vector<8x384xf32>
    %180 = tpu.matmul %177, %1, %cst_35 {dimension_numbers = #tpu.dot_dimension_numbers<[1], [0], [0], [1], [0, 0, 1, 1], [], []>} : vector<8x128xf32>, vector<128x384xf32>, vector<8x384xf32> -> vector<8x384xf32>
    %181 = vector.extract_strided_slice %179 {offsets = [0, 0], sizes = [8, 128], strides = [1, 1]} : vector<8x384xf32> to vector<8x128xf32>
    %182 = vector.extract_strided_slice %180 {offsets = [0, 0], sizes = [8, 128], strides = [1, 1]} : vector<8x384xf32> to vector<8x128xf32>
    %183 = arith.addf %181, %182 : vector<8x128xf32>
    %184 = arith.negf %183 : vector<8x128xf32>
    %185 = math.exp %184 : vector<8x128xf32>
    %cst_36 = arith.constant 1.000000e+00 : f32
    %186 = vector.broadcast %cst_36 : f32 to vector<8x128xf32>
    %187 = arith.addf %186, %185 : vector<8x128xf32>
    %188 = arith.divf %186, %187 : vector<8x128xf32>
    %189 = vector.extract_strided_slice %179 {offsets = [0, 128], sizes = [8, 128], strides = [1, 1]} : vector<8x384xf32> to vector<8x128xf32>
    %190 = vector.extract_strided_slice %180 {offsets = [0, 128], sizes = [8, 128], strides = [1, 1]} : vector<8x384xf32> to vector<8x128xf32>
    %191 = arith.addf %189, %190 : vector<8x128xf32>
    %192 = arith.negf %191 : vector<8x128xf32>
    %193 = math.exp %192 : vector<8x128xf32>
    %cst_37 = arith.constant 1.000000e+00 : f32
    %194 = vector.broadcast %cst_37 : f32 to vector<8x128xf32>
    %195 = arith.addf %194, %193 : vector<8x128xf32>
    %196 = arith.divf %194, %195 : vector<8x128xf32>
    %197 = vector.extract_strided_slice %179 {offsets = [0, 256], sizes = [8, 128], strides = [1, 1]} : vector<8x384xf32> to vector<8x128xf32>
    %198 = vector.extract_strided_slice %180 {offsets = [0, 256], sizes = [8, 128], strides = [1, 1]} : vector<8x384xf32> to vector<8x128xf32>
    %199 = arith.addf %198, %9 : vector<8x128xf32>
    %200 = arith.mulf %188, %199 : vector<8x128xf32>
    %201 = arith.addf %197, %200 : vector<8x128xf32>
    %202 = math.tanh %201 : vector<8x128xf32>
    %203 = arith.subf %177, %202 : vector<8x128xf32>
    %204 = arith.mulf %196, %203 : vector<8x128xf32>
    %205 = arith.addf %202, %204 : vector<8x128xf32>
    %c48 = arith.constant 48 : index
    %c0_38 = arith.constant 0 : index
    %206 = vector.load %arg12[%c48, %c0_38] : memref<64x128xf32, #tpu.memory_space<vmem>>, vector<8x128xf32>
    tpu.vector_store %arg12[%c48, %c0_38], %205 {strides = array<i32>} : memref<64x128xf32, #tpu.memory_space<vmem>>, vector<8x128xf32>,
    %207 = vector.extract_strided_slice %7 {offsets = [56, 0], sizes = [8, 384], strides = [1, 1]} : vector<64x384xf32> to vector<8x384xf32>
    %cst_39 = arith.constant dense<0.000000e+00> : vector<8x384xf32>
    %208 = tpu.matmul %205, %1, %cst_39 {dimension_numbers = #tpu.dot_dimension_numbers<[1], [0], [0], [1], [0, 0, 1, 1], [], []>} : vector<8x128xf32>, vector<128x384xf32>, vector<8x384xf32> -> vector<8x384xf32>
    %209 = vector.extract_strided_slice %207 {offsets = [0, 0], sizes = [8, 128], strides = [1, 1]} : vector<8x384xf32> to vector<8x128xf32>
    %210 = vector.extract_strided_slice %208 {offsets = [0, 0], sizes = [8, 128], strides = [1, 1]} : vector<8x384xf32> to vector<8x128xf32>
    %211 = arith.addf %209, %210 : vector<8x128xf32>
    %212 = arith.negf %211 : vector<8x128xf32>
    %213 = math.exp %212 : vector<8x128xf32>
    %cst_40 = arith.constant 1.000000e+00 : f32
    %214 = vector.broadcast %cst_40 : f32 to vector<8x128xf32>
    %215 = arith.addf %214, %213 : vector<8x128xf32>
    %216 = arith.divf %214, %215 : vector<8x128xf32>
    %217 = vector.extract_strided_slice %207 {offsets = [0, 128], sizes = [8, 128], strides = [1, 1]} : vector<8x384xf32> to vector<8x128xf32>
    %218 = vector.extract_strided_slice %208 {offsets = [0, 128], sizes = [8, 128], strides = [1, 1]} : vector<8x384xf32> to vector<8x128xf32>
    %219 = arith.addf %217, %218 : vector<8x128xf32>
    %220 = arith.negf %219 : vector<8x128xf32>
    %221 = math.exp %220 : vector<8x128xf32>
    %cst_41 = arith.constant 1.000000e+00 : f32
    %222 = vector.broadcast %cst_41 : f32 to vector<8x128xf32>
    %223 = arith.addf %222, %221 : vector<8x128xf32>
    %224 = arith.divf %222, %223 : vector<8x128xf32>
    %225 = vector.extract_strided_slice %207 {offsets = [0, 256], sizes = [8, 128], strides = [1, 1]} : vector<8x384xf32> to vector<8x128xf32>
    %226 = vector.extract_strided_slice %208 {offsets = [0, 256], sizes = [8, 128], strides = [1, 1]} : vector<8x384xf32> to vector<8x128xf32>
    %227 = arith.addf %226, %9 : vector<8x128xf32>
    %228 = arith.mulf %216, %227 : vector<8x128xf32>
    %229 = arith.addf %225, %228 : vector<8x128xf32>
    %230 = math.tanh %229 : vector<8x128xf32>
    %231 = arith.subf %205, %230 : vector<8x128xf32>
    %232 = arith.mulf %224, %231 : vector<8x128xf32>
    %233 = arith.addf %230, %232 : vector<8x128xf32>
    %c56 = arith.constant 56 : index
    %c0_42 = arith.constant 0 : index
    %234 = vector.load %arg12[%c56, %c0_42] : memref<64x128xf32, #tpu.memory_space<vmem>>, vector<8x128xf32>
    tpu.vector_store %arg12[%c56, %c0_42], %233 {strides = array<i32>} : memref<64x128xf32, #tpu.memory_space<vmem>>, vector<8x128xf32>,
    %c0_43 = arith.constant 0 : index
    %c0_44 = arith.constant 0 : index
    %235 = vector.load %arg5[%c0_43, %c0_44] : memref<128x384xf32, #tpu.memory_space<vmem>>, vector<128x384xf32>
    %c0_45 = arith.constant 0 : index
    %c0_46 = arith.constant 0 : index
    %236 = vector.load %arg6[%c0_45, %c0_46] : memref<128x384xf32, #tpu.memory_space<vmem>>, vector<128x384xf32>
    %c0_47 = arith.constant 0 : index
    %c0_48 = arith.constant 0 : index
    %237 = vector.load %arg7[%c0_47, %c0_48] : memref<1x384xf32, #tpu.memory_space<vmem>>, vector<1x384xf32>
    %c0_49 = arith.constant 0 : index
    %c0_50 = arith.constant 0 : index
    %238 = vector.load %arg8[%c0_49, %c0_50] : memref<1x128xf32, #tpu.memory_space<vmem>>, vector<1x128xf32>
    %c0_51 = arith.constant 0 : index
    %c0_52 = arith.constant 0 : index
    %239 = vector.load %arg12[%c0_51, %c0_52] : memref<64x128xf32, #tpu.memory_space<vmem>>, vector<64x128xf32>
    %cst_53 = arith.constant dense<0.000000e+00> : vector<64x384xf32>
    %240 = tpu.matmul %239, %235, %cst_53 {dimension_numbers = #tpu.dot_dimension_numbers<[1], [0], [0], [1], [0, 0, 1, 1], [], []>} : vector<64x128xf32>, vector<128x384xf32>, vector<64x384xf32> -> vector<64x384xf32>
    %241 = vector.broadcast %237 : vector<1x384xf32> to vector<64x384xf32>
    %242 = arith.addf %240, %241 : vector<64x384xf32>
    %243 = vector.shape_cast %238 : vector<1x128xf32> to vector<1x128xf32>
    %244 = vector.broadcast %243 : vector<1x128xf32> to vector<8x128xf32>
    %cst_54 = arith.constant 0.000000e+00 : f32
    %245 = vector.broadcast %cst_54 : f32 to vector<8x128xf32>
    %246 = vector.extract_strided_slice %242 {offsets = [0, 0], sizes = [8, 384], strides = [1, 1]} : vector<64x384xf32> to vector<8x384xf32>
    %cst_55 = arith.constant dense<0.000000e+00> : vector<8x384xf32>
    %247 = tpu.matmul %245, %236, %cst_55 {dimension_numbers = #tpu.dot_dimension_numbers<[1], [0], [0], [1], [0, 0, 1, 1], [], []>} : vector<8x128xf32>, vector<128x384xf32>, vector<8x384xf32> -> vector<8x384xf32>
    %248 = vector.extract_strided_slice %246 {offsets = [0, 0], sizes = [8, 128], strides = [1, 1]} : vector<8x384xf32> to vector<8x128xf32>
    %249 = vector.extract_strided_slice %247 {offsets = [0, 0], sizes = [8, 128], strides = [1, 1]} : vector<8x384xf32> to vector<8x128xf32>
    %250 = arith.addf %248, %249 : vector<8x128xf32>
    %251 = arith.negf %250 : vector<8x128xf32>
    %252 = math.exp %251 : vector<8x128xf32>
    %cst_56 = arith.constant 1.000000e+00 : f32
    %253 = vector.broadcast %cst_56 : f32 to vector<8x128xf32>
    %254 = arith.addf %253, %252 : vector<8x128xf32>
    %255 = arith.divf %253, %254 : vector<8x128xf32>
    %256 = vector.extract_strided_slice %246 {offsets = [0, 128], sizes = [8, 128], strides = [1, 1]} : vector<8x384xf32> to vector<8x128xf32>
    %257 = vector.extract_strided_slice %247 {offsets = [0, 128], sizes = [8, 128], strides = [1, 1]} : vector<8x384xf32> to vector<8x128xf32>
    %258 = arith.addf %256, %257 : vector<8x128xf32>
    %259 = arith.negf %258 : vector<8x128xf32>
    %260 = math.exp %259 : vector<8x128xf32>
    %cst_57 = arith.constant 1.000000e+00 : f32
    %261 = vector.broadcast %cst_57 : f32 to vector<8x128xf32>
    %262 = arith.addf %261, %260 : vector<8x128xf32>
    %263 = arith.divf %261, %262 : vector<8x128xf32>
    %264 = vector.extract_strided_slice %246 {offsets = [0, 256], sizes = [8, 128], strides = [1, 1]} : vector<8x384xf32> to vector<8x128xf32>
    %265 = vector.extract_strided_slice %247 {offsets = [0, 256], sizes = [8, 128], strides = [1, 1]} : vector<8x384xf32> to vector<8x128xf32>
    %266 = arith.addf %265, %244 : vector<8x128xf32>
    %267 = arith.mulf %255, %266 : vector<8x128xf32>
    %268 = arith.addf %264, %267 : vector<8x128xf32>
    %269 = math.tanh %268 : vector<8x128xf32>
    %270 = arith.subf %245, %269 : vector<8x128xf32>
    %271 = arith.mulf %263, %270 : vector<8x128xf32>
    %272 = arith.addf %269, %271 : vector<8x128xf32>
    %273 = vector.extract_strided_slice %242 {offsets = [8, 0], sizes = [8, 384], strides = [1, 1]} : vector<64x384xf32> to vector<8x384xf32>
    %cst_58 = arith.constant dense<0.000000e+00> : vector<8x384xf32>
    %274 = tpu.matmul %272, %236, %cst_58 {dimension_numbers = #tpu.dot_dimension_numbers<[1], [0], [0], [1], [0, 0, 1, 1], [], []>} : vector<8x128xf32>, vector<128x384xf32>, vector<8x384xf32> -> vector<8x384xf32>
    %275 = vector.extract_strided_slice %273 {offsets = [0, 0], sizes = [8, 128], strides = [1, 1]} : vector<8x384xf32> to vector<8x128xf32>
    %276 = vector.extract_strided_slice %274 {offsets = [0, 0], sizes = [8, 128], strides = [1, 1]} : vector<8x384xf32> to vector<8x128xf32>
    %277 = arith.addf %275, %276 : vector<8x128xf32>
    %278 = arith.negf %277 : vector<8x128xf32>
    %279 = math.exp %278 : vector<8x128xf32>
    %cst_59 = arith.constant 1.000000e+00 : f32
    %280 = vector.broadcast %cst_59 : f32 to vector<8x128xf32>
    %281 = arith.addf %280, %279 : vector<8x128xf32>
    %282 = arith.divf %280, %281 : vector<8x128xf32>
    %283 = vector.extract_strided_slice %273 {offsets = [0, 128], sizes = [8, 128], strides = [1, 1]} : vector<8x384xf32> to vector<8x128xf32>
    %284 = vector.extract_strided_slice %274 {offsets = [0, 128], sizes = [8, 128], strides = [1, 1]} : vector<8x384xf32> to vector<8x128xf32>
    %285 = arith.addf %283, %284 : vector<8x128xf32>
    %286 = arith.negf %285 : vector<8x128xf32>
    %287 = math.exp %286 : vector<8x128xf32>
    %cst_60 = arith.constant 1.000000e+00 : f32
    %288 = vector.broadcast %cst_60 : f32 to vector<8x128xf32>
    %289 = arith.addf %288, %287 : vector<8x128xf32>
    %290 = arith.divf %288, %289 : vector<8x128xf32>
    %291 = vector.extract_strided_slice %273 {offsets = [0, 256], sizes = [8, 128], strides = [1, 1]} : vector<8x384xf32> to vector<8x128xf32>
    %292 = vector.extract_strided_slice %274 {offsets = [0, 256], sizes = [8, 128], strides = [1, 1]} : vector<8x384xf32> to vector<8x128xf32>
    %293 = arith.addf %292, %244 : vector<8x128xf32>
    %294 = arith.mulf %282, %293 : vector<8x128xf32>
    %295 = arith.addf %291, %294 : vector<8x128xf32>
    %296 = math.tanh %295 : vector<8x128xf32>
    %297 = arith.subf %272, %296 : vector<8x128xf32>
    %298 = arith.mulf %290, %297 : vector<8x128xf32>
    %299 = arith.addf %296, %298 : vector<8x128xf32>
    %300 = vector.extract_strided_slice %242 {offsets = [16, 0], sizes = [8, 384], strides = [1, 1]} : vector<64x384xf32> to vector<8x384xf32>
    %cst_61 = arith.constant dense<0.000000e+00> : vector<8x384xf32>
    %301 = tpu.matmul %299, %236, %cst_61 {dimension_numbers = #tpu.dot_dimension_numbers<[1], [0], [0], [1], [0, 0, 1, 1], [], []>} : vector<8x128xf32>, vector<128x384xf32>, vector<8x384xf32> -> vector<8x384xf32>
    %302 = vector.extract_strided_slice %300 {offsets = [0, 0], sizes = [8, 128], strides = [1, 1]} : vector<8x384xf32> to vector<8x128xf32>
    %303 = vector.extract_strided_slice %301 {offsets = [0, 0], sizes = [8, 128], strides = [1, 1]} : vector<8x384xf32> to vector<8x128xf32>
    %304 = arith.addf %302, %303 : vector<8x128xf32>
    %305 = arith.negf %304 : vector<8x128xf32>
    %306 = math.exp %305 : vector<8x128xf32>
    %cst_62 = arith.constant 1.000000e+00 : f32
    %307 = vector.broadcast %cst_62 : f32 to vector<8x128xf32>
    %308 = arith.addf %307, %306 : vector<8x128xf32>
    %309 = arith.divf %307, %308 : vector<8x128xf32>
    %310 = vector.extract_strided_slice %300 {offsets = [0, 128], sizes = [8, 128], strides = [1, 1]} : vector<8x384xf32> to vector<8x128xf32>
    %311 = vector.extract_strided_slice %301 {offsets = [0, 128], sizes = [8, 128], strides = [1, 1]} : vector<8x384xf32> to vector<8x128xf32>
    %312 = arith.addf %310, %311 : vector<8x128xf32>
    %313 = arith.negf %312 : vector<8x128xf32>
    %314 = math.exp %313 : vector<8x128xf32>
    %cst_63 = arith.constant 1.000000e+00 : f32
    %315 = vector.broadcast %cst_63 : f32 to vector<8x128xf32>
    %316 = arith.addf %315, %314 : vector<8x128xf32>
    %317 = arith.divf %315, %316 : vector<8x128xf32>
    %318 = vector.extract_strided_slice %300 {offsets = [0, 256], sizes = [8, 128], strides = [1, 1]} : vector<8x384xf32> to vector<8x128xf32>
    %319 = vector.extract_strided_slice %301 {offsets = [0, 256], sizes = [8, 128], strides = [1, 1]} : vector<8x384xf32> to vector<8x128xf32>
    %320 = arith.addf %319, %244 : vector<8x128xf32>
    %321 = arith.mulf %309, %320 : vector<8x128xf32>
    %322 = arith.addf %318, %321 : vector<8x128xf32>
    %323 = math.tanh %322 : vector<8x128xf32>
    %324 = arith.subf %299, %323 : vector<8x128xf32>
    %325 = arith.mulf %317, %324 : vector<8x128xf32>
    %326 = arith.addf %323, %325 : vector<8x128xf32>
    %327 = vector.extract_strided_slice %242 {offsets = [24, 0], sizes = [8, 384], strides = [1, 1]} : vector<64x384xf32> to vector<8x384xf32>
    %cst_64 = arith.constant dense<0.000000e+00> : vector<8x384xf32>
    %328 = tpu.matmul %326, %236, %cst_64 {dimension_numbers = #tpu.dot_dimension_numbers<[1], [0], [0], [1], [0, 0, 1, 1], [], []>} : vector<8x128xf32>, vector<128x384xf32>, vector<8x384xf32> -> vector<8x384xf32>
    %329 = vector.extract_strided_slice %327 {offsets = [0, 0], sizes = [8, 128], strides = [1, 1]} : vector<8x384xf32> to vector<8x128xf32>
    %330 = vector.extract_strided_slice %328 {offsets = [0, 0], sizes = [8, 128], strides = [1, 1]} : vector<8x384xf32> to vector<8x128xf32>
    %331 = arith.addf %329, %330 : vector<8x128xf32>
    %332 = arith.negf %331 : vector<8x128xf32>
    %333 = math.exp %332 : vector<8x128xf32>
    %cst_65 = arith.constant 1.000000e+00 : f32
    %334 = vector.broadcast %cst_65 : f32 to vector<8x128xf32>
    %335 = arith.addf %334, %333 : vector<8x128xf32>
    %336 = arith.divf %334, %335 : vector<8x128xf32>
    %337 = vector.extract_strided_slice %327 {offsets = [0, 128], sizes = [8, 128], strides = [1, 1]} : vector<8x384xf32> to vector<8x128xf32>
    %338 = vector.extract_strided_slice %328 {offsets = [0, 128], sizes = [8, 128], strides = [1, 1]} : vector<8x384xf32> to vector<8x128xf32>
    %339 = arith.addf %337, %338 : vector<8x128xf32>
    %340 = arith.negf %339 : vector<8x128xf32>
    %341 = math.exp %340 : vector<8x128xf32>
    %cst_66 = arith.constant 1.000000e+00 : f32
    %342 = vector.broadcast %cst_66 : f32 to vector<8x128xf32>
    %343 = arith.addf %342, %341 : vector<8x128xf32>
    %344 = arith.divf %342, %343 : vector<8x128xf32>
    %345 = vector.extract_strided_slice %327 {offsets = [0, 256], sizes = [8, 128], strides = [1, 1]} : vector<8x384xf32> to vector<8x128xf32>
    %346 = vector.extract_strided_slice %328 {offsets = [0, 256], sizes = [8, 128], strides = [1, 1]} : vector<8x384xf32> to vector<8x128xf32>
    %347 = arith.addf %346, %244 : vector<8x128xf32>
    %348 = arith.mulf %336, %347 : vector<8x128xf32>
    %349 = arith.addf %345, %348 : vector<8x128xf32>
    %350 = math.tanh %349 : vector<8x128xf32>
    %351 = arith.subf %326, %350 : vector<8x128xf32>
    %352 = arith.mulf %344, %351 : vector<8x128xf32>
    %353 = arith.addf %350, %352 : vector<8x128xf32>
    %354 = vector.extract_strided_slice %242 {offsets = [32, 0], sizes = [8, 384], strides = [1, 1]} : vector<64x384xf32> to vector<8x384xf32>
    %cst_67 = arith.constant dense<0.000000e+00> : vector<8x384xf32>
    %355 = tpu.matmul %353, %236, %cst_67 {dimension_numbers = #tpu.dot_dimension_numbers<[1], [0], [0], [1], [0, 0, 1, 1], [], []>} : vector<8x128xf32>, vector<128x384xf32>, vector<8x384xf32> -> vector<8x384xf32>
    %356 = vector.extract_strided_slice %354 {offsets = [0, 0], sizes = [8, 128], strides = [1, 1]} : vector<8x384xf32> to vector<8x128xf32>
    %357 = vector.extract_strided_slice %355 {offsets = [0, 0], sizes = [8, 128], strides = [1, 1]} : vector<8x384xf32> to vector<8x128xf32>
    %358 = arith.addf %356, %357 : vector<8x128xf32>
    %359 = arith.negf %358 : vector<8x128xf32>
    %360 = math.exp %359 : vector<8x128xf32>
    %cst_68 = arith.constant 1.000000e+00 : f32
    %361 = vector.broadcast %cst_68 : f32 to vector<8x128xf32>
    %362 = arith.addf %361, %360 : vector<8x128xf32>
    %363 = arith.divf %361, %362 : vector<8x128xf32>
    %364 = vector.extract_strided_slice %354 {offsets = [0, 128], sizes = [8, 128], strides = [1, 1]} : vector<8x384xf32> to vector<8x128xf32>
    %365 = vector.extract_strided_slice %355 {offsets = [0, 128], sizes = [8, 128], strides = [1, 1]} : vector<8x384xf32> to vector<8x128xf32>
    %366 = arith.addf %364, %365 : vector<8x128xf32>
    %367 = arith.negf %366 : vector<8x128xf32>
    %368 = math.exp %367 : vector<8x128xf32>
    %cst_69 = arith.constant 1.000000e+00 : f32
    %369 = vector.broadcast %cst_69 : f32 to vector<8x128xf32>
    %370 = arith.addf %369, %368 : vector<8x128xf32>
    %371 = arith.divf %369, %370 : vector<8x128xf32>
    %372 = vector.extract_strided_slice %354 {offsets = [0, 256], sizes = [8, 128], strides = [1, 1]} : vector<8x384xf32> to vector<8x128xf32>
    %373 = vector.extract_strided_slice %355 {offsets = [0, 256], sizes = [8, 128], strides = [1, 1]} : vector<8x384xf32> to vector<8x128xf32>
    %374 = arith.addf %373, %244 : vector<8x128xf32>
    %375 = arith.mulf %363, %374 : vector<8x128xf32>
    %376 = arith.addf %372, %375 : vector<8x128xf32>
    %377 = math.tanh %376 : vector<8x128xf32>
    %378 = arith.subf %353, %377 : vector<8x128xf32>
    %379 = arith.mulf %371, %378 : vector<8x128xf32>
    %380 = arith.addf %377, %379 : vector<8x128xf32>
    %381 = vector.extract_strided_slice %242 {offsets = [40, 0], sizes = [8, 384], strides = [1, 1]} : vector<64x384xf32> to vector<8x384xf32>
    %cst_70 = arith.constant dense<0.000000e+00> : vector<8x384xf32>
    %382 = tpu.matmul %380, %236, %cst_70 {dimension_numbers = #tpu.dot_dimension_numbers<[1], [0], [0], [1], [0, 0, 1, 1], [], []>} : vector<8x128xf32>, vector<128x384xf32>, vector<8x384xf32> -> vector<8x384xf32>
    %383 = vector.extract_strided_slice %381 {offsets = [0, 0], sizes = [8, 128], strides = [1, 1]} : vector<8x384xf32> to vector<8x128xf32>
    %384 = vector.extract_strided_slice %382 {offsets = [0, 0], sizes = [8, 128], strides = [1, 1]} : vector<8x384xf32> to vector<8x128xf32>
    %385 = arith.addf %383, %384 : vector<8x128xf32>
    %386 = arith.negf %385 : vector<8x128xf32>
    %387 = math.exp %386 : vector<8x128xf32>
    %cst_71 = arith.constant 1.000000e+00 : f32
    %388 = vector.broadcast %cst_71 : f32 to vector<8x128xf32>
    %389 = arith.addf %388, %387 : vector<8x128xf32>
    %390 = arith.divf %388, %389 : vector<8x128xf32>
    %391 = vector.extract_strided_slice %381 {offsets = [0, 128], sizes = [8, 128], strides = [1, 1]} : vector<8x384xf32> to vector<8x128xf32>
    %392 = vector.extract_strided_slice %382 {offsets = [0, 128], sizes = [8, 128], strides = [1, 1]} : vector<8x384xf32> to vector<8x128xf32>
    %393 = arith.addf %391, %392 : vector<8x128xf32>
    %394 = arith.negf %393 : vector<8x128xf32>
    %395 = math.exp %394 : vector<8x128xf32>
    %cst_72 = arith.constant 1.000000e+00 : f32
    %396 = vector.broadcast %cst_72 : f32 to vector<8x128xf32>
    %397 = arith.addf %396, %395 : vector<8x128xf32>
    %398 = arith.divf %396, %397 : vector<8x128xf32>
    %399 = vector.extract_strided_slice %381 {offsets = [0, 256], sizes = [8, 128], strides = [1, 1]} : vector<8x384xf32> to vector<8x128xf32>
    %400 = vector.extract_strided_slice %382 {offsets = [0, 256], sizes = [8, 128], strides = [1, 1]} : vector<8x384xf32> to vector<8x128xf32>
    %401 = arith.addf %400, %244 : vector<8x128xf32>
    %402 = arith.mulf %390, %401 : vector<8x128xf32>
    %403 = arith.addf %399, %402 : vector<8x128xf32>
    %404 = math.tanh %403 : vector<8x128xf32>
    %405 = arith.subf %380, %404 : vector<8x128xf32>
    %406 = arith.mulf %398, %405 : vector<8x128xf32>
    %407 = arith.addf %404, %406 : vector<8x128xf32>
    %408 = vector.extract_strided_slice %242 {offsets = [48, 0], sizes = [8, 384], strides = [1, 1]} : vector<64x384xf32> to vector<8x384xf32>
    %cst_73 = arith.constant dense<0.000000e+00> : vector<8x384xf32>
    %409 = tpu.matmul %407, %236, %cst_73 {dimension_numbers = #tpu.dot_dimension_numbers<[1], [0], [0], [1], [0, 0, 1, 1], [], []>} : vector<8x128xf32>, vector<128x384xf32>, vector<8x384xf32> -> vector<8x384xf32>
    %410 = vector.extract_strided_slice %408 {offsets = [0, 0], sizes = [8, 128], strides = [1, 1]} : vector<8x384xf32> to vector<8x128xf32>
    %411 = vector.extract_strided_slice %409 {offsets = [0, 0], sizes = [8, 128], strides = [1, 1]} : vector<8x384xf32> to vector<8x128xf32>
    %412 = arith.addf %410, %411 : vector<8x128xf32>
    %413 = arith.negf %412 : vector<8x128xf32>
    %414 = math.exp %413 : vector<8x128xf32>
    %cst_74 = arith.constant 1.000000e+00 : f32
    %415 = vector.broadcast %cst_74 : f32 to vector<8x128xf32>
    %416 = arith.addf %415, %414 : vector<8x128xf32>
    %417 = arith.divf %415, %416 : vector<8x128xf32>
    %418 = vector.extract_strided_slice %408 {offsets = [0, 128], sizes = [8, 128], strides = [1, 1]} : vector<8x384xf32> to vector<8x128xf32>
    %419 = vector.extract_strided_slice %409 {offsets = [0, 128], sizes = [8, 128], strides = [1, 1]} : vector<8x384xf32> to vector<8x128xf32>
    %420 = arith.addf %418, %419 : vector<8x128xf32>
    %421 = arith.negf %420 : vector<8x128xf32>
    %422 = math.exp %421 : vector<8x128xf32>
    %cst_75 = arith.constant 1.000000e+00 : f32
    %423 = vector.broadcast %cst_75 : f32 to vector<8x128xf32>
    %424 = arith.addf %423, %422 : vector<8x128xf32>
    %425 = arith.divf %423, %424 : vector<8x128xf32>
    %426 = vector.extract_strided_slice %408 {offsets = [0, 256], sizes = [8, 128], strides = [1, 1]} : vector<8x384xf32> to vector<8x128xf32>
    %427 = vector.extract_strided_slice %409 {offsets = [0, 256], sizes = [8, 128], strides = [1, 1]} : vector<8x384xf32> to vector<8x128xf32>
    %428 = arith.addf %427, %244 : vector<8x128xf32>
    %429 = arith.mulf %417, %428 : vector<8x128xf32>
    %430 = arith.addf %426, %429 : vector<8x128xf32>
    %431 = math.tanh %430 : vector<8x128xf32>
    %432 = arith.subf %407, %431 : vector<8x128xf32>
    %433 = arith.mulf %425, %432 : vector<8x128xf32>
    %434 = arith.addf %431, %433 : vector<8x128xf32>
    %435 = vector.extract_strided_slice %242 {offsets = [56, 0], sizes = [8, 384], strides = [1, 1]} : vector<64x384xf32> to vector<8x384xf32>
    %cst_76 = arith.constant dense<0.000000e+00> : vector<8x384xf32>
    %436 = tpu.matmul %434, %236, %cst_76 {dimension_numbers = #tpu.dot_dimension_numbers<[1], [0], [0], [1], [0, 0, 1, 1], [], []>} : vector<8x128xf32>, vector<128x384xf32>, vector<8x384xf32> -> vector<8x384xf32>
    %437 = vector.extract_strided_slice %435 {offsets = [0, 0], sizes = [8, 128], strides = [1, 1]} : vector<8x384xf32> to vector<8x128xf32>
    %438 = vector.extract_strided_slice %436 {offsets = [0, 0], sizes = [8, 128], strides = [1, 1]} : vector<8x384xf32> to vector<8x128xf32>
    %439 = arith.addf %437, %438 : vector<8x128xf32>
    %440 = arith.negf %439 : vector<8x128xf32>
    %441 = math.exp %440 : vector<8x128xf32>
    %cst_77 = arith.constant 1.000000e+00 : f32
    %442 = vector.broadcast %cst_77 : f32 to vector<8x128xf32>
    %443 = arith.addf %442, %441 : vector<8x128xf32>
    %444 = arith.divf %442, %443 : vector<8x128xf32>
    %445 = vector.extract_strided_slice %435 {offsets = [0, 128], sizes = [8, 128], strides = [1, 1]} : vector<8x384xf32> to vector<8x128xf32>
    %446 = vector.extract_strided_slice %436 {offsets = [0, 128], sizes = [8, 128], strides = [1, 1]} : vector<8x384xf32> to vector<8x128xf32>
    %447 = arith.addf %445, %446 : vector<8x128xf32>
    %448 = arith.negf %447 : vector<8x128xf32>
    %449 = math.exp %448 : vector<8x128xf32>
    %cst_78 = arith.constant 1.000000e+00 : f32
    %450 = vector.broadcast %cst_78 : f32 to vector<8x128xf32>
    %451 = arith.addf %450, %449 : vector<8x128xf32>
    %452 = arith.divf %450, %451 : vector<8x128xf32>
    %453 = vector.extract_strided_slice %435 {offsets = [0, 256], sizes = [8, 128], strides = [1, 1]} : vector<8x384xf32> to vector<8x128xf32>
    %454 = vector.extract_strided_slice %436 {offsets = [0, 256], sizes = [8, 128], strides = [1, 1]} : vector<8x384xf32> to vector<8x128xf32>
    %455 = arith.addf %454, %244 : vector<8x128xf32>
    %456 = arith.mulf %444, %455 : vector<8x128xf32>
    %457 = arith.addf %453, %456 : vector<8x128xf32>
    %458 = math.tanh %457 : vector<8x128xf32>
    %459 = arith.subf %434, %458 : vector<8x128xf32>
    %460 = arith.mulf %452, %459 : vector<8x128xf32>
    %461 = arith.addf %458, %460 : vector<8x128xf32>
    %c0_79 = arith.constant 0 : index
    %c0_80 = arith.constant 0 : index
    %462 = vector.load %arg9[%c0_79, %c0_80] : memref<128x128xf32, #tpu.memory_space<vmem>>, vector<128x128xf32>
    %cst_81 = arith.constant dense<0.000000e+00> : vector<8x128xf32>
    %463 = tpu.matmul %461, %462, %cst_81 {dimension_numbers = #tpu.dot_dimension_numbers<[1], [0], [0], [1], [0, 0, 1, 1], [], []>} : vector<8x128xf32>, vector<128x128xf32>, vector<8x128xf32> -> vector<8x128xf32>
    %c0_82 = arith.constant 0 : index
    %c0_83 = arith.constant 0 : index
    %464 = vector.load %arg10[%c0_82, %c0_83] : memref<1x128xf32, #tpu.memory_space<vmem>>, vector<1x128xf32>
    %465 = vector.broadcast %464 : vector<1x128xf32> to vector<8x128xf32>
    %466 = arith.addf %463, %465 : vector<8x128xf32>
    %c0_84 = arith.constant 0 : index
    %c0_85 = arith.constant 0 : index
    %467 = vector.load %arg11[%c0_84, %c0_85] : memref<8x128xf32, #tpu.memory_space<vmem>>, vector<8x128xf32>
    tpu.vector_store %arg11[%c0_84, %c0_85], %466 {strides = array<i32>} : memref<8x128xf32, #tpu.memory_space<vmem>>, vector<8x128xf32>,
    return
  }
}

</mosaic_0001>

<bundles_post_ra>
// kernel: tpu_custom_call.1
= control target key start
LH: loop header
LB: loop body
LE: loop exit
PB: predicated region body
PF: predicated region fallthrough
CT: control target
= control target key end

     0   :  { %16 = vsyncpa [#allocation4], 0  ;;  %s6983_s0 = inlined_call_operand.vmem [shape: f32[64,16], index: 0, kind: input, shape index: {}]   ;;  %s6984_s1 = inlined_call_operand.vmem [shape: f32[16,384], index: 1, kind: input, shape index: {}]   ;;  %s6985_s2 = inlined_call_operand.hbm [shape: f32[128,384], index: 2, kind: input, shape index: {}]   ;;  %s6986_s3 = inlined_call_operand.vmem [shape: f32[1,384], index: 3, kind: input, shape index: {}]   ;;  %s6987_s4 = inlined_call_operand.vmem [shape: f32[1,128], index: 4, kind: input, shape index: {}]   ;;  %s6988_s5 = inlined_call_operand.hbm [shape: f32[128,384], index: 5, kind: input, shape index: {}]   ;;  %s6989_s6 = inlined_call_operand.hbm [shape: f32[128,384], index: 6, kind: input, shape index: {}]   ;;  %s6990_s7 = inlined_call_operand.vmem [shape: f32[1,384], index: 7, kind: input, shape index: {}]   ;;  %s6991_s8 = inlined_call_operand.vmem [shape: f32[1,128], index: 8, kind: input, shape index: {}]   ;;  %s6992_s9 = inlined_call_operand.hbm [shape: f32[128,128], index: 9, kind: input, shape index: {}]   ;;  %s6993_s10 = inlined_call_operand.vmem [shape: f32[1,128], index: 10, kind: input, shape index: {}]   ;;  %s6994_s11 = inlined_call_operand.hbm [shape: f32[8,128], index: 11, kind: output, shape index: {}]  }
   0x1   :  { %17 = vsyncpa [#allocation7], 0 }
   0x2   :  { %18 = vsyncpa [#allocation10], 0 }
   0x3   :  { %19 = vsyncpa [#allocation5], 0  ;;  %s5856_s17 = smov [#allocation6]   ;;  %s5857_s19 = smov [#allocation3]  }
   0x4   :  { %s45_s18 = sshll.u32 %s5856_s17, 4  ;;  %s29_s20 = sshll.u32 %s5857_s19, 4  ;;  %s46_s18 = int_to_ptr.vmem [resolvable:$true] %s45_s18  ;;  %s5928_s20 = int_to_ptr.vmem [resolvable:$true] %s29_s20 }
   0x5   :  { %s5738_s23 = scalar_lea.hbm %s6988_s5, 6144 }
   0x6   :  { %p5739_p0 = scmp.ne.s32.totalorder %s6988_s5, %s5738_s23  ;;  %p5742_p1 = scmp.lt.u32.totalorder %s5738_s23, %s6988_s5 }
   0x8   :  { %p5744_p2 = pnand %p5742_p1, %p5739_p0 }
   0xa   :  { %5747 = shalt.err (!%p5744_p2)
}
   0xb   :  { %s5748_s28 = scalar_lea.vmem %s46_s18, 6144  ;;  %p5753_p4 = scmp.lt.s32.totalorder %s46_s18, %s46_s18 }
   0xc   :  { %p5749_p3 = scmp.ne.s32.totalorder %s46_s18, %s5748_s28  ;;  %p5754_p5 = scmp.lt.s32.totalorder %s5748_s28, %s5748_s28 }
   0xe   :  { %p5755_p6 = por %p5754_p5, %p5753_p4 }
  0x10   :  { %p5756_p7 = pnand %p5755_p6, %p5749_p3 }
  0x12   :  { %5759 = shalt.err (!%p5756_p7)
}
  0x13   :  { %s5858_s29 = smov 384   ;;  %s5859_s30 = smov 24  }
  0x14   :  { %51 = dma.hbm_to_vmem [thread:$0]  %s6988_s5, 6144, %s46_s18, [#allocation7], %s5858_s29, %s5858_s29, %s5859_s30  }
  0x15   :  { %s5760_s16 = scalar_lea.hbm %s6985_s2, 6144 }
  0x16   :  { %p5761_p8 = scmp.ne.s32.totalorder %s6985_s2, %s5760_s16  ;;  %p5764_p9 = scmp.lt.u32.totalorder %s5760_s16, %s6985_s2 }
  0x18   :  { %p5766_p10 = pnand %p5764_p9, %p5761_p8 }
  0x1a   :  { %5769 = shalt.err (!%p5766_p10)
}
  0x1b   :  { %s5770_s23 = scalar_lea.vmem %s5928_s20, 6144  ;;  %p5775_p12 = scmp.lt.s32.totalorder %s5928_s20, %s5928_s20 }
  0x1c   :  { %p5771_p11 = scmp.ne.s32.totalorder %s5928_s20, %s5770_s23  ;;  %p5776_p13 = scmp.lt.s32.totalorder %s5770_s23, %s5770_s23 }
  0x1e   :  { %p5777_p0 = por %p5776_p13, %p5775_p12 }
  0x20   :  { %p5778_p1 = pnand %p5777_p0, %p5771_p11 }
  0x22   :  { %5781 = shalt.err (!%p5778_p1)
}
  0x23   :  { %35 = dma.hbm_to_vmem [thread:$0]  %s6985_s2, 6144, %s5928_s20, [#allocation4], %s5858_s29, %s5858_s29, %s5859_s30  }
  0x24   :  { %s5860_s24 = smov [#allocation8]   ;;  %s5861_s26 = smov [#allocation9]  }
  0x25   :  { %s57_s25 = sshll.u32 %s5860_s24, 4  ;;  %s73_s27 = sshll.u32 %s5861_s26, 4  ;;  %s58_s25 = int_to_ptr.vmem [resolvable:$true] %s57_s25  ;;  %s5965_s27 = int_to_ptr.vmem [resolvable:$true] %s73_s27 }
  0x26   :  { %s5782_s13 = scalar_lea.hbm %s6989_s6, 6144 }
  0x27   :  { %p5783_p2 = scmp.ne.s32.totalorder %s6989_s6, %s5782_s13  ;;  %p5786_p3 = scmp.lt.u32.totalorder %s5782_s13, %s6989_s6 }
  0x29   :  { %p5788_p4 = pnand %p5786_p3, %p5783_p2 }
  0x2b   :  { %5791 = shalt.err (!%p5788_p4)
}
  0x2c   :  { %s5792_s2 = scalar_lea.vmem %s58_s25, 6144  ;;  %p5797_p6 = scmp.lt.s32.totalorder %s58_s25, %s58_s25 }
  0x2d   :  { %p5793_p5 = scmp.ne.s32.totalorder %s58_s25, %s5792_s2  ;;  %p5798_p7 = scmp.lt.s32.totalorder %s5792_s2, %s5792_s2 }
  0x2f   :  { %p5799_p8 = por %p5798_p7, %p5797_p6 }
  0x31   :  { %p5800_p9 = pnand %p5799_p8, %p5793_p5 }
  0x33   :  { %5803 = shalt.err (!%p5800_p9)
}
  0x34   :  { %63 = dma.hbm_to_vmem [thread:$0]  %s6989_s6, 6144, %s58_s25, [#allocation7], %s5858_s29, %s5858_s29, %s5859_s30  }
  0x35   :  { %s5804_s23 = scalar_lea.hbm %s6992_s9, 2048 }
  0x36   :  { %p5805_p10 = scmp.ne.s32.totalorder %s6992_s9, %s5804_s23  ;;  %p5808_p11 = scmp.lt.u32.totalorder %s5804_s23, %s6992_s9 }
  0x38   :  { %p5810_p12 = pnand %p5808_p11, %p5805_p10 }
  0x3a   :  { %5813 = shalt.err (!%p5810_p12)
}
  0x3b   :  { %s5814_s28 = scalar_lea.vmem %s5965_s27, 2048  ;;  %p5819_p0 = scmp.lt.s32.totalorder %s5965_s27, %s5965_s27 }
  0x3c   :  { %p5815_p13 = scmp.ne.s32.totalorder %s5965_s27, %s5814_s28  ;;  %p5820_p1 = scmp.lt.s32.totalorder %s5814_s28, %s5814_s28 }
  0x3e   :  { %p5821_p2 = por %p5820_p1, %p5819_p0 }
  0x40   :  { %p5822_p3 = pnand %p5821_p2, %p5815_p13 }
  0x42   :  { %5825 = shalt.err (!%p5822_p3)
}
  0x43   :  { %s5862_s6 = smov 128   ;;  %s5863_s29 = smov 8  }
  0x44   :  { %79 = dma.hbm_to_vmem [thread:$0]  %s6992_s9, 2048, %s5965_s27, [#allocation10], %s5862_s6, %s5862_s6, %s5863_s29  }
  0x45   :  { %5848 = dma.done.wait [#allocation4], 6144  }
  0x46   :  { %5849 = vsyncadd [#allocation4], 4294961152 }
  0x47   :  { %5850 = dma.done.wait [#allocation7], 12288  }
  0x48   :  { %5851 = vsyncadd [#allocation7], 4294955008 }
  0x49   :  { %5852 = dma.done.wait [#allocation10], 2048  }
  0x4a   :  { %5853 = vsyncadd [#allocation10], 4294965248  ;;  %v5864_v0 = vmov 0.0   ;;  %v95_v1 = vld [vmem:[%s6984_s1 + $0x8] sm:$0xff]  ;;  %v98_v2 = vld [vmem:[%s6984_s1 + $0x20] sm:$0xff]  ;;  %vm174_vm0 = vcmask 130048  }
  0x4b   :  { %263 = vmatprep.mubr.f32.mxu0 %v5864_v0  ;;  %v94_v3 = vld [vmem:[%s6984_s1] sm:$0xff]  ;;  %v4509_v4 = vpack.c.bf16 %v98_v2, %v95_v1  ;;  %v97_v5 = vld [vmem:[%s6984_s1 + $0x18] sm:$0xff]  ;;  %v104_v9 = vld [vmem:[#allocation3 + $0x20] sm:$0xff]  ;;  %v5865_v48 = vmov 0.0|0.0   ;;  %vm5866_vm1 = vmmov 0   ;;  %s5867_s21 = smov [#allocation11]  }
  0x4c   :  { %v150_v6 = vld [vmem:[%s6983_s0] sm:$0xff]  ;;  %v101_v7 = vld [vmem:[#allocation3 + $0x8] sm:$0xff]  ;;  %v4511_v8 = vpack.c.bf16 %v97_v5, %v94_v3  ;;  %v100_v10 = vld [vmem:[#allocation3] sm:$0xff]  ;;  %s3469_s22 = sshll.u32 %s5867_s21, 4  ;;  %s3470_s22 = int_to_ptr.vmem [resolvable:$true] %s3469_s22 }
  0x4d   :  { %v103_v11 = vld [vmem:[#allocation3 + $0x18] sm:$0xff]  ;;  %3858 = vmatprep.mubr.msk.f32.mxu1 %vm174_vm0, %v150_v6  ;;  %4510 = vmatprep.subr.bf16.mxu0 %v4509_v4  ;;  %v6016_v12 = vpack.c.bf16 %v104_v9, %v101_v7  ;;  %v110_v14 = vld [vmem:[#allocation3 + $0x50] sm:$0xff]  ;;  %v109_v18 = vld [vmem:[#allocation3 + $0x48] sm:$0xff]  ;;  %s5826_s23 = scalar_lea.vmem %s3470_s22, 128  ;;  %p5831_p5 = scmp.lt.s32.totalorder %s3470_s22, %s3470_s22 }
  0x4e   :  { %v107_v13 = vld [vmem:[#allocation3 + $0x38] sm:$0xff]  ;;  %4512 = vmatpush1.bf16.msra.mxu0 %v4511_v8  ;;  %v6018_v15 = vpack.c.bf16 %v103_v11, %v100_v10  ;;  %v106_v17 = vld [vmem:[#allocation3 + $0x30] sm:$0xff]  ;;  %v113_v19 = vld [vmem:[#allocation3 + $0x68] sm:$0xff]  ;;  %p5827_p4 = scmp.ne.s32.totalorder %s3470_s22, %s5826_s23  ;;  %p5832_p6 = scmp.lt.s32.totalorder %s5826_s23, %s5826_s23 }
  0x4f   :  { %4518 = vmatprep.subr.bf16.mxu0 %v6016_v12  ;;  %v6021_v16 = vpack.c.bf16 %v110_v14, %v107_v13  ;;  %v116_v20 = vld [vmem:[#allocation3 + $0x80] sm:$0xff]  ;;  %v151_v21 = vld [vmem:[%s6983_s0 + $0x8] sm:$0xff]  ;;  %v6029_v22 = vpack.c.bf16 %v109_v18, %v106_v17  ;;  %v122_v27 = vld [vmem:[#allocation3 + $0xb0] sm:$0xff] }
  0x50   :  { %v6032_v23 = vpack.c.bf16 %v116_v20, %v113_v19  ;;  %v112_v24 = vld [vmem:[#allocation3 + $0x60] sm:$0xff]  ;;  %v115_v25 = vld [vmem:[#allocation3 + $0x78] sm:$0xff]  ;;  %v118_v34 = vld [vmem:[#allocation3 + $0x90] sm:$0xff]  ;;  %p5833_p7 = por %p5832_p6, %p5831_p5 }
  0x51   :  { %3480 = vmatmul.mubr.msk.f32.vlgmr.msra.gmra.mrb[0].mxu0 %vm174_vm0, %v150_v6  ;;  %v119_v26 = vld [vmem:[#allocation3 + $0x98] sm:$0xff]  ;;  %v96_v28 = vld [vmem:[%s6984_s1 + $0x10] sm:$0xff]  ;;  %v6046_v31 = vpack.c.bf16 %v115_v25, %v112_v24  ;;  %v121_v35 = vld [vmem:[#allocation3 + $0xa8] sm:$0xff] }
  0x52   :  { %4520 = vmatpush1.bf16.msra.mxu0 %v6018_v15  ;;  %269 = vmatprep.mubr.f32.mxu0 %v5864_v0  ;;  %v99_v29 = vld [vmem:[%s6984_s1 + $0x28] sm:$0xff]  ;;  %v152_v30 = vld [vmem:[%s6983_s0 + $0x10] sm:$0xff]  ;;  %v6049_v33 = vpack.c.bf16 %v122_v27, %v119_v26  ;;  %v102_v36 = vld [vmem:[#allocation3 + $0x10] sm:$0xff]  ;;  %v6059_v42 = vpack.c.bf16 %v121_v35, %v118_v34  ;;  %v159_v35 = vlaneseq  ;;  %p5834_p8 = pnand %p5833_p7, %p5827_p4 }
  0x53   :  { %4522 = vmatprep.subr.bf16.mxu0 %v6021_v16  ;;  %v4513_v32 = vpack.c.bf16 %v99_v29, %v96_v28  ;;  %v125_v37 = vld [vmem:[#allocation3 + $0xc8] sm:$0xff]  ;;  %v128_v38 = vld [vmem:[#allocation3 + $0xe0] sm:$0xff]  ;;  %v111_v44 = vld [vmem:[#allocation3 + $0x58] sm:$0xff] }
  0x54   :  { %v105_v39 = vld [vmem:[#allocation3 + $0x28] sm:$0xff]  ;;  %v108_v43 = vld [vmem:[#allocation3 + $0x40] sm:$0xff]  ;;  %v6062_v45 = vpack.c.bf16 %v128_v38, %v125_v37  ;;  %v127_v47 = vld [vmem:[#allocation3 + $0xd8] sm:$0xff] }
  0x55   :  { %3481 = vmatmul.mubr.msk.f32.gmra.mrb[2].mxu0 %vm174_vm0, %v151_v21  ;;  %4514 = vmatprep.subr.bf16.mxu1 %v4513_v32  ;;  %v6052_v40 = vpack.c.bf16 %v105_v39, %v102_v36  ;;  %v153_v41 = vld [vmem:[%s6983_s0 + $0x18] sm:$0xff]  ;;  %v124_v46 = vld [vmem:[#allocation3 + $0xc0] sm:$0xff]  ;;  %v131_v49 = vld [vmem:[#allocation3 + $0xf8] sm:$0xff]  ;;  %v6068_v51 = vpack.c.bf16 %v111_v44, %v108_v43  ;;  %v6187_v36 = vshrl.u32 %v159_v35, 7 }
  0x56   :  { %4524 = vmatpush1.bf16.msra.mxu0 %v6029_v22  ;;  %275 = vmatprep.mubr.f32.mxu0 %v5864_v0  ;;  %v134_v50 = vld [vmem:[#allocation3 + $0x110] sm:$0xff]  ;;  %v6075_v53 = vpack.c.bf16 %v127_v47, %v124_v46  ;;  %v117_v55 = vld [vmem:[#allocation3 + $0x88] sm:$0xff]  ;;  %v140_v60 = vld [vmem:[#allocation3 + $0x140] sm:$0xff] }
  0x57   :  { %4526 = vmatprep.subr.bf16.mxu0 %v6032_v23  ;;  %4516 = vmatpush3.bf16.msra.mxu1 %v4513_v32  ;;  %v154_v52 = vld [vmem:[%s6983_s0 + $0x20] sm:$0xff]  ;;  %v6078_v56 = vpack.c.bf16 %v134_v50, %v131_v49  ;;  %v133_v58 = vld [vmem:[#allocation3 + $0x108] sm:$0xff]  ;;  %v155_v62 = vld [vmem:[%s6983_s0 + $0x28] sm:$0xff]  ;;  %v169_v37 = vsub.s32 2, %v6187_v36 }
  0x58   :  { %4549 = vmatprep.subr.bf16.mxu1 %v5865_v48  ;;  %v114_v54 = vld [vmem:[#allocation3 + $0x70] sm:$0xff]  ;;  %v137_v59 = vld [vmem:[#allocation3 + $0x128] sm:$0xff]  ;;  %v120_v1 = vld [vmem:[#allocation3 + $0xa0] sm:$0xff] }
  0x59   :  { %3482 = vmatmul.mubr.msk.f32.gmra.mrb[4].mxu0 %vm174_vm0, %v152_v30  ;;  %v130_v57 = vld [vmem:[#allocation3 + $0xf0] sm:$0xff]  ;;  %v6084_v61 = vpack.c.bf16 %v117_v55, %v114_v54  ;;  %v123_v2 = vld [vmem:[#allocation3 + $0xb8] sm:$0xff]  ;;  %v6094_v3 = vpack.c.bf16 %v140_v60, %v137_v59  ;;  %v136_v4 = vld [vmem:[#allocation3 + $0x120] sm:$0xff] }
  0x5a   :  { %4528 = vmatpush1.bf16.msra.mxu0 %v6046_v31  ;;  %281 = vmatprep.mubr.f32.mxu0 %v5864_v0  ;;  %v6091_v63 = vpack.c.bf16 %v133_v58, %v130_v57  ;;  %v139_v5 = vld [vmem:[#allocation3 + $0x138] sm:$0xff]  ;;  %v146_v7 = vld [vmem:[#allocation3 + $0x170] sm:$0xff]  ;;  %v6100_v8 = vpack.c.bf16 %v123_v2, %v120_v1  ;;  %v156_v9 = vld [vmem:[%s6983_s0 + $0x30] sm:$0xff] }
  0x5b   :  { %4530 = vmatprep.subr.bf16.mxu0 %v6049_v33  ;;  %3859 = vmatmul.mubr.msk.f32.vlgmr.msra.gmra.mrb[0].mxu1 %vm174_vm0, %v151_v21  ;;  %v143_v6 = vld [vmem:[#allocation3 + $0x158] sm:$0xff]  ;;  %v6107_v10 = vpack.c.bf16 %v139_v5, %v136_v4  ;;  %v126_v11 = vld [vmem:[#allocation3 + $0xd0] sm:$0xff]  ;;  %v129_v13 = vld [vmem:[#allocation3 + $0xe8] sm:$0xff]  ;;  %v165_v5 = vsub.s32 1, %v6187_v36 }
  0x5c   :  { %4551 = vmatpush3.bf16.msra.mxu1 %v6052_v40  ;;  %3861 = vmatprep.mubr.msk.f32.mxu1 %vm174_vm0, %v152_v30  ;;  %v6110_v14 = vpack.c.bf16 %v146_v7, %v143_v6  ;;  %v142_v17 = vld [vmem:[#allocation3 + $0x150] sm:$0xff]  ;;  %v145_v18 = vld [vmem:[#allocation3 + $0x168] sm:$0xff]  ;;  %v6116_v19 = vpack.c.bf16 %v129_v13, %v126_v11  ;;  %v132_v24 = vld [vmem:[#allocation3 + $0x100] sm:$0xff] }
  0x5d   :  { %3483 = vmatmul.mubr.msk.f32.gmra.mrb[6].mxu0 %vm174_vm0, %v153_v41  ;;  %4552 = vmatprep.subr.bf16.mxu1 %v5865_v48  ;;  %v157_v20 = vld [vmem:[%s6983_s0 + $0x38] sm:$0xff]  ;;  %v6123_v21 = vpack.c.bf16 %v145_v18, %v142_v17  ;;  %v135_v25 = vld [vmem:[#allocation3 + $0x118] sm:$0xff]  ;;  %v138_v27 = vld [vmem:[#allocation3 + $0x130] sm:$0xff] }
  0x5e   :  { %4532 = vmatpush1.bf16.msra.mxu0 %v6059_v42  ;;  %287 = vmatprep.mubr.f32.mxu0 %v5864_v0  ;;  %v6130_v26 = vpack.c.bf16 %v135_v25, %v132_v24  ;;  %v141_v28 = vld [vmem:[#allocation3 + $0x148] sm:$0xff]  ;;  %v144_v30 = vld [vmem:[#allocation3 + $0x160] sm:$0xff]  ;;  %v147_v32 = vld [vmem:[#allocation3 + $0x178] sm:$0xff] }
  0x5f   :  { %4534 = vmatprep.subr.bf16.mxu0 %v6062_v45  ;;  %3862 = vmatmul.mubr.msk.f32.gmra.mrb[2].mxu1 %vm174_vm0, %v153_v41  ;;  %v6140_v29 = vpack.c.bf16 %v141_v28, %v138_v27  ;;  %v6149_v34 = vpack.c.bf16 %v147_v32, %v144_v30  ;;  %v148_v38 = vld [vmem:[%s6986_s3] sm:$0x7] }
  0x60   :  { %4554 = vmatpush3.bf16.msra.mxu1 %v6068_v51  ;;  %3864 = vmatprep.mubr.msk.f32.mxu1 %vm174_vm0, %v154_v52  ;;  %v170_v39 = vrot.slane %v148_v38, %v169_v37  ;;  %v6218_v11 = vrot.slane %v148_v38, %v165_v5  ;;  %v6224_v27 = vld [vmem:[%s6987_s4] ss:$0 sm:$0xff] }
  0x61   :  { %3484 = vmatmul.mubr.msk.f32.gmra.mrb[8].mxu0 %vm174_vm0, %v154_v52  ;;  %4555 = vmatprep.subr.bf16.mxu1 %v5865_v48  ;;  %v161_v52 = vsub.s32 0, %v6187_v36 }
  0x62   :  { %4536 = vmatpush1.bf16.msra.mxu0 %v6075_v53  ;;  %293 = vmatprep.mubr.f32.mxu0 %v5864_v0 }
  0x63   :  { %4538 = vmatprep.subr.bf16.mxu0 %v6078_v56  ;;  %3865 = vmatmul.mubr.msk.f32.gmra.mrb[4].mxu1 %vm174_vm0, %v155_v62  ;;  %v6206_v58 = vrot.slane %v148_v38, %v161_v52 }
  0x64   :  { %4557 = vmatpush3.bf16.msra.mxu1 %v6084_v61  ;;  %3867 = vmatprep.mubr.msk.f32.mxu1 %vm174_vm0, %v156_v9 }
  0x65   :  { %3485 = vmatmul.mubr.msk.f32.gmra.mrb[10].mxu0 %vm174_vm0, %v155_v62  ;;  %4558 = vmatprep.subr.bf16.mxu1 %v5865_v48 }
  0x66   :  { %4540 = vmatpush1.bf16.msra.mxu0 %v6091_v63  ;;  %299 = vmatprep.mubr.f32.mxu0 %v5864_v0 }
  0x67   :  { %4542 = vmatprep.subr.bf16.mxu0 %v6094_v3  ;;  %3868 = vmatmul.mubr.msk.f32.gmra.mrb[6].mxu1 %vm174_vm0, %v157_v20 }
  0x68   :  { %4560 = vmatpush3.bf16.msra.mxu1 %v6100_v8  ;;  %3902 = vmatprep.mubr.msk.f32.mxu1 %vm5866_vm1, %v5864_v0 }
  0x69   :  { %3486 = vmatmul.mubr.msk.f32.gmra.mrb[12].mxu0 %vm174_vm0, %v156_v9  ;;  %4561 = vmatprep.subr.bf16.mxu1 %v5865_v48 }
  0x6a   :  { %4544 = vmatpush1.bf16.msra.mxu0 %v6107_v10  ;;  %305 = vmatprep.mubr.f32.mxu0 %v5864_v0 }
  0x6b   :  { %4546 = vmatprep.subr.bf16.mxu0 %v6110_v14 }
  0x6c   :  { %4563 = vmatpush3.bf16.msra.mxu1 %v6116_v19 }
  0x6d   :  { %3487 = vmatmul.mubr.msk.f32.gmra.mrb[14].mxu0 %vm174_vm0, %v157_v20  ;;  %4564 = vmatprep.subr.bf16.mxu1 %v5865_v48 }
  0x6e   :  { %4548 = vmatpush1.bf16.msra.mxu0 %v6123_v21  ;;  %487 = vmatprep.mubr.f32.mxu0 %v5864_v0 }
  0x6f   :  { %4574 = vmatprep.subr.bf16.mxu0 %v6016_v12 }
  0x70   :  { %4566 = vmatpush3.bf16.msra.mxu1 %v6130_v26 }
  0x71   :  { %488 = vmatmul.mubr.f32.vlgmr.msra.gmra.mrb[0].mxu0 %v5864_v0  ;;  %4567 = vmatprep.subr.bf16.mxu1 %v5865_v48 }
  0x72   :  { %4576 = vmatpush1.bf16.msra.mxu0 %v6018_v15  ;;  %650 = vmatprep.mubr.f32.mxu0 %v5864_v0 }
  0x73   :  { %4578 = vmatprep.subr.bf16.mxu0 %v6021_v16 }
  0x74   :  { %4569 = vmatpush3.bf16.msra.mxu1 %v6140_v29 }
  0x75   :  { %4570 = vmatprep.subr.bf16.mxu1 %v5865_v48 }
  0x76   :  { %4580 = vmatpush1.bf16.msra.mxu0 %v6029_v22 }
  0x77   :  { %4582 = vmatprep.subr.bf16.mxu0 %v6032_v23 }
  0x78   :  { %4572 = vmatpush3.bf16.msra.mxu1 %v6149_v34 }
  0x79   :  { %4605 = vmatprep.subr.bf16.mxu1 %v5865_v48 }
  0x7a   :  { %4584 = vmatpush1.bf16.msra.mxu0 %v6046_v31 }
  0x7b   :  { %3903 = vmatmul.mubr.f32.vlgmr.msra.gmra.mrb[8].mxu1 %v5864_v0  ;;  %4586 = vmatprep.subr.bf16.mxu0 %v6049_v33 }
  0x7c   :  { %4607 = vmatpush3.bf16.msra.mxu1 %v6052_v40  ;;  %3937 = vmatprep.mubr.msk.f32.mxu1 %vm5866_vm1, %v5864_v0 }
  0x7d   :  { %4608 = vmatprep.subr.bf16.mxu1 %v5865_v48 }
  0x7e   :  { %4588 = vmatpush1.bf16.msra.mxu0 %v6059_v42 }
  0x7f   :  { %4590 = vmatprep.subr.bf16.mxu0 %v6062_v45 }
  0x80   :  { %4610 = vmatpush3.bf16.msra.mxu1 %v6068_v51 }
  0x81   :  { %4611 = vmatprep.subr.bf16.mxu1 %v5865_v48 }
  0x82   :  { %4592 = vmatpush1.bf16.msra.mxu0 %v6075_v53 }
  0x83   :  { %4594 = vmatprep.subr.bf16.mxu0 %v6078_v56 }
  0x84   :  { %4613 = vmatpush3.bf16.msra.mxu1 %v6084_v61 }
  0x85   :  { %4614 = vmatprep.subr.bf16.mxu1 %v5865_v48 }
  0x86   :  { %4596 = vmatpush1.bf16.msra.mxu0 %v6091_v63 }
  0x87   :  { %4598 = vmatprep.subr.bf16.mxu0 %v6094_v3 }
  0x88   :  { %4616 = vmatpush3.bf16.msra.mxu1 %v6100_v8 }
  0x89   :  { %4617 = vmatprep.subr.bf16.mxu1 %v5865_v48 }
  0x8a   :  { %4600 = vmatpush1.bf16.msra.mxu0 %v6107_v10 }
  0x8b   :  { %4602 = vmatprep.subr.bf16.mxu0 %v6110_v14 }
  0x8c   :  { %4619 = vmatpush3.bf16.msra.mxu1 %v6116_v19 }
  0x8d   :  { %4620 = vmatprep.subr.bf16.mxu1 %v5865_v48 }
  0x8e   :  { %4604 = vmatpush1.bf16.msra.mxu0 %v6123_v21 }
  0x8f   :  { %4630 = vmatprep.subr.bf16.mxu0 %v6016_v12 }
  0x90   :  { %4622 = vmatpush3.bf16.msra.mxu1 %v6130_v26 }
  0x91   :  { %4623 = vmatprep.subr.bf16.mxu1 %v5865_v48 }
  0x94   :  { %4625 = vmatpush3.bf16.msra.mxu1 %v6140_v29 }
  0x95   :  { %4626 = vmatprep.subr.bf16.mxu1 %v5865_v48 }
  0x98   :  { %4628 = vmatpush3.bf16.msra.mxu1 %v6149_v34 }
  0x99   :  { %4661 = vmatprep.subr.bf16.mxu1 %v5865_v48 }
 0x12e   :  { %v3860_v41 = vpop.f32.mrb[0].mxu1 }
 0x12f   :  { %v6195_v43 = vadd.f32 %v3860_v41, %v170_v39  ;;  %v378_v44 = vpop.f32.mrb[1].mxu1 }
 0x130   :  { %v379_v35 = vadd.f32 %v378_v44, %v170_v39 }
 0x132   :  { %v3863_v46 = vpop.f32.mrb[2].mxu1 }
 0x133   :  { %v6197_v47 = vadd.f32 %v3863_v46, %v170_v39  ;;  %v388_v49 = vpop.f32.mrb[3].mxu1 }
 0x134   :  { %v6199_v50 = vadd.f32 %v388_v49, %v170_v39 }
 0x136   :  { %v3866_v54 = vpop.f32.mrb[4].mxu1 }
 0x137   :  { %v6202_v55 = vadd.f32 %v3866_v54, %v170_v39  ;;  %v398_v57 = vpop.f32.mrb[5].mxu1 }
 0x138   :  { %v6208_v59 = vadd.f32 %v398_v57, %v170_v39 }
 0x13a   :  { %v3869_v60 = vpop.f32.mrb[6].mxu1 }
 0x13b   :  { %v6210_v1 = vadd.f32 %v3869_v60, %v170_v39  ;;  %v408_v2 = vpop.f32.mrb[7].mxu1 }
 0x13c   :  { %v6214_v7 = vadd.f32 %v408_v2, %v170_v39 }
 0x144   :  { %v489_v62 = vpop.f32.mrb[0].mxu0 }
 0x145   :  { %v5501_v4 = vadd.f32 %v489_v62, %v6206_v58  ;;  %v491_v6 = vpop.f32.mrb[1].mxu0 }
 0x146   :  { %v5502_v13 = vadd.f32 %v491_v6, %v6218_v11 }
 0x147   :  { %v3497_v9 = vmul.f32 -1.442695, %v5501_v4 }
 0x148   :  { %v3498_v20 = vmul.f32 -1.442695, %v5502_v13 }
 0x149   :  { %5577 = vpow2.f32 %v3497_v9 }
 0x14a   :  { %5579 = vpow2.f32 %v3498_v20 }
 0x14e   :  { %v560_v17 = vpop.f32.mrb[8].mxu1 }
 0x14f   :  { %v3904_v18 = vpop.f32.mrb[9].mxu1  ;;  %v578_v28 = vadd.f32 %v6224_v27, %v560_v17 }
 0x153   :  { %v5578_v24 = vpop.eup %5577 }
 0x154   :  { %v568_v25 = vadd.f32 1.0, %v5578_v24  ;;  %v5580_v30 = vpop.eup %5579 }
 0x155   :  { %v575_v41 = vadd.f32 1.0, %v5580_v30 }
 0x156   :  { %5581 = vrcp.f32 %v568_v25 }
 0x160   :  { %v5582_v32 = vpop.eup %5581 }
 0x161   :  { %v579_v38 = vmul.f32 %v5582_v32, %v578_v28 }
 0x163   :  { %v580_v46 = vadd.f32 %v579_v38, %v379_v35 }
 0x165   :  { %5583 = vtanh.f32 %v580_v46 }
 0x166   :  { %5585 = vrcp.f32 %v575_v41 }
 0x16f   :  { %v5584_v49 = vpop.eup %5583 }
 0x170   :  { %v582_v54 = vsub.f32 0.0, %v5584_v49  ;;  %v5586_v57 = vpop.eup %5585 }
 0x172   :  { %v583_v60 = vmul.f32 %v5586_v57, %v582_v54 }
 0x174   :  { %v6227_v62 = vadd.f32 %v5584_v49, %v583_v60 }
 0x176   :  { %651 = vmatmul.mubr.f32.vlgmr.msra.gmra.mrb[2].mxu0 %v6227_v62  ;;  %3938 = vmatmul.mubr.f32.vlgmr.msra.gmra.mrb[10].mxu1 %v6227_v62 }
 0x177   :  { %4632 = vmatpush1.bf16.msra.mxu0 %v6018_v15  ;;  %4663 = vmatpush3.bf16.msra.mxu1 %v6052_v40 }
 0x178   :  { %4634 = vmatprep.subr.bf16.mxu0 %v6021_v16  ;;  %4664 = vmatprep.subr.bf16.mxu1 %v5865_v48 }
 0x179   :  { %813 = vmatprep.mubr.f32.mxu0 %v5864_v0  ;;  %3972 = vmatprep.mubr.msk.f32.mxu1 %vm5866_vm1, %v5864_v0 }
 0x17b   :  { %4636 = vmatpush1.bf16.msra.mxu0 %v6029_v22  ;;  %4666 = vmatpush3.bf16.msra.mxu1 %v6068_v51 }
 0x17c   :  { %4638 = vmatprep.subr.bf16.mxu0 %v6032_v23  ;;  %4667 = vmatprep.subr.bf16.mxu1 %v5865_v48 }
 0x17f   :  { %4640 = vmatpush1.bf16.msra.mxu0 %v6046_v31  ;;  %4669 = vmatpush3.bf16.msra.mxu1 %v6084_v61 }
 0x180   :  { %4642 = vmatprep.subr.bf16.mxu0 %v6049_v33  ;;  %4670 = vmatprep.subr.bf16.mxu1 %v5865_v48 }
 0x183   :  { %4644 = vmatpush1.bf16.msra.mxu0 %v6059_v42  ;;  %4672 = vmatpush3.bf16.msra.mxu1 %v6100_v8 }
 0x184   :  { %4646 = vmatprep.subr.bf16.mxu0 %v6062_v45  ;;  %4673 = vmatprep.subr.bf16.mxu1 %v5865_v48 }
 0x187   :  { %4648 = vmatpush1.bf16.msra.mxu0 %v6075_v53  ;;  %4675 = vmatpush3.bf16.msra.mxu1 %v6116_v19 }
 0x188   :  { %4650 = vmatprep.subr.bf16.mxu0 %v6078_v56  ;;  %4676 = vmatprep.subr.bf16.mxu1 %v5865_v48 }
 0x18b   :  { %4652 = vmatpush1.bf16.msra.mxu0 %v6091_v63  ;;  %4678 = vmatpush3.bf16.msra.mxu1 %v6130_v26 }
 0x18c   :  { %4654 = vmatprep.subr.bf16.mxu0 %v6094_v3  ;;  %4679 = vmatprep.subr.bf16.mxu1 %v5865_v48 }
 0x18f   :  { %4656 = vmatpush1.bf16.msra.mxu0 %v6107_v10  ;;  %4681 = vmatpush3.bf16.msra.mxu1 %v6140_v29 }
 0x190   :  { %4658 = vmatprep.subr.bf16.mxu0 %v6110_v14  ;;  %4682 = vmatprep.subr.bf16.mxu1 %v5865_v48 }
 0x193   :  { %4660 = vmatpush1.bf16.msra.mxu0 %v6123_v21  ;;  %4684 = vmatpush3.bf16.msra.mxu1 %v6149_v34 }
 0x194   :  { %4686 = vmatprep.subr.bf16.mxu0 %v6016_v12  ;;  %4717 = vmatprep.subr.bf16.mxu1 %v5865_v48 }
 0x249   :  { %v652_v39 = vpop.f32.mrb[2].mxu0  ;;  %v723_v44 = vpop.f32.mrb[10].mxu1 }
 0x24a   :  { %v5503_v2 = vadd.f32 %v652_v39, %v6206_v58  ;;  %v654_v4 = vpop.f32.mrb[3].mxu0  ;;  %v3939_v6 = vpop.f32.mrb[11].mxu1  ;;  %v741_v25 = vadd.f32 %v6224_v27, %v723_v44 }
 0x24b   :  { %v5504_v13 = vadd.f32 %v654_v4, %v6218_v11 }
 0x24c   :  { %v3499_v9 = vmul.f32 -1.442695, %v5503_v2 }
 0x24d   :  { %v3500_v17 = vmul.f32 -1.442695, %v5504_v13 }
 0x24e   :  { %5587 = vpow2.f32 %v3499_v9 }
 0x24f   :  { %5589 = vpow2.f32 %v3500_v17 }
 0x258   :  { %v5588_v18 = vpop.eup %5587 }
 0x259   :  { %v731_v20 = vadd.f32 1.0, %v5588_v18  ;;  %v5590_v24 = vpop.eup %5589 }
 0x25a   :  { %v738_v35 = vadd.f32 1.0, %v5590_v24 }
 0x25b   :  { %5591 = vrcp.f32 %v731_v20 }
 0x265   :  { %v5592_v28 = vpop.eup %5591 }
 0x266   :  { %v742_v30 = vmul.f32 %v5592_v28, %v741_v25 }
 0x268   :  { %v743_v32 = vadd.f32 %v742_v30, %v6195_v43 }
 0x26a   :  { %5593 = vtanh.f32 %v743_v32 }
 0x26b   :  { %5595 = vrcp.f32 %v738_v35 }
 0x274   :  { %v5594_v38 = vpop.eup %5593 }
 0x275   :  { %v745_v41 = vsub.f32 %v6227_v62, %v5594_v38  ;;  %v5596_v46 = vpop.eup %5595 }
 0x277   :  { %v746_v49 = vmul.f32 %v5596_v46, %v745_v41 }
 0x279   :  { %v6271_v54 = vadd.f32 %v5594_v38, %v746_v49 }
 0x27b   :  { %814 = vmatmul.mubr.f32.vlgmr.msra.gmra.mrb[4].mxu0 %v6271_v54  ;;  %3973 = vmatmul.mubr.f32.vlgmr.msra.gmra.mrb[12].mxu1 %v6271_v54 }
 0x27c   :  { %4688 = vmatpush1.bf16.msra.mxu0 %v6018_v15  ;;  %4719 = vmatpush3.bf16.msra.mxu1 %v6052_v40 }
 0x27d   :  { %4690 = vmatprep.subr.bf16.mxu0 %v6021_v16  ;;  %4720 = vmatprep.subr.bf16.mxu1 %v5865_v48 }
 0x27e   :  { %976 = vmatprep.mubr.f32.mxu0 %v5864_v0  ;;  %4007 = vmatprep.mubr.msk.f32.mxu1 %vm5866_vm1, %v5864_v0 }
 0x280   :  { %4692 = vmatpush1.bf16.msra.mxu0 %v6029_v22  ;;  %4722 = vmatpush3.bf16.msra.mxu1 %v6068_v51 }
 0x281   :  { %4694 = vmatprep.subr.bf16.mxu0 %v6032_v23  ;;  %4723 = vmatprep.subr.bf16.mxu1 %v5865_v48 }
 0x284   :  { %4696 = vmatpush1.bf16.msra.mxu0 %v6046_v31  ;;  %4725 = vmatpush3.bf16.msra.mxu1 %v6084_v61 }
 0x285   :  { %4698 = vmatprep.subr.bf16.mxu0 %v6049_v33  ;;  %4726 = vmatprep.subr.bf16.mxu1 %v5865_v48 }
 0x288   :  { %4700 = vmatpush1.bf16.msra.mxu0 %v6059_v42  ;;  %4728 = vmatpush3.bf16.msra.mxu1 %v6100_v8 }
 0x289   :  { %4702 = vmatprep.subr.bf16.mxu0 %v6062_v45  ;;  %4729 = vmatprep.subr.bf16.mxu1 %v5865_v48 }
 0x28c   :  { %4704 = vmatpush1.bf16.msra.mxu0 %v6075_v53  ;;  %4731 = vmatpush3.bf16.msra.mxu1 %v6116_v19 }
 0x28d   :  { %4706 = vmatprep.subr.bf16.mxu0 %v6078_v56  ;;  %4732 = vmatprep.subr.bf16.mxu1 %v5865_v48 }
 0x290   :  { %4708 = vmatpush1.bf16.msra.mxu0 %v6091_v63  ;;  %4734 = vmatpush3.bf16.msra.mxu1 %v6130_v26 }
 0x291   :  { %4710 = vmatprep.subr.bf16.mxu0 %v6094_v3  ;;  %4735 = vmatprep.subr.bf16.mxu1 %v5865_v48 }
 0x294   :  { %4712 = vmatpush1.bf16.msra.mxu0 %v6107_v10  ;;  %4737 = vmatpush3.bf16.msra.mxu1 %v6140_v29 }
 0x295   :  { %4714 = vmatprep.subr.bf16.mxu0 %v6110_v14  ;;  %4738 = vmatprep.subr.bf16.mxu1 %v5865_v48 }
 0x298   :  { %4716 = vmatpush1.bf16.msra.mxu0 %v6123_v21  ;;  %4740 = vmatpush3.bf16.msra.mxu1 %v6149_v34 }
 0x299   :  { %4742 = vmatprep.subr.bf16.mxu0 %v6016_v12  ;;  %4773 = vmatprep.subr.bf16.mxu1 %v5865_v48 }
 0x34e   :  { %v815_v43 = vpop.f32.mrb[4].mxu0  ;;  %v886_v57 = vpop.f32.mrb[12].mxu1 }
 0x34f   :  { %v5505_v60 = vadd.f32 %v815_v43, %v6206_v58  ;;  %v817_v39 = vpop.f32.mrb[5].mxu0  ;;  %v3974_v44 = vpop.f32.mrb[13].mxu1  ;;  %v904_v18 = vadd.f32 %v6224_v27, %v886_v57 }
 0x350   :  { %v5506_v4 = vadd.f32 %v817_v39, %v6218_v11 }
 0x351   :  { %v3501_v2 = vmul.f32 -1.442695, %v5505_v60 }
 0x352   :  { %v3502_v6 = vmul.f32 -1.442695, %v5506_v4 }
 0x353   :  { %5597 = vpow2.f32 %v3501_v2 }
 0x354   :  { %5599 = vpow2.f32 %v3502_v6 }
 0x35d   :  { %v5598_v9 = vpop.eup %5597 }
 0x35e   :  { %v894_v13 = vadd.f32 1.0, %v5598_v9  ;;  %v5600_v17 = vpop.eup %5599 }
 0x35f   :  { %v901_v28 = vadd.f32 1.0, %v5600_v17 }
 0x360   :  { %5601 = vrcp.f32 %v894_v13 }
 0x36a   :  { %v5602_v20 = vpop.eup %5601 }
 0x36b   :  { %v905_v24 = vmul.f32 %v5602_v20, %v904_v18 }
 0x36d   :  { %v906_v25 = vadd.f32 %v905_v24, %v6199_v50 }
 0x36f   :  { %5603 = vtanh.f32 %v906_v25 }
 0x370   :  { %5605 = vrcp.f32 %v901_v28 }
 0x379   :  { %v5604_v30 = vpop.eup %5603 }
 0x37a   :  { %v908_v32 = vsub.f32 %v6271_v54, %v5604_v30  ;;  %v5606_v35 = vpop.eup %5605 }
 0x37c   :  { %v909_v38 = vmul.f32 %v5606_v35, %v908_v32 }
 0x37e   :  { %v6315_v41 = vadd.f32 %v5604_v30, %v909_v38 }
 0x380   :  { %977 = vmatmul.mubr.f32.vlgmr.msra.gmra.mrb[6].mxu0 %v6315_v41  ;;  %4008 = vmatmul.mubr.f32.vlgmr.msra.gmra.mrb[14].mxu1 %v6315_v41 }
 0x381   :  { %4744 = vmatpush1.bf16.msra.mxu0 %v6018_v15  ;;  %4775 = vmatpush3.bf16.msra.mxu1 %v6052_v40 }
 0x382   :  { %4746 = vmatprep.subr.bf16.mxu0 %v6021_v16  ;;  %4776 = vmatprep.subr.bf16.mxu1 %v5865_v48 }
 0x383   :  { %1139 = vmatprep.mubr.f32.mxu0 %v5864_v0  ;;  %4042 = vmatprep.mubr.msk.f32.mxu1 %vm5866_vm1, %v5864_v0 }
 0x385   :  { %4748 = vmatpush1.bf16.msra.mxu0 %v6029_v22  ;;  %4778 = vmatpush3.bf16.msra.mxu1 %v6068_v51 }
 0x386   :  { %4750 = vmatprep.subr.bf16.mxu0 %v6032_v23  ;;  %4779 = vmatprep.subr.bf16.mxu1 %v5865_v48 }
 0x389   :  { %4752 = vmatpush1.bf16.msra.mxu0 %v6046_v31  ;;  %4781 = vmatpush3.bf16.msra.mxu1 %v6084_v61 }
 0x38a   :  { %4754 = vmatprep.subr.bf16.mxu0 %v6049_v33  ;;  %4782 = vmatprep.subr.bf16.mxu1 %v5865_v48 }
 0x38d   :  { %4756 = vmatpush1.bf16.msra.mxu0 %v6059_v42  ;;  %4784 = vmatpush3.bf16.msra.mxu1 %v6100_v8 }
 0x38e   :  { %4758 = vmatprep.subr.bf16.mxu0 %v6062_v45  ;;  %4785 = vmatprep.subr.bf16.mxu1 %v5865_v48 }
 0x391   :  { %4760 = vmatpush1.bf16.msra.mxu0 %v6075_v53  ;;  %4787 = vmatpush3.bf16.msra.mxu1 %v6116_v19 }
 0x392   :  { %4762 = vmatprep.subr.bf16.mxu0 %v6078_v56  ;;  %4788 = vmatprep.subr.bf16.mxu1 %v5865_v48 }
 0x395   :  { %4764 = vmatpush1.bf16.msra.mxu0 %v6091_v63  ;;  %4790 = vmatpush3.bf16.msra.mxu1 %v6130_v26 }
 0x396   :  { %4766 = vmatprep.subr.bf16.mxu0 %v6094_v3  ;;  %4791 = vmatprep.subr.bf16.mxu1 %v5865_v48 }
 0x399   :  { %4768 = vmatpush1.bf16.msra.mxu0 %v6107_v10  ;;  %4793 = vmatpush3.bf16.msra.mxu1 %v6140_v29 }
 0x39a   :  { %4770 = vmatprep.subr.bf16.mxu0 %v6110_v14  ;;  %4794 = vmatprep.subr.bf16.mxu1 %v5865_v48 }
 0x39d   :  { %4772 = vmatpush1.bf16.msra.mxu0 %v6123_v21  ;;  %4796 = vmatpush3.bf16.msra.mxu1 %v6149_v34 }
 0x39e   :  { %4798 = vmatprep.subr.bf16.mxu0 %v6016_v12  ;;  %4829 = vmatprep.subr.bf16.mxu1 %v5865_v48 }
 0x453   :  { %v978_v50 = vpop.f32.mrb[6].mxu0  ;;  %v1049_v46 = vpop.f32.mrb[14].mxu1 }
 0x454   :  { %v5507_v49 = vadd.f32 %v978_v50, %v6206_v58  ;;  %v980_v43 = vpop.f32.mrb[7].mxu0  ;;  %v4009_v57 = vpop.f32.mrb[15].mxu1  ;;  %v1067_v9 = vadd.f32 %v6224_v27, %v1049_v46 }
 0x455   :  { %v5508_v39 = vadd.f32 %v980_v43, %v6218_v11 }
 0x456   :  { %v3503_v60 = vmul.f32 -1.442695, %v5507_v49 }
 0x457   :  { %v3504_v44 = vmul.f32 -1.442695, %v5508_v39 }
 0x458   :  { %5607 = vpow2.f32 %v3503_v60 }
 0x459   :  { %5609 = vpow2.f32 %v3504_v44 }
 0x462   :  { %v5608_v2 = vpop.eup %5607 }
 0x463   :  { %v1057_v4 = vadd.f32 1.0, %v5608_v2  ;;  %v5610_v6 = vpop.eup %5609 }
 0x464   :  { %v1064_v20 = vadd.f32 1.0, %v5610_v6 }
 0x465   :  { %5611 = vrcp.f32 %v1057_v4 }
 0x46f   :  { %v5612_v13 = vpop.eup %5611 }
 0x470   :  { %v1068_v17 = vmul.f32 %v5612_v13, %v1067_v9 }
 0x472   :  { %v1069_v18 = vadd.f32 %v1068_v17, %v6197_v47 }
 0x474   :  { %5613 = vtanh.f32 %v1069_v18 }
 0x475   :  { %5615 = vrcp.f32 %v1064_v20 }
 0x47e   :  { %v5614_v24 = vpop.eup %5613 }
 0x47f   :  { %v1071_v25 = vsub.f32 %v6315_v41, %v5614_v24  ;;  %v5616_v28 = vpop.eup %5615 }
 0x481   :  { %v1072_v30 = vmul.f32 %v5616_v28, %v1071_v25 }
 0x483   :  { %v6359_v32 = vadd.f32 %v5614_v24, %v1072_v30 }
 0x485   :  { %1140 = vmatmul.mubr.f32.vlgmr.msra.gmra.mrb[8].mxu0 %v6359_v32  ;;  %4043 = vmatmul.mubr.f32.vlgmr.msra.gmra.mrb[16].mxu1 %v6359_v32 }
 0x486   :  { %4800 = vmatpush1.bf16.msra.mxu0 %v6018_v15  ;;  %4831 = vmatpush3.bf16.msra.mxu1 %v6052_v40 }
 0x487   :  { %4802 = vmatprep.subr.bf16.mxu0 %v6021_v16  ;;  %4832 = vmatprep.subr.bf16.mxu1 %v5865_v48 }
 0x488   :  { %1302 = vmatprep.mubr.f32.mxu0 %v5864_v0  ;;  %4077 = vmatprep.mubr.msk.f32.mxu1 %vm5866_vm1, %v5864_v0 }
 0x48a   :  { %4804 = vmatpush1.bf16.msra.mxu0 %v6029_v22  ;;  %4834 = vmatpush3.bf16.msra.mxu1 %v6068_v51 }
 0x48b   :  { %4806 = vmatprep.subr.bf16.mxu0 %v6032_v23  ;;  %4835 = vmatprep.subr.bf16.mxu1 %v5865_v48 }
 0x48e   :  { %4808 = vmatpush1.bf16.msra.mxu0 %v6046_v31  ;;  %4837 = vmatpush3.bf16.msra.mxu1 %v6084_v61 }
 0x48f   :  { %4810 = vmatprep.subr.bf16.mxu0 %v6049_v33  ;;  %4838 = vmatprep.subr.bf16.mxu1 %v5865_v48 }
 0x492   :  { %4812 = vmatpush1.bf16.msra.mxu0 %v6059_v42  ;;  %4840 = vmatpush3.bf16.msra.mxu1 %v6100_v8 }
 0x493   :  { %4814 = vmatprep.subr.bf16.mxu0 %v6062_v45  ;;  %4841 = vmatprep.subr.bf16.mxu1 %v5865_v48 }
 0x496   :  { %4816 = vmatpush1.bf16.msra.mxu0 %v6075_v53  ;;  %4843 = vmatpush3.bf16.msra.mxu1 %v6116_v19 }
 0x497   :  { %4818 = vmatprep.subr.bf16.mxu0 %v6078_v56  ;;  %4844 = vmatprep.subr.bf16.mxu1 %v5865_v48 }
 0x49a   :  { %4820 = vmatpush1.bf16.msra.mxu0 %v6091_v63  ;;  %4846 = vmatpush3.bf16.msra.mxu1 %v6130_v26 }
 0x49b   :  { %4822 = vmatprep.subr.bf16.mxu0 %v6094_v3  ;;  %4847 = vmatprep.subr.bf16.mxu1 %v5865_v48 }
 0x49e   :  { %4824 = vmatpush1.bf16.msra.mxu0 %v6107_v10  ;;  %4849 = vmatpush3.bf16.msra.mxu1 %v6140_v29 }
 0x49f   :  { %4826 = vmatprep.subr.bf16.mxu0 %v6110_v14  ;;  %4850 = vmatprep.subr.bf16.mxu1 %v5865_v48 }
 0x4a2   :  { %4828 = vmatpush1.bf16.msra.mxu0 %v6123_v21  ;;  %4852 = vmatpush3.bf16.msra.mxu1 %v6149_v34 }
 0x4a3   :  { %4854 = vmatprep.subr.bf16.mxu0 %v6016_v12  ;;  %4885 = vmatprep.subr.bf16.mxu1 %v5865_v48 }
 0x558   :  { %v1141_v47 = vpop.f32.mrb[8].mxu0  ;;  %v1212_v35 = vpop.f32.mrb[16].mxu1 }
 0x559   :  { %v5509_v38 = vadd.f32 %v1141_v47, %v6206_v58  ;;  %v1143_v50 = vpop.f32.mrb[9].mxu0  ;;  %v4044_v46 = vpop.f32.mrb[17].mxu1  ;;  %v1230_v2 = vadd.f32 %v6224_v27, %v1212_v35 }
 0x55a   :  { %v5510_v43 = vadd.f32 %v1143_v50, %v6218_v11 }
 0x55b   :  { %v3505_v49 = vmul.f32 -1.442695, %v5509_v38 }
 0x55c   :  { %v3506_v57 = vmul.f32 -1.442695, %v5510_v43 }
 0x55d   :  { %5617 = vpow2.f32 %v3505_v49 }
 0x55e   :  { %5619 = vpow2.f32 %v3506_v57 }
 0x567   :  { %v5618_v60 = vpop.eup %5617 }
 0x568   :  { %v1220_v39 = vadd.f32 1.0, %v5618_v60  ;;  %v5620_v44 = vpop.eup %5619 }
 0x569   :  { %v1227_v13 = vadd.f32 1.0, %v5620_v44 }
 0x56a   :  { %5621 = vrcp.f32 %v1220_v39 }
 0x574   :  { %v5622_v4 = vpop.eup %5621 }
 0x575   :  { %v1231_v6 = vmul.f32 %v5622_v4, %v1230_v2 }
 0x577   :  { %v1232_v9 = vadd.f32 %v1231_v6, %v6208_v59 }
 0x579   :  { %5623 = vtanh.f32 %v1232_v9 }
 0x57a   :  { %5625 = vrcp.f32 %v1227_v13 }
 0x583   :  { %v5624_v17 = vpop.eup %5623 }
 0x584   :  { %v1234_v18 = vsub.f32 %v6359_v32, %v5624_v17  ;;  %v5626_v20 = vpop.eup %5625 }
 0x586   :  { %v1235_v24 = vmul.f32 %v5626_v20, %v1234_v18  ;;  %v1727_v18 = vld [vmem:[#allocation6] sm:$0xff]  ;;  %v1730_v20 = vld [vmem:[#allocation6 + $0x18] sm:$0xff] }
 0x588   :  { %v6403_v25 = vadd.f32 %v5624_v17, %v1235_v24 }
 0x58a   :  { %1303 = vmatmul.mubr.f32.vlgmr.msra.gmra.mrb[10].mxu0 %v6403_v25  ;;  %4078 = vmatmul.mubr.f32.vlgmr.msra.gmra.mrb[18].mxu1 %v6403_v25 }
 0x58b   :  { %4856 = vmatpush1.bf16.msra.mxu0 %v6018_v15  ;;  %4887 = vmatpush3.bf16.msra.mxu1 %v6052_v40 }
 0x58c   :  { %4858 = vmatprep.subr.bf16.mxu0 %v6021_v16  ;;  %4888 = vmatprep.subr.bf16.mxu1 %v5865_v48 }
 0x58d   :  { %1465 = vmatprep.mubr.f32.mxu0 %v5864_v0  ;;  %4112 = vmatprep.mubr.msk.f32.mxu1 %vm5866_vm1, %v5864_v0 }
 0x58f   :  { %4860 = vmatpush1.bf16.msra.mxu0 %v6029_v22  ;;  %4890 = vmatpush3.bf16.msra.mxu1 %v6068_v51 }
 0x590   :  { %4862 = vmatprep.subr.bf16.mxu0 %v6032_v23  ;;  %4891 = vmatprep.subr.bf16.mxu1 %v5865_v48 }
 0x593   :  { %4864 = vmatpush1.bf16.msra.mxu0 %v6046_v31  ;;  %4893 = vmatpush3.bf16.msra.mxu1 %v6084_v61 }
 0x594   :  { %4866 = vmatprep.subr.bf16.mxu0 %v6049_v33  ;;  %4894 = vmatprep.subr.bf16.mxu1 %v5865_v48 }
 0x597   :  { %4868 = vmatpush1.bf16.msra.mxu0 %v6059_v42  ;;  %4896 = vmatpush3.bf16.msra.mxu1 %v6100_v8 }
 0x598   :  { %4870 = vmatprep.subr.bf16.mxu0 %v6062_v45  ;;  %4897 = vmatprep.subr.bf16.mxu1 %v5865_v48 }
 0x59b   :  { %4872 = vmatpush1.bf16.msra.mxu0 %v6075_v53  ;;  %4899 = vmatpush3.bf16.msra.mxu1 %v6116_v19 }
 0x59c   :  { %4874 = vmatprep.subr.bf16.mxu0 %v6078_v56  ;;  %4900 = vmatprep.subr.bf16.mxu1 %v5865_v48 }
 0x59f   :  { %4876 = vmatpush1.bf16.msra.mxu0 %v6091_v63  ;;  %4902 = vmatpush3.bf16.msra.mxu1 %v6130_v26 }
 0x5a0   :  { %4878 = vmatprep.subr.bf16.mxu0 %v6094_v3  ;;  %4903 = vmatprep.subr.bf16.mxu1 %v5865_v48 }
 0x5a3   :  { %4880 = vmatpush1.bf16.msra.mxu0 %v6107_v10  ;;  %4905 = vmatpush3.bf16.msra.mxu1 %v6140_v29 }
 0x5a4   :  { %4882 = vmatprep.subr.bf16.mxu0 %v6110_v14  ;;  %4906 = vmatprep.subr.bf16.mxu1 %v5865_v48 }
 0x5a7   :  { %4884 = vmatpush1.bf16.msra.mxu0 %v6123_v21  ;;  %4908 = vmatpush3.bf16.msra.mxu1 %v6149_v34 }
 0x5a8   :  { %4910 = vmatprep.subr.bf16.mxu0 %v6016_v12  ;;  %4941 = vmatprep.subr.bf16.mxu1 %v5865_v48 }
 0x65d   :  { %v1304_v59 = vpop.f32.mrb[10].mxu0  ;;  %v1375_v28 = vpop.f32.mrb[18].mxu1 }
 0x65e   :  { %v5511_v30 = vadd.f32 %v1304_v59, %v6206_v58  ;;  %v1306_v47 = vpop.f32.mrb[11].mxu0  ;;  %v4079_v35 = vpop.f32.mrb[19].mxu1  ;;  %v1393_v12 = vadd.f32 %v6224_v27, %v1375_v28  ;;  %v1734_v59 = vld [vmem:[#allocation6 + $0x38] sm:$0xff]  ;;  %v1737_v28 = vld [vmem:[#allocation6 + $0x50] sm:$0xff] }
 0x65f   :  { %v5512_v50 = vadd.f32 %v1306_v47, %v6218_v11  ;;  %v1735_v47 = vld [vmem:[#allocation6 + $0x40] sm:$0xff]  ;;  %v1738_v35 = vld [vmem:[#allocation6 + $0x58] sm:$0xff] }
 0x660   :  { %v3507_v38 = vmul.f32 -1.442695, %v5511_v30 }
 0x661   :  { %v3508_v46 = vmul.f32 -1.442695, %v5512_v50  ;;  %v4969_v50 = vpack.c.bf16 %v1737_v28, %v1734_v59  ;;  %v1765_v59 = vld [vmem:[#allocation6 + $0x130] sm:$0xff]  ;;  %v1768_v28 = vld [vmem:[#allocation6 + $0x148] sm:$0xff] }
 0x662   :  { %5627 = vpow2.f32 %v3507_v38  ;;  %v4967_v38 = vpack.c.bf16 %v1730_v20, %v1727_v18  ;;  %v1760_v18 = vld [vmem:[#allocation6 + $0x108] sm:$0xff] }
 0x663   :  { %5629 = vpow2.f32 %v3508_v46  ;;  %v1733_v46 = vld [vmem:[#allocation6 + $0x30] sm:$0xff]  ;;  %v1764_v20 = vld [vmem:[#allocation6 + $0x128] sm:$0xff] }
 0x66c   :  { %v5628_v49 = vpop.eup %5627 }
 0x66d   :  { %v1383_v43 = vadd.f32 1.0, %v5628_v49  ;;  %v5630_v57 = vpop.eup %5629  ;;  %v1740_v49 = vld [vmem:[#allocation6 + $0x68] sm:$0xff] }
 0x66e   :  { %v1390_v2 = vadd.f32 1.0, %v5630_v57  ;;  %v1743_v57 = vld [vmem:[#allocation6 + $0x80] sm:$0xff] }
 0x66f   :  { %5631 = vrcp.f32 %v1383_v43  ;;  %v5001_v43 = vpack.c.bf16 %v1738_v35, %v1735_v47  ;;  %v5021_v35 = vpack.c.bf16 %v1768_v28, %v1765_v59  ;;  %v1815_v59 = vld [vmem:[#allocation8 + $0x140] sm:$0xff] }
 0x670   :  { %v1811_v28 = vld [vmem:[#allocation8 + $0x120] sm:$0xff] }
 0x679   :  { %v5632_v60 = vpop.eup %5631 }
 0x67a   :  { %v1394_v39 = vmul.f32 %v5632_v60, %v1393_v12  ;;  %v1741_v12 = vld [vmem:[#allocation6 + $0x70] sm:$0xff]  ;;  %v1744_v60 = vld [vmem:[#allocation6 + $0x88] sm:$0xff] }
 0x67c   :  { %v1395_v44 = vadd.f32 %v1394_v39, %v6202_v55 }
 0x67e   :  { %5633 = vtanh.f32 %v1395_v44  ;;  %v4973_v44 = vpack.c.bf16 %v1743_v57, %v1740_v49  ;;  %v1771_v49 = vld [vmem:[#allocation6 + $0x160] sm:$0xff] }
 0x67f   :  { %5635 = vrcp.f32 %v1390_v2  ;;  %v5005_v2 = vpack.c.bf16 %v1744_v60, %v1741_v12 }
 0x688   :  { %v5634_v4 = vpop.eup %5633 }
 0x689   :  { %v1397_v6 = vsub.f32 %v6403_v25, %v5634_v4  ;;  %v5636_v9 = vpop.eup %5635 }
 0x68b   :  { %v1398_v13 = vmul.f32 %v5636_v9, %v1397_v6  ;;  %v1742_v6 = vld [vmem:[#allocation6 + $0x78] sm:$0xff] }
 0x68c   :  { %v1746_v9 = vld [vmem:[#allocation6 + $0x98] sm:$0xff] }
 0x68d   :  { %v6447_v17 = vadd.f32 %v5634_v4, %v1398_v13  ;;  %v1739_v4 = vld [vmem:[#allocation6 + $0x60] sm:$0xff]  ;;  %v1749_v13 = vld [vmem:[#allocation6 + $0xb0] sm:$0xff] }
 0x68f   :  { %1466 = vmatmul.mubr.f32.vlgmr.msra.gmra.mrb[12].mxu0 %v6447_v17  ;;  %4113 = vmatmul.mubr.f32.vlgmr.msra.gmra.mrb[20].mxu1 %v6447_v17 }
 0x690   :  { %4912 = vmatpush1.bf16.msra.mxu0 %v6018_v15  ;;  %4943 = vmatpush3.bf16.msra.mxu1 %v6052_v40  ;;  %v1728_v15 = vld [vmem:[#allocation6 + $0x8] sm:$0xff] }
 0x691   :  { %4914 = vmatprep.subr.bf16.mxu0 %v6021_v16  ;;  %4944 = vmatprep.subr.bf16.mxu1 %v5865_v48  ;;  %v1731_v16 = vld [vmem:[#allocation6 + $0x20] sm:$0xff] }
 0x692   :  { %1628 = vmatprep.mubr.f32.mxu0 %v5864_v0  ;;  %4147 = vmatprep.mubr.msk.f32.mxu1 %vm5866_vm1, %v5864_v0 }
 0x694   :  { %4916 = vmatpush1.bf16.msra.mxu0 %v6029_v22  ;;  %4946 = vmatpush3.bf16.msra.mxu1 %v6068_v51  ;;  %v1729_v22 = vld [vmem:[#allocation6 + $0x10] sm:$0xff] }
 0x695   :  { %4918 = vmatprep.subr.bf16.mxu0 %v6032_v23  ;;  %4947 = vmatprep.subr.bf16.mxu1 %v5865_v48  ;;  %v4965_v23 = vpack.c.bf16 %v1731_v16, %v1728_v15  ;;  %v1747_v15 = vld [vmem:[#allocation6 + $0xa0] sm:$0xff]  ;;  %v1750_v16 = vld [vmem:[#allocation6 + $0xb8] sm:$0xff] }
 0x698   :  { %4920 = vmatpush1.bf16.msra.mxu0 %v6046_v31  ;;  %4949 = vmatpush3.bf16.msra.mxu1 %v6084_v61  ;;  %v1732_v31 = vld [vmem:[#allocation6 + $0x28] sm:$0xff] }
 0x699   :  { %4922 = vmatprep.subr.bf16.mxu0 %v6049_v33  ;;  %4950 = vmatprep.subr.bf16.mxu1 %v5865_v48  ;;  %v4997_v33 = vpack.c.bf16 %v1732_v31, %v1729_v22  ;;  %v4975_v22 = vpack.c.bf16 %v1742_v6, %v1739_v4  ;;  %v5009_v31 = vpack.c.bf16 %v1750_v16, %v1747_v15  ;;  %v1775_v4 = vld [vmem:[#allocation8] sm:$0xff]  ;;  %v1784_v15 = vld [vmem:[#allocation8 + $0x48] sm:$0xff] }
 0x69c   :  { %4924 = vmatpush1.bf16.msra.mxu0 %v6059_v42  ;;  %4952 = vmatpush3.bf16.msra.mxu1 %v6100_v8 }
 0x69d   :  { %4926 = vmatprep.subr.bf16.mxu0 %v6062_v45  ;;  %4953 = vmatprep.subr.bf16.mxu1 %v5865_v48 }
 0x6a0   :  { %4928 = vmatpush1.bf16.msra.mxu0 %v6075_v53  ;;  %4955 = vmatpush3.bf16.msra.mxu1 %v6116_v19 }
 0x6a1   :  { %4930 = vmatprep.subr.bf16.mxu0 %v6078_v56  ;;  %4956 = vmatprep.subr.bf16.mxu1 %v5865_v48 }
 0x6a4   :  { %4932 = vmatpush1.bf16.msra.mxu0 %v6091_v63  ;;  %4958 = vmatpush3.bf16.msra.mxu1 %v6130_v26 }
 0x6a5   :  { %4934 = vmatprep.subr.bf16.mxu0 %v6094_v3  ;;  %4959 = vmatprep.subr.bf16.mxu1 %v5865_v48 }
 0x6a8   :  { %4936 = vmatpush1.bf16.msra.mxu0 %v6107_v10  ;;  %4961 = vmatpush3.bf16.msra.mxu1 %v6140_v29 }
 0x6a9   :  { %4938 = vmatprep.subr.bf16.mxu0 %v6110_v14  ;;  %4962 = vmatprep.subr.bf16.mxu1 %v5865_v48 }
 0x6ac   :  { %4940 = vmatpush1.bf16.msra.mxu0 %v6123_v21  ;;  %4964 = vmatpush3.bf16.msra.mxu1 %v6149_v34 }
 0x6ad   :  { %4966 = vmatprep.subr.bf16.mxu0 %v4965_v23  ;;  %4998 = vmatprep.subr.bf16.mxu1 %v4997_v33  ;;  %v4977_v23 = vpack.c.bf16 %v1749_v13, %v1746_v9  ;;  %v1781_v13 = vld [vmem:[#allocation8 + $0x30] sm:$0xff] }
 0x6ae   :  { %v6524_v16 = vpack.c.bf16 %v1784_v15, %v1781_v13  ;;  %v1801_v13 = vld [vmem:[#allocation8 + $0xd0] sm:$0xff]  ;;  %v1804_v15 = vld [vmem:[#allocation8 + $0xe8] sm:$0xff] }
 0x762   :  { %v1467_v40 = vpop.f32.mrb[12].mxu0  ;;  %v1538_v42 = vpop.f32.mrb[20].mxu1 }
 0x763   :  { %v5513_v45 = vadd.f32 %v1467_v40, %v6206_v58  ;;  %v1469_v51 = vpop.f32.mrb[13].mxu0  ;;  %v4114_v53 = vpop.f32.mrb[21].mxu1  ;;  %v1556_v14 = vadd.f32 %v6224_v27, %v1538_v42  ;;  %v1748_v40 = vld [vmem:[#allocation6 + $0xa8] sm:$0xff] }
 0x764   :  { %v5514_v61 = vadd.f32 %v1469_v51, %v6218_v11  ;;  %v1752_v42 = vld [vmem:[#allocation6 + $0xc8] sm:$0xff]  ;;  %v1753_v51 = vld [vmem:[#allocation6 + $0xd0] sm:$0xff] }
 0x765   :  { %v3509_v56 = vmul.f32 -1.442695, %v5513_v45  ;;  %v1755_v45 = vld [vmem:[#allocation6 + $0xe0] sm:$0xff]  ;;  %v1756_v53 = vld [vmem:[#allocation6 + $0xe8] sm:$0xff] }
 0x766   :  { %v3510_v63 = vmul.f32 -1.442695, %v5514_v61  ;;  %v4981_v61 = vpack.c.bf16 %v1755_v45, %v1752_v42  ;;  %v1794_v45 = vld [vmem:[#allocation8 + $0x98] sm:$0xff] }
 0x767   :  { %5637 = vpow2.f32 %v3509_v56 }
 0x768   :  { %5639 = vpow2.f32 %v3510_v63  ;;  %v5013_v63 = vpack.c.bf16 %v1756_v53, %v1753_v51  ;;  %v1797_v51 = vld [vmem:[#allocation8 + $0xb0] sm:$0xff] }
 0x769   :  { %v6534_v53 = vpack.c.bf16 %v1797_v51, %v1794_v45  ;;  %v1813_v45 = vld [vmem:[#allocation8 + $0x130] sm:$0xff]  ;;  %v1816_v51 = vld [vmem:[#allocation8 + $0x148] sm:$0xff] }
 0x771   :  { %v5638_v3 = vpop.eup %5637 }
 0x772   :  { %v1546_v8 = vadd.f32 1.0, %v5638_v3  ;;  %v5640_v10 = vpop.eup %5639  ;;  %v1751_v3 = vld [vmem:[#allocation6 + $0xc0] sm:$0xff] }
 0x773   :  { %v1553_v29 = vadd.f32 1.0, %v5640_v10  ;;  %v1758_v10 = vld [vmem:[#allocation6 + $0xf8] sm:$0xff] }
 0x774   :  { %5641 = vrcp.f32 %v1546_v8  ;;  %v1754_v8 = vld [vmem:[#allocation6 + $0xd8] sm:$0xff] }
 0x77e   :  { %v5642_v19 = vpop.eup %5641 }
 0x77f   :  { %v1557_v21 = vmul.f32 %v5642_v19, %v1556_v14  ;;  %v1761_v14 = vld [vmem:[#allocation6 + $0x110] sm:$0xff]  ;;  %v1759_v19 = vld [vmem:[#allocation6 + $0x100] sm:$0xff] }
 0x781   :  { %v1558_v26 = vadd.f32 %v1557_v21, %v6214_v7  ;;  %v1736_v7 = vld [vmem:[#allocation6 + $0x48] sm:$0xff]  ;;  %v1762_v21 = vld [vmem:[#allocation6 + $0x118] sm:$0xff] }
 0x782   :  { %v4971_v39 = vpack.c.bf16 %v1736_v7, %v1733_v46  ;;  %v1770_v46 = vld [vmem:[#allocation6 + $0x158] sm:$0xff]  ;;  %v1773_v7 = vld [vmem:[#allocation6 + $0x170] sm:$0xff] }
 0x783   :  { %5643 = vtanh.f32 %v1558_v26  ;;  %v4983_v26 = vpack.c.bf16 %v1754_v8, %v1751_v3  ;;  %v4993_v12 = vpack.c.bf16 %v1773_v7, %v1770_v46  ;;  %v1800_v3 = vld [vmem:[#allocation8 + $0xc8] sm:$0xff]  ;;  %v1803_v8 = vld [vmem:[#allocation8 + $0xe0] sm:$0xff]  ;;  %v1818_v7 = vld [vmem:[#allocation8 + $0x158] sm:$0xff] }
 0x784   :  { %5645 = vrcp.f32 %v1553_v29  ;;  %v4985_v29 = vpack.c.bf16 %v1761_v14, %v1758_v10  ;;  %v6540_v10 = vpack.c.bf16 %v1803_v8, %v1800_v3  ;;  %v1799_v14 = vld [vmem:[#allocation8 + $0xc0] sm:$0xff]  ;;  %v1822_v3 = vld [vmem:[#allocation8 + $0x178] sm:$0xff] }
 0x78d   :  { %v5644_v34 = vpop.eup %5643 }
 0x78e   :  { %v1560_v55 = vsub.f32 %v6447_v17, %v5644_v34  ;;  %v5646_v24 = vpop.eup %5645 }
 0x790   :  { %v1561_v30 = vmul.f32 %v5646_v24, %v1560_v55  ;;  %v1757_v55 = vld [vmem:[#allocation6 + $0xf0] sm:$0xff]  ;;  %v1767_v24 = vld [vmem:[#allocation6 + $0x140] sm:$0xff] }
 0x791   :  { %v4989_v47 = vpack.c.bf16 %v1767_v24, %v1764_v20  ;;  %v1812_v24 = vld [vmem:[#allocation8 + $0x128] sm:$0xff] }
 0x792   :  { %v6489_v27 = vadd.f32 %v5644_v34, %v1561_v30  ;;  %v5017_v34 = vpack.c.bf16 %v1762_v21, %v1759_v19  ;;  %v4987_v30 = vpack.c.bf16 %v1760_v18, %v1757_v55  ;;  %v1802_v19 = vld [vmem:[#allocation8 + $0xd8] sm:$0xff]  ;;  %v1805_v55 = vld [vmem:[#allocation8 + $0xf0] sm:$0xff]  ;;  %v1808_v18 = vld [vmem:[#allocation8 + $0x108] sm:$0xff] }
 0x793   :  { %v6542_v21 = vpack.c.bf16 %v1802_v19, %v1799_v14  ;;  %v6548_v20 = vpack.c.bf16 %v1808_v18, %v1805_v55 }
 0x794   :  { %1629 = vmatmul.mubr.f32.vlgmr.msra.gmra.mrb[14].mxu0 %v6489_v27  ;;  %4148 = vmatmul.mubr.f32.vlgmr.msra.gmra.mrb[22].mxu1 %v6489_v27 }
 0x795   :  { %4968 = vmatpush1.bf16.msra.mxu0 %v4967_v38  ;;  %5000 = vmatpush3.bf16.msra.mxu1 %v4997_v33  ;;  %v1745_v33 = vld [vmem:[#allocation6 + $0x90] sm:$0xff]  ;;  %v1763_v38 = vld [vmem:[#allocation6 + $0x120] sm:$0xff] }
 0x796   :  { %4182 = vmatprep.mubr.f32.mxu1 %v6227_v62  ;;  %4970 = vmatprep.subr.bf16.mxu0 %v4969_v50  ;;  %v4979_v56 = vpack.c.bf16 %v1748_v40, %v1745_v33  ;;  %v1766_v50 = vld [vmem:[#allocation6 + $0x138] sm:$0xff]  ;;  %v1787_v33 = vld [vmem:[#allocation8 + $0x60] sm:$0xff] }
 0x797   :  { %5002 = vmatprep.subr.bf16.mxu1 %v5001_v43  ;;  %1913 = vmatprep.mubr.f32.mxu0 %v5864_v0  ;;  %v4991_v57 = vpack.c.bf16 %v1766_v50, %v1763_v38  ;;  %v1790_v40 = vld [vmem:[#allocation8 + $0x78] sm:$0xff]  ;;  %v1780_v38 = vld [vmem:[#allocation8 + $0x28] sm:$0xff] }
 0x798   :  { %v6530_v42 = vpack.c.bf16 %v1790_v40, %v1787_v33  ;;  %v1810_v33 = vld [vmem:[#allocation8 + $0x118] sm:$0xff] }
 0x799   :  { %4972 = vmatpush1.bf16.msra.mxu0 %v4971_v39  ;;  %5004 = vmatpush3.bf16.msra.mxu1 %v5001_v43  ;;  %v1774_v43 = vld [vmem:[#allocation6 + $0x178] sm:$0xff]  ;;  %v1769_v39 = vld [vmem:[#allocation6 + $0x150] sm:$0xff] }
 0x79a   :  { %4974 = vmatprep.subr.bf16.mxu0 %v4973_v44  ;;  %5006 = vmatprep.subr.bf16.mxu1 %v5005_v2  ;;  %v5025_v60 = vpack.c.bf16 %v1774_v43, %v1771_v49  ;;  %v1772_v44 = vld [vmem:[#allocation6 + $0x168] sm:$0xff]  ;;  %v1821_v49 = vld [vmem:[#allocation8 + $0x170] sm:$0xff] }
 0x79b   :  { %v6562_v43 = vpack.c.bf16 %v1821_v49, %v1818_v7 }
 0x79d   :  { %4976 = vmatpush1.bf16.msra.mxu0 %v4975_v22  ;;  %5008 = vmatpush3.bf16.msra.mxu1 %v5005_v2  ;;  %v4995_v2 = vpack.c.bf16 %v1772_v44, %v1769_v39  ;;  %v1788_v22 = vld [vmem:[#allocation8 + $0x68] sm:$0xff]  ;;  %v1783_v39 = vld [vmem:[#allocation8 + $0x40] sm:$0xff]  ;;  %v1786_v44 = vld [vmem:[#allocation8 + $0x58] sm:$0xff] }
 0x79e   :  { %4978 = vmatprep.subr.bf16.mxu0 %v4977_v23  ;;  %5010 = vmatprep.subr.bf16.mxu1 %v5009_v31  ;;  %v1791_v23 = vld [vmem:[#allocation8 + $0x80] sm:$0xff] }
 0x7a1   :  { %4980 = vmatpush1.bf16.msra.mxu0 %v4979_v56  ;;  %5012 = vmatpush3.bf16.msra.mxu1 %v5009_v31  ;;  %v6528_v31 = vpack.c.bf16 %v1791_v23, %v1788_v22  ;;  %v1793_v56 = vld [vmem:[#allocation8 + $0x90] sm:$0xff]  ;;  %v6580_v22 = vpack.c.bf16 %v1804_v15, %v1801_v13  ;;  %v1807_v23 = vld [vmem:[#allocation8 + $0x100] sm:$0xff] }
 0x7a2   :  { %4982 = vmatprep.subr.bf16.mxu0 %v4981_v61  ;;  %5014 = vmatprep.subr.bf16.mxu1 %v5013_v63  ;;  %v1796_v61 = vld [vmem:[#allocation8 + $0xa8] sm:$0xff]  ;;  %v6584_v40 = vpack.c.bf16 %v1810_v33, %v1807_v23 }
 0x7a5   :  { %4984 = vmatpush1.bf16.msra.mxu0 %v4983_v26  ;;  %5016 = vmatpush3.bf16.msra.mxu1 %v5013_v63  ;;  %v6536_v63 = vpack.c.bf16 %v1796_v61, %v1793_v56  ;;  %v1806_v26 = vld [vmem:[#allocation8 + $0xf8] sm:$0xff]  ;;  %v6588_v56 = vpack.c.bf16 %v1816_v51, %v1813_v45  ;;  %v1819_v61 = vld [vmem:[#allocation8 + $0x160] sm:$0xff] }
 0x7a6   :  { %4986 = vmatprep.subr.bf16.mxu0 %v4985_v29  ;;  %5018 = vmatprep.subr.bf16.mxu1 %v5017_v34  ;;  %v1809_v29 = vld [vmem:[#allocation8 + $0x110] sm:$0xff]  ;;  %v6592_v8 = vpack.c.bf16 %v1822_v3, %v1819_v61 }
 0x7a9   :  { %4988 = vmatpush1.bf16.msra.mxu0 %v4987_v30  ;;  %5020 = vmatpush3.bf16.msra.mxu1 %v5017_v34  ;;  %v6546_v34 = vpack.c.bf16 %v1809_v29, %v1806_v26  ;;  %v6551_v30 = vpack.c.bf16 %v1815_v59, %v1812_v24 }
 0x7aa   :  { %4990 = vmatprep.subr.bf16.mxu0 %v4989_v47  ;;  %5022 = vmatprep.subr.bf16.mxu1 %v5021_v35  ;;  %v1814_v47 = vld [vmem:[#allocation8 + $0x138] sm:$0xff] }
 0x7ab   :  { %v6554_v50 = vpack.c.bf16 %v1814_v47, %v1811_v28 }
 0x7ad   :  { %4992 = vmatpush1.bf16.msra.mxu0 %v4991_v57  ;;  %5024 = vmatpush3.bf16.msra.mxu1 %v5021_v35  ;;  %v1777_v35 = vld [vmem:[#allocation8 + $0x10] sm:$0xff] }
 0x7ae   :  { %4994 = vmatprep.subr.bf16.mxu0 %v4993_v12  ;;  %5026 = vmatprep.subr.bf16.mxu1 %v5025_v60  ;;  %v6556_v46 = vpack.c.bf16 %v1780_v38, %v1777_v35  ;;  %v1817_v57 = vld [vmem:[#allocation8 + $0x150] sm:$0xff]  ;;  %v1820_v12 = vld [vmem:[#allocation8 + $0x168] sm:$0xff] }
 0x7af   :  { %v5737_v38 = vld [vmem:[%s6987_s4] ss:$0 sm:$0xff] }
 0x7b1   :  { %4996 = vmatpush1.bf16.msra.mxu0 %v4995_v2  ;;  %5028 = vmatpush3.bf16.msra.mxu1 %v5025_v60  ;;  %v6564_v60 = vpack.c.bf16 %v1820_v12, %v1817_v57  ;;  %v6567_v2 = vpack.c.bf16 %v1786_v44, %v1783_v39 }
 0x7b2   :  { %5061 = vmatprep.subr.bf16.mxu1 %v5865_v48 }
 0x7b4   :  { %1914 = vmatmul.mubr.f32.vlgmr.msra.gmra.mrb[16].mxu0 %v6227_v62  ;;  %4183 = vmatmul.mubr.f32.vlgmr.msra.gmra.mrb[24].mxu1 %v6271_v54  ;;  %v1776_v62 = vld [vmem:[#allocation8 + $0x8] sm:$0xff] }
 0x7b5   :  { %4185 = vmatprep.mubr.f32.mxu1 %v6315_v41  ;;  %1919 = vmatprep.mubr.f32.mxu0 %v5864_v0 }
 0x7b6   :  { %5063 = vmatpush3.bf16.msra.mxu1 %v6556_v46 }
 0x7b7   :  { %5064 = vmatprep.subr.bf16.mxu1 %v5865_v48 }
 0x7b8   :  { %1920 = vmatmul.mubr.f32.gmra.mrb[18].mxu0 %v6271_v54  ;;  %4186 = vmatmul.mubr.f32.gmra.mrb[26].mxu1 %v6359_v32  ;;  %v1779_v54 = vld [vmem:[#allocation8 + $0x20] sm:$0xff] }
 0x7b9   :  { %4188 = vmatprep.mubr.f32.mxu1 %v6403_v25  ;;  %1925 = vmatprep.mubr.f32.mxu0 %v5864_v0 }
 0x7ba   :  { %5066 = vmatpush3.bf16.msra.mxu1 %v6567_v2 }
 0x7bb   :  { %5067 = vmatprep.subr.bf16.mxu1 %v5865_v48 }
 0x7bc   :  { %1926 = vmatmul.mubr.f32.gmra.mrb[20].mxu0 %v6315_v41  ;;  %4189 = vmatmul.mubr.f32.gmra.mrb[28].mxu1 %v6447_v17  ;;  %v6516_v41 = vpack.c.bf16 %v1779_v54, %v1776_v62  ;;  %v1789_v62 = vld [vmem:[#allocation8 + $0x70] sm:$0xff]  ;;  %v1792_v54 = vld [vmem:[#allocation8 + $0x88] sm:$0xff] }
 0x7bd   :  { %4191 = vmatprep.mubr.f32.mxu1 %v6489_v27  ;;  %1931 = vmatprep.mubr.f32.mxu0 %v5864_v0 }
 0x7be   :  { %5030 = vmatprep.subr.bf16.mxu0 %v6516_v41 }
 0x7c0   :  { %1932 = vmatmul.mubr.f32.gmra.mrb[22].mxu0 %v6359_v32  ;;  %v1778_v32 = vld [vmem:[#allocation8 + $0x18] sm:$0xff] }
 0x7c1   :  { %1937 = vmatprep.mubr.f32.mxu0 %v5864_v0  ;;  %v6518_v6 = vpack.c.bf16 %v1778_v32, %v1775_v4  ;;  %v1795_v4 = vld [vmem:[#allocation8 + $0xa0] sm:$0xff]  ;;  %v6573_v32 = vpack.c.bf16 %v1792_v54, %v1789_v62 }
 0x7c3   :  { %5032 = vmatpush1.bf16.msra.mxu0 %v6518_v6  ;;  %5069 = vmatpush3.bf16.msra.mxu1 %v6573_v32 }
 0x7c4   :  { %1938 = vmatmul.mubr.f32.gmra.mrb[24].mxu0 %v6403_v25  ;;  %v1782_v25 = vld [vmem:[#allocation8 + $0x38] sm:$0xff]  ;;  %5070 = vmatprep.subr.bf16.mxu1 %v5865_v48 }
 0x7c5   :  { %1943 = vmatprep.mubr.f32.mxu0 %v5864_v0 }
 0x7c8   :  { %1944 = vmatmul.mubr.f32.gmra.mrb[26].mxu0 %v6447_v17  ;;  %v1785_v17 = vld [vmem:[#allocation8 + $0x50] sm:$0xff] }
 0x7c9   :  { %1949 = vmatprep.mubr.f32.mxu0 %v5864_v0  ;;  %v6522_v9 = vpack.c.bf16 %v1785_v17, %v1782_v25  ;;  %v1798_v25 = vld [vmem:[#allocation8 + $0xb8] sm:$0xff] }
 0x7ca   :  { %v6576_v17 = vpack.c.bf16 %v1798_v25, %v1795_v4 }
 0x7cb   :  { %5034 = vmatprep.subr.bf16.mxu0 %v6522_v9 }
 0x7cc   :  { %1950 = vmatmul.mubr.f32.gmra.mrb[28].mxu0 %v6489_v27  ;;  %5072 = vmatpush3.bf16.msra.mxu1 %v6576_v17 }
 0x7cd   :  { %1955 = vmatprep.mubr.f32.mxu0 %v5864_v0  ;;  %5036 = vmatpush1.bf16.msra.mxu0 %v6524_v16 }
 0x7ce   :  { %5038 = vmatprep.subr.bf16.mxu0 %v6528_v31  ;;  %5073 = vmatprep.subr.bf16.mxu1 %v5865_v48 }
 0x7d0   :  { %5075 = vmatpush3.bf16.msra.mxu1 %v6580_v22 }
 0x7d1   :  { %5040 = vmatpush1.bf16.msra.mxu0 %v6530_v42  ;;  %5076 = vmatprep.subr.bf16.mxu1 %v5865_v48 }
 0x7d2   :  { %5042 = vmatprep.subr.bf16.mxu0 %v6534_v53 }
 0x7d4   :  { %5078 = vmatpush3.bf16.msra.mxu1 %v6584_v40 }
 0x7d5   :  { %5044 = vmatpush1.bf16.msra.mxu0 %v6536_v63  ;;  %5079 = vmatprep.subr.bf16.mxu1 %v5865_v48 }
 0x7d6   :  { %5046 = vmatprep.subr.bf16.mxu0 %v6540_v10 }
 0x7d8   :  { %5081 = vmatpush3.bf16.msra.mxu1 %v6588_v56 }
 0x7d9   :  { %5048 = vmatpush1.bf16.msra.mxu0 %v6542_v21  ;;  %5082 = vmatprep.subr.bf16.mxu1 %v5865_v48 }
 0x7da   :  { %5050 = vmatprep.subr.bf16.mxu0 %v6546_v34 }
 0x7dc   :  { %5084 = vmatpush3.bf16.msra.mxu1 %v6592_v8 }
 0x7dd   :  { %5052 = vmatpush1.bf16.msra.mxu0 %v6548_v20  ;;  %5117 = vmatprep.subr.bf16.mxu1 %v5865_v48 }
 0x7de   :  { %5054 = vmatprep.subr.bf16.mxu0 %v6551_v30 }
 0x7e1   :  { %5056 = vmatpush1.bf16.msra.mxu0 %v6554_v50 }
 0x7e2   :  { %5058 = vmatprep.subr.bf16.mxu0 %v6562_v43 }
 0x7e5   :  { %5060 = vmatpush1.bf16.msra.mxu0 %v6564_v60 }
 0x7e6   :  { %5086 = vmatprep.subr.bf16.mxu0 %v6516_v41 }
 0x867   :  { %v1630_v14 = vpop.f32.mrb[14].mxu0  ;;  %v1701_v19 = vpop.f32.mrb[22].mxu1 }
 0x868   :  { %v5515_v26 = vadd.f32 %v1630_v14, %v6206_v58  ;;  %v1632_v29 = vpop.f32.mrb[15].mxu0  ;;  %v4149_v55 = vpop.f32.mrb[23].mxu1  ;;  %v1719_v7 = vadd.f32 %v5737_v38, %v1701_v19 }
 0x869   :  { %v5516_v24 = vadd.f32 %v1632_v29, %v6218_v11 }
 0x86a   :  { %v3511_v18 = vmul.f32 -1.442695, %v5515_v26 }
 0x86b   :  { %v3512_v59 = vmul.f32 -1.442695, %v5516_v24 }
 0x86c   :  { %5647 = vpow2.f32 %v3511_v18 }
 0x86d   :  { %5649 = vpow2.f32 %v3512_v59 }
 0x876   :  { %v5648_v28 = vpop.eup %5647 }
 0x877   :  { %v1709_v47 = vadd.f32 1.0, %v5648_v28  ;;  %v5650_v35 = vpop.eup %5649 }
 0x878   :  { %v1716_v12 = vadd.f32 1.0, %v5650_v35 }
 0x879   :  { %5651 = vrcp.f32 %v1709_v47 }
 0x883   :  { %v5652_v49 = vpop.eup %5651 }
 0x884   :  { %v1720_v57 = vmul.f32 %v5652_v49, %v1719_v7 }
 0x886   :  { %v1721_v58 = vadd.f32 %v1720_v57, %v6210_v1 }
 0x887   :  { %v6603_v39 = vpop.f32.mrb[24].mxu1 }
 0x888   :  { %5653 = vtanh.f32 %v1721_v58  ;;  %v6605_v11 = vpop.f32.mrb[25].mxu1 }
 0x889   :  { %5655 = vrcp.f32 %v1716_v12 }
 0x88b   :  { %v6607_v44 = vpop.f32.mrb[26].mxu1 }
 0x88c   :  { %v6609_v62 = vpop.f32.mrb[27].mxu1 }
 0x88f   :  { %v6611_v54 = vpop.f32.mrb[28].mxu1 }
 0x890   :  { %v6613_v4 = vpop.f32.mrb[29].mxu1 }
 0x892   :  { %v5654_v25 = vpop.eup %5653 }
 0x893   :  { %v1723_v13 = vsub.f32 %v6489_v27, %v5654_v25  ;;  %v5656_v15 = vpop.eup %5655  ;;  %v1823_v27 = vld [vmem:[%s6990_s7] sm:$0x7] }
 0x894   :  { %v6665_v51 = vrot.slane %v1823_v27, %v161_v52  ;;  %v6670_v55 = vrot.slane %v1823_v27, %v165_v5  ;;  %v6676_v52 = vld [vmem:[%s6991_s8] ss:$0 sm:$0xff]  ;;  %v6680_v47 = vrot.slane %v1823_v27, %v169_v37 }
 0x895   :  { %v1724_v1 = vmul.f32 %v5656_v15, %v1723_v13 }
 0x896   :  { %v2029_v7 = vadd.f32 %v6605_v11, %v6680_v47 }
 0x897   :  { %v1725_v23 = vadd.f32 %v5654_v25, %v1724_v1 }
 0x899   :  { %1956 = vmatmul.mubr.f32.gmra.mrb[30].mxu0 %v1725_v23  ;;  %4192 = vmatmul.mubr.f32.gmra.mrb[30].mxu1 %v1725_v23 }
 0x89a   :  { %2137 = vmatprep.mubr.f32.mxu0 %v5864_v0  ;;  %4226 = vmatprep.mubr.msk.f32.mxu1 %vm5866_vm1, %v5864_v0 }
 0x89d   :  { %2138 = vmatmul.mubr.f32.vlgmr.msra.gmra.mrb[16].mxu0 %v5864_v0  ;;  %4227 = vmatmul.mubr.f32.vlgmr.msra.gmra.mrb[32].mxu1 %v5864_v0 }
 0x89e   :  { %5088 = vmatpush1.bf16.msra.mxu0 %v6518_v6  ;;  %5119 = vmatpush3.bf16.msra.mxu1 %v6556_v46 }
 0x89f   :  { %5090 = vmatprep.subr.bf16.mxu0 %v6522_v9  ;;  %5120 = vmatprep.subr.bf16.mxu1 %v5865_v48 }
 0x8a0   :  { %2299 = vmatprep.mubr.f32.mxu0 %v5864_v0  ;;  %4261 = vmatprep.mubr.msk.f32.mxu1 %vm5866_vm1, %v5864_v0 }
 0x8a2   :  { %5092 = vmatpush1.bf16.msra.mxu0 %v6524_v16  ;;  %5122 = vmatpush3.bf16.msra.mxu1 %v6567_v2 }
 0x8a3   :  { %5094 = vmatprep.subr.bf16.mxu0 %v6528_v31  ;;  %5123 = vmatprep.subr.bf16.mxu1 %v5865_v48 }
 0x8a6   :  { %5096 = vmatpush1.bf16.msra.mxu0 %v6530_v42  ;;  %5125 = vmatpush3.bf16.msra.mxu1 %v6573_v32 }
 0x8a7   :  { %5098 = vmatprep.subr.bf16.mxu0 %v6534_v53  ;;  %5126 = vmatprep.subr.bf16.mxu1 %v5865_v48 }
 0x8aa   :  { %5100 = vmatpush1.bf16.msra.mxu0 %v6536_v63  ;;  %5128 = vmatpush3.bf16.msra.mxu1 %v6576_v17 }
 0x8ab   :  { %5102 = vmatprep.subr.bf16.mxu0 %v6540_v10  ;;  %5129 = vmatprep.subr.bf16.mxu1 %v5865_v48 }
 0x8ae   :  { %5104 = vmatpush1.bf16.msra.mxu0 %v6542_v21  ;;  %5131 = vmatpush3.bf16.msra.mxu1 %v6580_v22 }
 0x8af   :  { %5106 = vmatprep.subr.bf16.mxu0 %v6546_v34  ;;  %5132 = vmatprep.subr.bf16.mxu1 %v5865_v48 }
 0x8b2   :  { %5108 = vmatpush1.bf16.msra.mxu0 %v6548_v20  ;;  %5134 = vmatpush3.bf16.msra.mxu1 %v6584_v40 }
 0x8b3   :  { %5110 = vmatprep.subr.bf16.mxu0 %v6551_v30  ;;  %5135 = vmatprep.subr.bf16.mxu1 %v5865_v48 }
 0x8b6   :  { %5112 = vmatpush1.bf16.msra.mxu0 %v6554_v50  ;;  %5137 = vmatpush3.bf16.msra.mxu1 %v6588_v56 }
 0x8b7   :  { %5114 = vmatprep.subr.bf16.mxu0 %v6562_v43  ;;  %5138 = vmatprep.subr.bf16.mxu1 %v5865_v48 }
 0x8ba   :  { %5116 = vmatpush1.bf16.msra.mxu0 %v6564_v60  ;;  %5140 = vmatpush3.bf16.msra.mxu1 %v6592_v8 }
 0x8bb   :  { %5142 = vmatprep.subr.bf16.mxu0 %v6516_v41  ;;  %5173 = vmatprep.subr.bf16.mxu1 %v5865_v48 }
 0x96c   :  { %v6659_v33 = vpop.f32.mrb[30].mxu1 }
 0x96d   :  { %v6661_v45 = vpop.f32.mrb[31].mxu1 }
 0x970   :  { %v2139_v61 = vpop.f32.mrb[16].mxu0  ;;  %v2210_v3 = vpop.f32.mrb[32].mxu1 }
 0x971   :  { %v5517_v14 = vadd.f32 %v2139_v61, %v6665_v51  ;;  %v2141_v19 = vpop.f32.mrb[17].mxu0  ;;  %v4228_v26 = vpop.f32.mrb[33].mxu1  ;;  %v2228_v35 = vadd.f32 %v6676_v52, %v2210_v3 }
 0x972   :  { %v5518_v18 = vadd.f32 %v2141_v19, %v6670_v55 }
 0x973   :  { %v3514_v29 = vmul.f32 -1.442695, %v5517_v14 }
 0x974   :  { %v3515_v24 = vmul.f32 -1.442695, %v5518_v18 }
 0x975   :  { %5657 = vpow2.f32 %v3514_v29 }
 0x976   :  { %5659 = vpow2.f32 %v3515_v24 }
 0x97f   :  { %v5658_v59 = vpop.eup %5657 }
 0x980   :  { %v2218_v28 = vadd.f32 1.0, %v5658_v59  ;;  %v5660_v5 = vpop.eup %5659  ;;  %v2034_v59 = vadd.f32 %v6603_v39, %v6680_v47 }
 0x981   :  { %v2225_v57 = vadd.f32 1.0, %v5660_v5 }
 0x982   :  { %5661 = vrcp.f32 %v2218_v28 }
 0x98c   :  { %v5662_v38 = vpop.eup %5661 }
 0x98d   :  { %v2229_v49 = vmul.f32 %v5662_v38, %v2228_v35 }
 0x98f   :  { %v2230_v58 = vadd.f32 %v2229_v49, %v2029_v7 }
 0x991   :  { %5663 = vtanh.f32 %v2230_v58 }
 0x992   :  { %5665 = vrcp.f32 %v2225_v57 }
 0x99b   :  { %v5664_v12 = vpop.eup %5663 }
 0x99c   :  { %v2232_v25 = vsub.f32 0.0, %v5664_v12  ;;  %v5666_v13 = vpop.eup %5665 }
 0x99e   :  { %v2233_v15 = vmul.f32 %v5666_v13, %v2232_v25 }
 0x9a0   :  { %v6685_v1 = vadd.f32 %v5664_v12, %v2233_v15 }
 0x9a2   :  { %2300 = vmatmul.mubr.f32.vlgmr.msra.gmra.mrb[18].mxu0 %v6685_v1  ;;  %4262 = vmatmul.mubr.f32.vlgmr.msra.gmra.mrb[34].mxu1 %v6685_v1 }
 0x9a3   :  { %5144 = vmatpush1.bf16.msra.mxu0 %v6518_v6  ;;  %5175 = vmatpush3.bf16.msra.mxu1 %v6556_v46 }
 0x9a4   :  { %5146 = vmatprep.subr.bf16.mxu0 %v6522_v9  ;;  %5176 = vmatprep.subr.bf16.mxu1 %v5865_v48 }
 0x9a5   :  { %2461 = vmatprep.mubr.f32.mxu0 %v5864_v0  ;;  %4296 = vmatprep.mubr.msk.f32.mxu1 %vm5866_vm1, %v5864_v0 }
 0x9a7   :  { %5148 = vmatpush1.bf16.msra.mxu0 %v6524_v16  ;;  %5178 = vmatpush3.bf16.msra.mxu1 %v6567_v2 }
 0x9a8   :  { %5150 = vmatprep.subr.bf16.mxu0 %v6528_v31  ;;  %5179 = vmatprep.subr.bf16.mxu1 %v5865_v48 }
 0x9ab   :  { %5152 = vmatpush1.bf16.msra.mxu0 %v6530_v42  ;;  %5181 = vmatpush3.bf16.msra.mxu1 %v6573_v32 }
 0x9ac   :  { %5154 = vmatprep.subr.bf16.mxu0 %v6534_v53  ;;  %5182 = vmatprep.subr.bf16.mxu1 %v5865_v48 }
 0x9af   :  { %5156 = vmatpush1.bf16.msra.mxu0 %v6536_v63  ;;  %5184 = vmatpush3.bf16.msra.mxu1 %v6576_v17 }
 0x9b0   :  { %5158 = vmatprep.subr.bf16.mxu0 %v6540_v10  ;;  %5185 = vmatprep.subr.bf16.mxu1 %v5865_v48 }
 0x9b3   :  { %5160 = vmatpush1.bf16.msra.mxu0 %v6542_v21  ;;  %5187 = vmatpush3.bf16.msra.mxu1 %v6580_v22 }
 0x9b4   :  { %5162 = vmatprep.subr.bf16.mxu0 %v6546_v34  ;;  %5188 = vmatprep.subr.bf16.mxu1 %v5865_v48 }
 0x9b7   :  { %5164 = vmatpush1.bf16.msra.mxu0 %v6548_v20  ;;  %5190 = vmatpush3.bf16.msra.mxu1 %v6584_v40 }
 0x9b8   :  { %5166 = vmatprep.subr.bf16.mxu0 %v6551_v30  ;;  %5191 = vmatprep.subr.bf16.mxu1 %v5865_v48 }
 0x9bb   :  { %5168 = vmatpush1.bf16.msra.mxu0 %v6554_v50  ;;  %5193 = vmatpush3.bf16.msra.mxu1 %v6588_v56 }
 0x9bc   :  { %5170 = vmatprep.subr.bf16.mxu0 %v6562_v43  ;;  %5194 = vmatprep.subr.bf16.mxu1 %v5865_v48 }
 0x9bf   :  { %5172 = vmatpush1.bf16.msra.mxu0 %v6564_v60  ;;  %5196 = vmatpush3.bf16.msra.mxu1 %v6592_v8 }
 0x9c0   :  { %5198 = vmatprep.subr.bf16.mxu0 %v6516_v41  ;;  %5229 = vmatprep.subr.bf16.mxu1 %v5865_v48 }
 0xa75   :  { %v2301_v36 = vpop.f32.mrb[18].mxu0  ;;  %v2372_v37 = vpop.f32.mrb[34].mxu1 }
 0xa76   :  { %v5519_v11 = vadd.f32 %v2301_v36, %v6665_v51  ;;  %v2303_v23 = vpop.f32.mrb[19].mxu0  ;;  %v4263_v27 = vpop.f32.mrb[35].mxu1  ;;  %v2390_v18 = vadd.f32 %v6676_v52, %v2372_v37 }
 0xa77   :  { %v5520_v3 = vadd.f32 %v2303_v23, %v6670_v55 }
 0xa78   :  { %v3516_v61 = vmul.f32 -1.442695, %v5519_v11 }
 0xa79   :  { %v3517_v14 = vmul.f32 -1.442695, %v5520_v3 }
 0xa7a   :  { %5667 = vpow2.f32 %v3516_v61 }
 0xa7b   :  { %5669 = vpow2.f32 %v3517_v14  ;;  %v2039_v14 = vadd.f32 %v6609_v62, %v6680_v47 }
 0xa84   :  { %v5668_v19 = vpop.eup %5667 }
 0xa85   :  { %v2380_v26 = vadd.f32 1.0, %v5668_v19  ;;  %v5670_v29 = vpop.eup %5669 }
 0xa86   :  { %v2387_v5 = vadd.f32 1.0, %v5670_v29 }
 0xa87   :  { %5671 = vrcp.f32 %v2380_v26 }
 0xa91   :  { %v5672_v24 = vpop.eup %5671 }
 0xa92   :  { %v2391_v28 = vmul.f32 %v5672_v24, %v2390_v18 }
 0xa94   :  { %v2392_v35 = vadd.f32 %v2391_v28, %v2034_v59 }
 0xa96   :  { %5673 = vtanh.f32 %v2392_v35 }
 0xa97   :  { %5675 = vrcp.f32 %v2387_v5 }
 0xaa0   :  { %v5674_v38 = vpop.eup %5673 }
 0xaa1   :  { %v2394_v7 = vsub.f32 %v6685_v1, %v5674_v38  ;;  %v5676_v49 = vpop.eup %5675 }
 0xaa3   :  { %v2395_v57 = vmul.f32 %v5676_v49, %v2394_v7 }
 0xaa5   :  { %v6730_v58 = vadd.f32 %v5674_v38, %v2395_v57 }
 0xaa7   :  { %2462 = vmatmul.mubr.f32.vlgmr.msra.gmra.mrb[20].mxu0 %v6730_v58  ;;  %4297 = vmatmul.mubr.f32.vlgmr.msra.gmra.mrb[36].mxu1 %v6730_v58 }
 0xaa8   :  { %5200 = vmatpush1.bf16.msra.mxu0 %v6518_v6  ;;  %5231 = vmatpush3.bf16.msra.mxu1 %v6556_v46 }
 0xaa9   :  { %5202 = vmatprep.subr.bf16.mxu0 %v6522_v9  ;;  %5232 = vmatprep.subr.bf16.mxu1 %v5865_v48 }
 0xaaa   :  { %2623 = vmatprep.mubr.f32.mxu0 %v5864_v0  ;;  %4331 = vmatprep.mubr.msk.f32.mxu1 %vm5866_vm1, %v5864_v0 }
 0xaac   :  { %5204 = vmatpush1.bf16.msra.mxu0 %v6524_v16  ;;  %5234 = vmatpush3.bf16.msra.mxu1 %v6567_v2 }
 0xaad   :  { %5206 = vmatprep.subr.bf16.mxu0 %v6528_v31  ;;  %5235 = vmatprep.subr.bf16.mxu1 %v5865_v48 }
 0xab0   :  { %5208 = vmatpush1.bf16.msra.mxu0 %v6530_v42  ;;  %5237 = vmatpush3.bf16.msra.mxu1 %v6573_v32 }
 0xab1   :  { %5210 = vmatprep.subr.bf16.mxu0 %v6534_v53  ;;  %5238 = vmatprep.subr.bf16.mxu1 %v5865_v48 }
 0xab4   :  { %5212 = vmatpush1.bf16.msra.mxu0 %v6536_v63  ;;  %5240 = vmatpush3.bf16.msra.mxu1 %v6576_v17 }
 0xab5   :  { %5214 = vmatprep.subr.bf16.mxu0 %v6540_v10  ;;  %5241 = vmatprep.subr.bf16.mxu1 %v5865_v48 }
 0xab8   :  { %5216 = vmatpush1.bf16.msra.mxu0 %v6542_v21  ;;  %5243 = vmatpush3.bf16.msra.mxu1 %v6580_v22 }
 0xab9   :  { %5218 = vmatprep.subr.bf16.mxu0 %v6546_v34  ;;  %5244 = vmatprep.subr.bf16.mxu1 %v5865_v48 }
 0xabc   :  { %5220 = vmatpush1.bf16.msra.mxu0 %v6548_v20  ;;  %5246 = vmatpush3.bf16.msra.mxu1 %v6584_v40 }
 0xabd   :  { %5222 = vmatprep.subr.bf16.mxu0 %v6551_v30  ;;  %5247 = vmatprep.subr.bf16.mxu1 %v5865_v48 }
 0xac0   :  { %5224 = vmatpush1.bf16.msra.mxu0 %v6554_v50  ;;  %5249 = vmatpush3.bf16.msra.mxu1 %v6588_v56 }
 0xac1   :  { %5226 = vmatprep.subr.bf16.mxu0 %v6562_v43  ;;  %5250 = vmatprep.subr.bf16.mxu1 %v5865_v48 }
 0xac4   :  { %5228 = vmatpush1.bf16.msra.mxu0 %v6564_v60  ;;  %5252 = vmatpush3.bf16.msra.mxu1 %v6592_v8 }
 0xac5   :  { %5254 = vmatprep.subr.bf16.mxu0 %v6516_v41  ;;  %5285 = vmatprep.subr.bf16.mxu1 %v5865_v48 }
 0xb7a   :  { %v2463_v39 = vpop.f32.mrb[20].mxu0  ;;  %v2534_v12 = vpop.f32.mrb[36].mxu1 }
 0xb7b   :  { %v5521_v25 = vadd.f32 %v2463_v39, %v6665_v51  ;;  %v2465_v13 = vpop.f32.mrb[21].mxu0  ;;  %v4298_v15 = vpop.f32.mrb[37].mxu1  ;;  %v2552_v61 = vadd.f32 %v6676_v52, %v2534_v12 }
 0xb7c   :  { %v5522_v36 = vadd.f32 %v2465_v13, %v6670_v55 }
 0xb7d   :  { %v3518_v1 = vmul.f32 -1.442695, %v5521_v25 }
 0xb7e   :  { %v3519_v37 = vmul.f32 -1.442695, %v5522_v36  ;;  %v2044_v36 = vadd.f32 %v6607_v44, %v6680_v47 }
 0xb7f   :  { %5677 = vpow2.f32 %v3518_v1 }
 0xb80   :  { %5679 = vpow2.f32 %v3519_v37 }
 0xb89   :  { %v5678_v11 = vpop.eup %5677 }
 0xb8a   :  { %v2542_v23 = vadd.f32 1.0, %v5678_v11  ;;  %v5680_v27 = vpop.eup %5679 }
 0xb8b   :  { %v2549_v29 = vadd.f32 1.0, %v5680_v27 }
 0xb8c   :  { %5681 = vrcp.f32 %v2542_v23 }
 0xb96   :  { %v5682_v3 = vpop.eup %5681 }
 0xb97   :  { %v2553_v19 = vmul.f32 %v5682_v3, %v2552_v61 }
 0xb99   :  { %v2554_v26 = vadd.f32 %v2553_v19, %v2039_v14 }
 0xb9b   :  { %5683 = vtanh.f32 %v2554_v26 }
 0xb9c   :  { %5685 = vrcp.f32 %v2549_v29 }
 0xba5   :  { %v5684_v18 = vpop.eup %5683 }
 0xba6   :  { %v2556_v24 = vsub.f32 %v6730_v58, %v5684_v18  ;;  %v5686_v59 = vpop.eup %5685 }
 0xba8   :  { %v2557_v28 = vmul.f32 %v5686_v59, %v2556_v24 }
 0xbaa   :  { %v6775_v35 = vadd.f32 %v5684_v18, %v2557_v28 }
 0xbac   :  { %2624 = vmatmul.mubr.f32.vlgmr.msra.gmra.mrb[22].mxu0 %v6775_v35  ;;  %4332 = vmatmul.mubr.f32.vlgmr.msra.gmra.mrb[38].mxu1 %v6775_v35 }
 0xbad   :  { %5256 = vmatpush1.bf16.msra.mxu0 %v6518_v6  ;;  %5287 = vmatpush3.bf16.msra.mxu1 %v6556_v46 }
 0xbae   :  { %5258 = vmatprep.subr.bf16.mxu0 %v6522_v9  ;;  %5288 = vmatprep.subr.bf16.mxu1 %v5865_v48 }
 0xbaf   :  { %2785 = vmatprep.mubr.f32.mxu0 %v5864_v0  ;;  %4366 = vmatprep.mubr.msk.f32.mxu1 %vm5866_vm1, %v5864_v0 }
 0xbb1   :  { %5260 = vmatpush1.bf16.msra.mxu0 %v6524_v16  ;;  %5290 = vmatpush3.bf16.msra.mxu1 %v6567_v2 }
 0xbb2   :  { %5262 = vmatprep.subr.bf16.mxu0 %v6528_v31  ;;  %5291 = vmatprep.subr.bf16.mxu1 %v5865_v48 }
 0xbb5   :  { %5264 = vmatpush1.bf16.msra.mxu0 %v6530_v42  ;;  %5293 = vmatpush3.bf16.msra.mxu1 %v6573_v32 }
 0xbb6   :  { %5266 = vmatprep.subr.bf16.mxu0 %v6534_v53  ;;  %5294 = vmatprep.subr.bf16.mxu1 %v5865_v48 }
 0xbb9   :  { %5268 = vmatpush1.bf16.msra.mxu0 %v6536_v63  ;;  %5296 = vmatpush3.bf16.msra.mxu1 %v6576_v17 }
 0xbba   :  { %5270 = vmatprep.subr.bf16.mxu0 %v6540_v10  ;;  %5297 = vmatprep.subr.bf16.mxu1 %v5865_v48 }
 0xbbd   :  { %5272 = vmatpush1.bf16.msra.mxu0 %v6542_v21  ;;  %5299 = vmatpush3.bf16.msra.mxu1 %v6580_v22 }
 0xbbe   :  { %5274 = vmatprep.subr.bf16.mxu0 %v6546_v34  ;;  %5300 = vmatprep.subr.bf16.mxu1 %v5865_v48 }
 0xbc1   :  { %5276 = vmatpush1.bf16.msra.mxu0 %v6548_v20  ;;  %5302 = vmatpush3.bf16.msra.mxu1 %v6584_v40 }
 0xbc2   :  { %5278 = vmatprep.subr.bf16.mxu0 %v6551_v30  ;;  %5303 = vmatprep.subr.bf16.mxu1 %v5865_v48 }
 0xbc5   :  { %5280 = vmatpush1.bf16.msra.mxu0 %v6554_v50  ;;  %5305 = vmatpush3.bf16.msra.mxu1 %v6588_v56 }
 0xbc6   :  { %5282 = vmatprep.subr.bf16.mxu0 %v6562_v43  ;;  %5306 = vmatprep.subr.bf16.mxu1 %v5865_v48 }
 0xbc9   :  { %5284 = vmatpush1.bf16.msra.mxu0 %v6564_v60  ;;  %5308 = vmatpush3.bf16.msra.mxu1 %v6592_v8 }
 0xbca   :  { %5310 = vmatprep.subr.bf16.mxu0 %v6516_v41  ;;  %5341 = vmatprep.subr.bf16.mxu1 %v5865_v48 }
 0xc7f   :  { %v2625_v62 = vpop.f32.mrb[22].mxu0  ;;  %v2696_v5 = vpop.f32.mrb[38].mxu1 }
 0xc80   :  { %v5523_v38 = vadd.f32 %v2625_v62, %v6665_v51  ;;  %v2627_v7 = vpop.f32.mrb[23].mxu0  ;;  %v4333_v49 = vpop.f32.mrb[39].mxu1  ;;  %v2714_v15 = vadd.f32 %v6676_v52, %v2696_v5 }
 0xc81   :  { %v5524_v58 = vadd.f32 %v2627_v7, %v6670_v55 }
 0xc82   :  { %v3520_v57 = vmul.f32 -1.442695, %v5523_v38 }
 0xc83   :  { %v3521_v39 = vmul.f32 -1.442695, %v5524_v58 }
 0xc84   :  { %5687 = vpow2.f32 %v3520_v57  ;;  %v2049_v57 = vadd.f32 %v6613_v4, %v6680_v47 }
 0xc85   :  { %5689 = vpow2.f32 %v3521_v39 }
 0xc8e   :  { %v5688_v12 = vpop.eup %5687 }
 0xc8f   :  { %v2704_v25 = vadd.f32 1.0, %v5688_v12  ;;  %v5690_v13 = vpop.eup %5689 }
 0xc90   :  { %v2711_v23 = vadd.f32 1.0, %v5690_v13 }
 0xc91   :  { %5691 = vrcp.f32 %v2704_v25 }
 0xc9b   :  { %v5692_v1 = vpop.eup %5691 }
 0xc9c   :  { %v2715_v37 = vmul.f32 %v5692_v1, %v2714_v15 }
 0xc9e   :  { %v2716_v11 = vadd.f32 %v2715_v37, %v2044_v36 }
 0xca0   :  { %5693 = vtanh.f32 %v2716_v11 }
 0xca1   :  { %5695 = vrcp.f32 %v2711_v23 }
 0xcaa   :  { %v5694_v27 = vpop.eup %5693 }
 0xcab   :  { %v2718_v61 = vsub.f32 %v6775_v35, %v5694_v27  ;;  %v5696_v3 = vpop.eup %5695 }
 0xcad   :  { %v2719_v14 = vmul.f32 %v5696_v3, %v2718_v61 }
 0xcaf   :  { %v6820_v19 = vadd.f32 %v5694_v27, %v2719_v14 }
 0xcb1   :  { %2786 = vmatmul.mubr.f32.vlgmr.msra.gmra.mrb[24].mxu0 %v6820_v19  ;;  %4367 = vmatmul.mubr.f32.vlgmr.msra.gmra.mrb[40].mxu1 %v6820_v19 }
 0xcb2   :  { %5312 = vmatpush1.bf16.msra.mxu0 %v6518_v6  ;;  %5343 = vmatpush3.bf16.msra.mxu1 %v6556_v46 }
 0xcb3   :  { %5314 = vmatprep.subr.bf16.mxu0 %v6522_v9  ;;  %5344 = vmatprep.subr.bf16.mxu1 %v5865_v48 }
 0xcb4   :  { %2947 = vmatprep.mubr.f32.mxu0 %v5864_v0  ;;  %4401 = vmatprep.mubr.msk.f32.mxu1 %vm5866_vm1, %v5864_v0 }
 0xcb6   :  { %5316 = vmatpush1.bf16.msra.mxu0 %v6524_v16  ;;  %5346 = vmatpush3.bf16.msra.mxu1 %v6567_v2 }
 0xcb7   :  { %5318 = vmatprep.subr.bf16.mxu0 %v6528_v31  ;;  %5347 = vmatprep.subr.bf16.mxu1 %v5865_v48 }
 0xcba   :  { %5320 = vmatpush1.bf16.msra.mxu0 %v6530_v42  ;;  %5349 = vmatpush3.bf16.msra.mxu1 %v6573_v32 }
 0xcbb   :  { %5322 = vmatprep.subr.bf16.mxu0 %v6534_v53  ;;  %5350 = vmatprep.subr.bf16.mxu1 %v5865_v48 }
 0xcbe   :  { %5324 = vmatpush1.bf16.msra.mxu0 %v6536_v63  ;;  %5352 = vmatpush3.bf16.msra.mxu1 %v6576_v17 }
 0xcbf   :  { %5326 = vmatprep.subr.bf16.mxu0 %v6540_v10  ;;  %5353 = vmatprep.subr.bf16.mxu1 %v5865_v48 }
 0xcc2   :  { %5328 = vmatpush1.bf16.msra.mxu0 %v6542_v21  ;;  %5355 = vmatpush3.bf16.msra.mxu1 %v6580_v22 }
 0xcc3   :  { %5330 = vmatprep.subr.bf16.mxu0 %v6546_v34  ;;  %5356 = vmatprep.subr.bf16.mxu1 %v5865_v48 }
 0xcc6   :  { %5332 = vmatpush1.bf16.msra.mxu0 %v6548_v20  ;;  %5358 = vmatpush3.bf16.msra.mxu1 %v6584_v40 }
 0xcc7   :  { %5334 = vmatprep.subr.bf16.mxu0 %v6551_v30  ;;  %5359 = vmatprep.subr.bf16.mxu1 %v5865_v48 }
 0xcca   :  { %5336 = vmatpush1.bf16.msra.mxu0 %v6554_v50  ;;  %5361 = vmatpush3.bf16.msra.mxu1 %v6588_v56 }
 0xccb   :  { %5338 = vmatprep.subr.bf16.mxu0 %v6562_v43  ;;  %5362 = vmatprep.subr.bf16.mxu1 %v5865_v48 }
 0xcce   :  { %5340 = vmatpush1.bf16.msra.mxu0 %v6564_v60  ;;  %5364 = vmatpush3.bf16.msra.mxu1 %v6592_v8 }
 0xccf   :  { %5366 = vmatprep.subr.bf16.mxu0 %v6516_v41  ;;  %5397 = vmatprep.subr.bf16.mxu1 %v5865_v48 }
 0xd84   :  { %v2787_v44 = vpop.f32.mrb[24].mxu0  ;;  %v2858_v26 = vpop.f32.mrb[40].mxu1 }
 0xd85   :  { %v5525_v29 = vadd.f32 %v2787_v44, %v6665_v51  ;;  %v2789_v18 = vpop.f32.mrb[25].mxu0  ;;  %v4368_v24 = vpop.f32.mrb[41].mxu1  ;;  %v2876_v7 = vadd.f32 %v6676_v52, %v2858_v26 }
 0xd86   :  { %v5526_v28 = vadd.f32 %v2789_v18, %v6670_v55  ;;  %v2054_v18 = vadd.f32 %v6611_v54, %v6680_v47  ;;  %v3370_v54 = vld [vmem:[#allocation9 + $0x8] sm:$0xff] }
 0xd87   :  { %v3522_v59 = vmul.f32 -1.442695, %v5525_v29 }
 0xd88   :  { %v3523_v35 = vmul.f32 -1.442695, %v5526_v28 }
 0xd89   :  { %5697 = vpow2.f32 %v3522_v59 }
 0xd8a   :  { %5699 = vpow2.f32 %v3523_v35 }
 0xd93   :  { %v5698_v62 = vpop.eup %5697 }
 0xd94   :  { %v2866_v5 = vadd.f32 1.0, %v5698_v62  ;;  %v5700_v38 = vpop.eup %5699 }
 0xd95   :  { %v2873_v12 = vadd.f32 1.0, %v5700_v38 }
 0xd96   :  { %5701 = vrcp.f32 %v2866_v5 }
 0xda0   :  { %v5702_v49 = vpop.eup %5701 }
 0xda1   :  { %v2877_v58 = vmul.f32 %v5702_v49, %v2876_v7  ;;  %v3371_v49 = vld [vmem:[#allocation9 + $0x10] sm:$0xff] }
 0xda3   :  { %v2878_v39 = vadd.f32 %v2877_v58, %v2049_v57  ;;  %v3372_v57 = vld [vmem:[#allocation9 + $0x18] sm:$0xff] }
 0xda4   :  { %v5481_v58 = vpack.c.bf16 %v3372_v57, %v3371_v49 }
 0xda5   :  { %5703 = vtanh.f32 %v2878_v39  ;;  %v3373_v39 = vld [vmem:[#allocation9 + $0x20] sm:$0xff] }
 0xda6   :  { %5705 = vrcp.f32 %v2873_v12  ;;  %v3374_v12 = vld [vmem:[#allocation9 + $0x28] sm:$0xff] }
 0xdaf   :  { %v5704_v25 = vpop.eup %5703 }
 0xdb0   :  { %v2880_v13 = vsub.f32 %v6820_v19, %v5704_v25  ;;  %v5706_v15 = vpop.eup %5705 }
 0xdb2   :  { %v2881_v1 = vmul.f32 %v5706_v15, %v2880_v13  ;;  %v3375_v13 = vld [vmem:[#allocation9 + $0x30] sm:$0xff] }
 0xdb4   :  { %v6865_v36 = vadd.f32 %v5704_v25, %v2881_v1  ;;  %v5484_v25 = vpack.c.bf16 %v3374_v12, %v3373_v39  ;;  %v3377_v1 = vld [vmem:[#allocation9 + $0x40] sm:$0xff] }
 0xdb6   :  { %2948 = vmatmul.mubr.f32.vlgmr.msra.gmra.mrb[26].mxu0 %v6865_v36  ;;  %4402 = vmatmul.mubr.f32.vlgmr.msra.gmra.mrb[42].mxu1 %v6865_v36 }
 0xdb7   :  { %5368 = vmatpush1.bf16.msra.mxu0 %v6518_v6  ;;  %5399 = vmatpush3.bf16.msra.mxu1 %v6556_v46 }
 0xdb8   :  { %5370 = vmatprep.subr.bf16.mxu0 %v6522_v9  ;;  %5400 = vmatprep.subr.bf16.mxu1 %v5865_v48 }
 0xdb9   :  { %3109 = vmatprep.mubr.f32.mxu0 %v5864_v0  ;;  %4436 = vmatprep.mubr.msk.f32.mxu1 %vm5866_vm1, %v5864_v0 }
 0xdbb   :  { %5372 = vmatpush1.bf16.msra.mxu0 %v6524_v16  ;;  %5402 = vmatpush3.bf16.msra.mxu1 %v6567_v2 }
 0xdbc   :  { %5374 = vmatprep.subr.bf16.mxu0 %v6528_v31  ;;  %5403 = vmatprep.subr.bf16.mxu1 %v5865_v48 }
 0xdbf   :  { %5376 = vmatpush1.bf16.msra.mxu0 %v6530_v42  ;;  %5405 = vmatpush3.bf16.msra.mxu1 %v6573_v32 }
 0xdc0   :  { %5378 = vmatprep.subr.bf16.mxu0 %v6534_v53  ;;  %5406 = vmatprep.subr.bf16.mxu1 %v5865_v48 }
 0xdc3   :  { %5380 = vmatpush1.bf16.msra.mxu0 %v6536_v63  ;;  %5408 = vmatpush3.bf16.msra.mxu1 %v6576_v17 }
 0xdc4   :  { %5382 = vmatprep.subr.bf16.mxu0 %v6540_v10  ;;  %5409 = vmatprep.subr.bf16.mxu1 %v5865_v48 }
 0xdc7   :  { %5384 = vmatpush1.bf16.msra.mxu0 %v6542_v21  ;;  %5411 = vmatpush3.bf16.msra.mxu1 %v6580_v22 }
 0xdc8   :  { %5386 = vmatprep.subr.bf16.mxu0 %v6546_v34  ;;  %5412 = vmatprep.subr.bf16.mxu1 %v5865_v48 }
 0xdcb   :  { %5388 = vmatpush1.bf16.msra.mxu0 %v6548_v20  ;;  %5414 = vmatpush3.bf16.msra.mxu1 %v6584_v40 }
 0xdcc   :  { %5390 = vmatprep.subr.bf16.mxu0 %v6551_v30  ;;  %5415 = vmatprep.subr.bf16.mxu1 %v5865_v48 }
 0xdcf   :  { %5392 = vmatpush1.bf16.msra.mxu0 %v6554_v50  ;;  %5417 = vmatpush3.bf16.msra.mxu1 %v6588_v56 }
 0xdd0   :  { %5394 = vmatprep.subr.bf16.mxu0 %v6562_v43  ;;  %5418 = vmatprep.subr.bf16.mxu1 %v5865_v48 }
 0xdd3   :  { %5396 = vmatpush1.bf16.msra.mxu0 %v6564_v60  ;;  %5420 = vmatpush3.bf16.msra.mxu1 %v6592_v8 }
 0xdd4   :  { %5422 = vmatprep.subr.bf16.mxu0 %v6516_v41  ;;  %5453 = vmatprep.subr.bf16.mxu1 %v5865_v48 }
 0xe89   :  { %v2949_v4 = vpop.f32.mrb[26].mxu0  ;;  %v3020_v37 = vpop.f32.mrb[42].mxu1 }
 0xe8a   :  { %v5527_v11 = vadd.f32 %v2949_v4, %v6665_v51  ;;  %v2951_v23 = vpop.f32.mrb[27].mxu0  ;;  %v4403_v27 = vpop.f32.mrb[43].mxu1  ;;  %v3038_v41 = vadd.f32 %v6676_v52, %v3020_v37  ;;  %v3379_v4 = vld [vmem:[#allocation9 + $0x50] sm:$0xff] }
 0xe8b   :  { %v5528_v3 = vadd.f32 %v2951_v23, %v6670_v55  ;;  %v3381_v27 = vld [vmem:[#allocation9 + $0x60] sm:$0xff] }
 0xe8c   :  { %v3524_v61 = vmul.f32 -1.442695, %v5527_v11  ;;  %v3380_v11 = vld [vmem:[#allocation9 + $0x58] sm:$0xff] }
 0xe8d   :  { %v3525_v14 = vmul.f32 -1.442695, %v5528_v3  ;;  %v5493_v23 = vpack.c.bf16 %v3380_v11, %v3379_v4 }
 0xe8e   :  { %5707 = vpow2.f32 %v3524_v61  ;;  %v3382_v61 = vld [vmem:[#allocation9 + $0x68] sm:$0xff] }
 0xe8f   :  { %5709 = vpow2.f32 %v3525_v14  ;;  %v5496_v3 = vpack.c.bf16 %v3382_v61, %v3381_v27  ;;  %v3383_v14 = vld [vmem:[#allocation9 + $0x70] sm:$0xff] }
 0xe98   :  { %v5708_v19 = vpop.eup %5707 }
 0xe99   :  { %v3028_v44 = vadd.f32 1.0, %v5708_v19  ;;  %v5710_v26 = vpop.eup %5709  ;;  %v3384_v19 = vld [vmem:[#allocation9 + $0x78] sm:$0xff] }
 0xe9a   :  { %v3035_v28 = vadd.f32 1.0, %v5710_v26 }
 0xe9b   :  { %5711 = vrcp.f32 %v3028_v44  ;;  %v5499_v44 = vpack.c.bf16 %v3384_v19, %v3383_v14 }
 0xea5   :  { %v5712_v29 = vpop.eup %5711 }
 0xea6   :  { %v3039_v24 = vmul.f32 %v5712_v29, %v3038_v41 }
 0xea8   :  { %v3040_v59 = vadd.f32 %v3039_v24, %v2054_v18 }
 0xeaa   :  { %5713 = vtanh.f32 %v3040_v59 }
 0xeab   :  { %5715 = vrcp.f32 %v3035_v28 }
 0xeb4   :  { %v5714_v35 = vpop.eup %5713 }
 0xeb5   :  { %v3042_v62 = vsub.f32 %v6865_v36, %v5714_v35  ;;  %v5716_v5 = vpop.eup %5715  ;;  %v3378_v36 = vld [vmem:[#allocation9 + $0x48] sm:$0xff] }
 0xeb6   :  { %v5490_v37 = vpack.c.bf16 %v3378_v36, %v3377_v1 }
 0xeb7   :  { %v3043_v38 = vmul.f32 %v5716_v5, %v3042_v62 }
 0xeb9   :  { %v3044_v7 = vadd.f32 %v5714_v35, %v3043_v38 }
 0xebb   :  { %3110 = vmatmul.mubr.f32.vlgmr.msra.gmra.mrb[28].mxu0 %v3044_v7  ;;  %4437 = vmatmul.mubr.f32.vlgmr.msra.gmra.mrb[44].mxu1 %v3044_v7 }
 0xebc   :  { %5424 = vmatpush1.bf16.msra.mxu0 %v6518_v6  ;;  %5455 = vmatpush3.bf16.msra.mxu1 %v6556_v46  ;;  %v2059_v46 = vadd.f32 %v6661_v45, %v6680_v47 }
 0xebd   :  { %5426 = vmatprep.subr.bf16.mxu0 %v6522_v9  ;;  %5456 = vmatprep.subr.bf16.mxu1 %v5865_v48 }
 0xebe   :  { %3271 = vmatprep.mubr.f32.mxu0 %v5864_v0  ;;  %4471 = vmatprep.mubr.msk.f32.mxu1 %vm5866_vm1, %v5864_v0 }
 0xec0   :  { %5428 = vmatpush1.bf16.msra.mxu0 %v6524_v16  ;;  %5458 = vmatpush3.bf16.msra.mxu1 %v6567_v2 }
 0xec1   :  { %5430 = vmatprep.subr.bf16.mxu0 %v6528_v31  ;;  %5459 = vmatprep.subr.bf16.mxu1 %v5865_v48 }
 0xec4   :  { %5432 = vmatpush1.bf16.msra.mxu0 %v6530_v42  ;;  %5461 = vmatpush3.bf16.msra.mxu1 %v6573_v32 }
 0xec5   :  { %5434 = vmatprep.subr.bf16.mxu0 %v6534_v53  ;;  %5462 = vmatprep.subr.bf16.mxu1 %v5865_v48 }
 0xec8   :  { %5436 = vmatpush1.bf16.msra.mxu0 %v6536_v63  ;;  %5464 = vmatpush3.bf16.msra.mxu1 %v6576_v17 }
 0xec9   :  { %5438 = vmatprep.subr.bf16.mxu0 %v6540_v10  ;;  %5465 = vmatprep.subr.bf16.mxu1 %v5865_v48 }
 0xecc   :  { %5440 = vmatpush1.bf16.msra.mxu0 %v6542_v21  ;;  %5467 = vmatpush3.bf16.msra.mxu1 %v6580_v22 }
 0xecd   :  { %5442 = vmatprep.subr.bf16.mxu0 %v6546_v34  ;;  %5468 = vmatprep.subr.bf16.mxu1 %v5865_v48 }
 0xed0   :  { %5444 = vmatpush1.bf16.msra.mxu0 %v6548_v20  ;;  %5470 = vmatpush3.bf16.msra.mxu1 %v6584_v40 }
 0xed1   :  { %5446 = vmatprep.subr.bf16.mxu0 %v6551_v30  ;;  %5471 = vmatprep.subr.bf16.mxu1 %v5865_v48 }
 0xed4   :  { %5448 = vmatpush1.bf16.msra.mxu0 %v6554_v50  ;;  %5473 = vmatpush3.bf16.msra.mxu1 %v6588_v56 }
 0xed5   :  { %5450 = vmatprep.subr.bf16.mxu0 %v6562_v43  ;;  %5474 = vmatprep.subr.bf16.mxu1 %v5865_v48 }
 0xed8   :  { %5452 = vmatpush1.bf16.msra.mxu0 %v6564_v60  ;;  %5476 = vmatpush3.bf16.msra.mxu1 %v6592_v8  ;;  %v3369_v8 = vld [vmem:[#allocation9] sm:$0xff] }
 0xed9   :  { %5477 = vmatprep.subr.bf16.mxu0 %v5865_v48  ;;  %v5478_v45 = vpack.c.bf16 %v3370_v54, %v3369_v8 }
 0xf8e   :  { %v3111_v6 = vpop.f32.mrb[28].mxu0  ;;  %v3182_v9 = vpop.f32.mrb[44].mxu1 }
 0xf8f   :  { %v5529_v16 = vadd.f32 %v3111_v6, %v6665_v51  ;;  %v3113_v31 = vpop.f32.mrb[29].mxu0  ;;  %v4438_v42 = vpop.f32.mrb[45].mxu1  ;;  %v3200_v30 = vadd.f32 %v6676_v52, %v3182_v9  ;;  %v2064_v6 = vadd.f32 %v6659_v33, %v6680_v47 }
 0xf90   :  { %v5530_v63 = vadd.f32 %v3113_v31, %v6670_v55 }
 0xf91   :  { %v3526_v53 = vmul.f32 -1.442695, %v5529_v16 }
 0xf92   :  { %v3527_v10 = vmul.f32 -1.442695, %v5530_v63 }
 0xf93   :  { %5717 = vpow2.f32 %v3526_v53 }
 0xf94   :  { %5719 = vpow2.f32 %v3527_v10 }
 0xf9d   :  { %v5718_v21 = vpop.eup %5717 }
 0xf9e   :  { %v3190_v34 = vadd.f32 1.0, %v5718_v21  ;;  %v5720_v20 = vpop.eup %5719 }
 0xf9f   :  { %v3197_v2 = vadd.f32 1.0, %v5720_v20 }
 0xfa0   :  { %5721 = vrcp.f32 %v3190_v34 }
 0xfaa   :  { %v5722_v50 = vpop.eup %5721 }
 0xfab   :  { %v3201_v43 = vmul.f32 %v5722_v50, %v3200_v30 }
 0xfad   :  { %v3202_v60 = vadd.f32 %v3201_v43, %v2059_v46 }
 0xfaf   :  { %5723 = vtanh.f32 %v3202_v60 }
 0xfb0   :  { %5725 = vrcp.f32 %v3197_v2 }
 0xfb9   :  { %v5724_v32 = vpop.eup %5723 }
 0xfba   :  { %v3204_v17 = vsub.f32 %v3044_v7, %v5724_v32  ;;  %v5726_v22 = vpop.eup %5725 }
 0xfbc   :  { %v3205_v40 = vmul.f32 %v5726_v22, %v3204_v17 }
 0xfbe   :  { %v6949_v56 = vadd.f32 %v5724_v32, %v3205_v40 }
 0xfc0   :  { %3272 = vmatmul.mubr.f32.vlgmr.msra.gmra.mrb[30].mxu0 %v6949_v56  ;;  %4472 = vmatmul.mubr.f32.vlgmr.msra.gmra.mrb[46].mxu1 %v6949_v56 }
 0xfc1   :  { %4506 = vmatprep.mubr.msk.f32.mxu0 %vm5866_vm1, %v5864_v0  ;;  %5479 = vmatpush3.bf16.msra.mxu0 %v5478_v45  ;;  %v3376_v0 = vld [vmem:[#allocation9 + $0x38] sm:$0xff] }
 0xfc2   :  { %5480 = vmatprep.subr.bf16.mxu0 %v5865_v48  ;;  %v5487_v15 = vpack.c.bf16 %v3376_v0, %v3375_v13 }
 0xfc5   :  { %5482 = vmatpush3.bf16.msra.mxu0 %v5481_v58 }
 0xfc6   :  { %5483 = vmatprep.subr.bf16.mxu0 %v5865_v48 }
 0xfc9   :  { %5485 = vmatpush3.bf16.msra.mxu0 %v5484_v25 }
 0xfca   :  { %5486 = vmatprep.subr.bf16.mxu0 %v5865_v48 }
 0xfcd   :  { %5488 = vmatpush3.bf16.msra.mxu0 %v5487_v15 }
 0xfce   :  { %5489 = vmatprep.subr.bf16.mxu0 %v5865_v48 }
 0xfd1   :  { %5491 = vmatpush3.bf16.msra.mxu0 %v5490_v37 }
 0xfd2   :  { %5492 = vmatprep.subr.bf16.mxu0 %v5865_v48 }
 0xfd5   :  { %5494 = vmatpush3.bf16.msra.mxu0 %v5493_v23 }
 0xfd6   :  { %5495 = vmatprep.subr.bf16.mxu0 %v5865_v48 }
 0xfd9   :  { %5497 = vmatpush3.bf16.msra.mxu0 %v5496_v3 }
 0xfda   :  { %5498 = vmatprep.subr.bf16.mxu0 %v5865_v48 }
 0xfdd   :  { %5500 = vmatpush3.bf16.msra.mxu0 %v5499_v44 }
0x1093   :  { %v3273_v26 = vpop.f32.mrb[30].mxu0  ;;  %v3344_v41 = vpop.f32.mrb[46].mxu1 }
0x1094   :  { %v5531_v29 = vadd.f32 %v3273_v26, %v6665_v51  ;;  %v3275_v18 = vpop.f32.mrb[31].mxu0  ;;  %v4473_v24 = vpop.f32.mrb[47].mxu1  ;;  %v3362_v7 = vadd.f32 %v6676_v52, %v3344_v41  ;;  %v3530_v52 = vld [vmem:[%s6993_s10] ss:$0 sm:$0xff] }
0x1095   :  { %v5532_v28 = vadd.f32 %v3275_v18, %v6670_v55 }
0x1096   :  { %v3528_v59 = vmul.f32 -1.442695, %v5531_v29 }
0x1097   :  { %v3529_v35 = vmul.f32 -1.442695, %v5532_v28 }
0x1098   :  { %5727 = vpow2.f32 %v3528_v59 }
0x1099   :  { %5729 = vpow2.f32 %v3529_v35 }
0x10a2   :  { %v5728_v62 = vpop.eup %5727 }
0x10a3   :  { %v3352_v5 = vadd.f32 1.0, %v5728_v62  ;;  %v5730_v38 = vpop.eup %5729 }
0x10a4   :  { %v3359_v16 = vadd.f32 1.0, %v5730_v38 }
0x10a5   :  { %5731 = vrcp.f32 %v3352_v5 }
0x10af   :  { %v5732_v48 = vpop.eup %5731 }
0x10b0   :  { %v3363_v9 = vmul.f32 %v5732_v48, %v3362_v7 }
0x10b2   :  { %v3364_v51 = vadd.f32 %v3363_v9, %v2064_v6 }
0x10b4   :  { %5733 = vtanh.f32 %v3364_v51 }
0x10b5   :  { %5735 = vrcp.f32 %v3359_v16 }
0x10be   :  { %v5734_v31 = vpop.eup %5733 }
0x10bf   :  { %v3366_v55 = vsub.f32 %v6949_v56, %v5734_v31  ;;  %v5736_v42 = vpop.eup %5735 }
0x10c1   :  { %v3367_v53 = vmul.f32 %v5736_v42, %v3366_v55 }
0x10c3   :  { %v3368_v63 = vadd.f32 %v5734_v31, %v3367_v53 }
0x10c5   :  { %4507 = vmatmul.mubr.f32.vlgmr.msra.gmra.mrb[32].mxu0 %v3368_v63 }
0x1198   :  { %v3458_v10 = vpop.f32.mrb[32].mxu0 }
0x1199   :  { %v3459_v33 = vadd.f32 %v3530_v52, %v3458_v10  ;;  %v4508_v47 = vpop.f32.mrb[33].mxu0 }
0x119b   :  { %3462 = vst [vmem:[#allocation11] sm:$0xff] %v3459_v33 }
0x119c   :  { %5837 = shalt.err (!%p5834_p8)
}
0x119d   :  { %s5838_s24 = scalar_lea.hbm %s6994_s11, 128 }
0x119e   :  { %p5839_p9 = scmp.ne.s32.totalorder %s6994_s11, %s5838_s24  ;;  %p5842_p10 = scmp.lt.u32.totalorder %s5838_s24, %s6994_s11 }
0x11a0   :  { %p5844_p11 = pnand %p5842_p10, %p5839_p9 }
0x11a2   :  { %5847 = shalt.err (!%p5844_p11)
}
0x11a3   :  { %3472 = dma.vmem_to_hbm [thread:$0]  %s3470_s22, 128, %s6994_s11, [#allocation5]  }
0x11a4   :  { %5854 = dma.done.wait [#allocation5], 128  }
0x11a5   :  { %5855 = vsyncadd [#allocation5], 4294967168 }
0x11a6   :  { %3476 = vsyncpa [#allocation4], 1 }
0x11a7   :  { %3477 = vsyncpa [#allocation7], 1 }
0x11a8   :  { %3478 = vsyncpa [#allocation10], 1 }
0x11a9   :  { %3479 = vsyncpa [#allocation5], 1 }

</bundles_post_ra>
